<compile_context>
chip_gen: v7x
topology: tpu7x:2x2x1
jax: 0.10.0
libtpu: 0.0.40
codegen_flags: <defaults>
</compile_context>

<pallas_src>
import numpy as np
import jax
import jax.numpy as jnp
from jax import lax
from jax.experimental import pallas as pl
from jax.experimental.pallas import tpu as pltpu

# ----------------------------------------------------------------------------
# Geometric algebra tables for PGA(3,0,1)  (built once in numpy)
# ----------------------------------------------------------------------------
BLADES = [(), (0,), (1,), (2,), (3,),
          (0, 1), (0, 2), (0, 3), (1, 2), (1, 3), (2, 3),
          (0, 1, 2), (0, 1, 3), (0, 2, 3), (1, 2, 3), (0, 1, 2, 3)]
IDX = {b: i for i, b in enumerate(BLADES)}
METRIC = [0.0, 1.0, 1.0, 1.0]  # e0^2 = 0, e1^2 = e2^2 = e3^2 = 1


def _blade_product(a, b, metric):
    lst = list(a) + list(b)
    sign = 1.0
    n = len(lst)
    for p in range(n):
        for q in range(n - 1 - p):
            if lst[q] > lst[q + 1]:
                lst[q], lst[q + 1] = lst[q + 1], lst[q]
                sign = -sign
    out = []
    q = 0
    while q < len(lst):
        if q + 1 < len(lst) and lst[q] == lst[q + 1]:
            sign *= metric[lst[q]]
            q += 2
        else:
            out.append(lst[q])
            q += 1
    return sign, tuple(out)


def _build_tables():
    gp = np.zeros((16, 16, 16), np.float32)
    op = np.zeros((16, 16, 16), np.float32)
    for i, bi in enumerate(BLADES):
        for j, bj in enumerate(BLADES):
            s, res = _blade_product(bi, bj, METRIC)
            if s != 0.0:
                gp[IDX[res], i, j] += s
            if not (set(bi) & set(bj)):
                s2, res2 = _blade_product(bi, bj, [1.0] * 4)
                op[IDX[res2], i, j] += s2
    D = np.zeros((16, 16), np.float32)
    for i, b in enumerate(BLADES):
        comp = tuple(sorted(set(range(4)) - set(b)))
        s, res = _blade_product(b, comp, [1.0] * 4)
        assert res == (0, 1, 2, 3)
        D[IDX[comp], i] = s
    Dinv = np.linalg.inv(D).astype(np.float32)
    join = np.einsum('kl,lmn,mi,nj->kij', Dinv, op, D, D).astype(np.float32)
    basis = np.zeros((9, 16, 16), np.float32)
    for i, b in enumerate(BLADES):
        basis[len(b), i, i] = 1.0
    for i, b in enumerate(BLADES):
        if 0 not in b and len(b) <= 3:
            basis[5 + len(b), IDX[(0,) + b], i] = 1.0
    mask = np.array([0.0 if 0 in b else 1.0 for b in BLADES], np.float32)
    return gp, join, basis, mask


_GP_NP, _JOIN_NP, _BASIS_NP, _MASK_NP = _build_tables()
BASIS_J = jnp.asarray(_BASIS_NP)
INNER_MASK = jnp.asarray(_MASK_NP)

# ----------------------------------------------------------------------------
# Model configuration (matches the synthetic instantiation of the module)
# ----------------------------------------------------------------------------
C_IN_MV_SRC = 2    # num_input_channels_source
C_IN_MV_TGT = 2    # num_input_channels_target (== source -> shared input layer)
C_OUT_MV = 4       # num_output_channels
S_IN_SRC = 3       # num_input_scalars_source
S_IN_TGT = 3       # num_input_scalars_target
S_OUT = 8          # num_output_scalars
NUM_HEADS = 2      # num_attn_heads
C_LAT = C_OUT_MV   # num_latent_channels (default)

WIDTH = C_LAT * 16 + S_OUT          # 72 : latent row layout [mv_flat(64) | s(8)]
ATTN_DP = 128                       # padded per-head lane block (zeros beyond 36 used, exact)


# ----------------------------------------------------------------------------
# EquiLinear: parameter init + fusion into dense GEMM weights (offline)
# ----------------------------------------------------------------------------
def init_equilinear(key, cin_mv, cout_mv, cin_s=None, cout_s=None):
    ks = jax.random.split(key, 6)
    w9 = jax.random.normal(ks[0], (cout_mv, cin_mv, 9), jnp.float32) / np.sqrt(9.0 * cin_mv)
    wfull = jnp.einsum('oib,bkj->ijok', w9, BASIS_J).reshape(cin_mv * 16, cout_mv * 16)
    p = {'Wmv': wfull,
         'b_mv': 0.1 * jax.random.normal(ks[1], (cout_mv,), jnp.float32)}
    if cin_s is not None:
        p['W_s2mv'] = jax.random.normal(ks[2], (cin_s, cout_mv), jnp.float32) / np.sqrt(cin_s)
    if cout_s is not None:
        p['W_mvs2s'] = jax.random.normal(ks[3], (cin_mv, cout_s), jnp.float32) / np.sqrt(cin_mv)
        p['b_s'] = 0.1 * jax.random.normal(ks[4], (cout_s,), jnp.float32)
        if cin_s is not None:
            p['W_s2s'] = jax.random.normal(ks[5], (cin_s, cout_s), jnp.float32) / np.sqrt(cin_s)
    return p


def fuse_equilinear(p, cin_mv, cout_mv, cin_s, cout_s):
    """(cin_mv*16 + cin_s + 1, cout_mv*16 + cout_s) weight acting on [mv_flat | s | 1]."""
    Kdim = cin_mv * 16 + cin_s + 1
    Ndim = cout_mv * 16 + cout_s
    W = jnp.zeros((Kdim, Ndim), jnp.float32)
    W = W.at[:cin_mv * 16, :cout_mv * 16].set(p['Wmv'])
    out0 = jnp.arange(cout_mv) * 16
    if cout_s > 0 and 'W_mvs2s' in p:
        in0 = jnp.arange(cin_mv) * 16
        W = W.at[in0, cout_mv * 16:].set(p['W_mvs2s'])
        W = W.at[Kdim - 1, cout_mv * 16:].set(p['b_s'])
        if cin_s > 0 and 'W_s2s' in p:
            W = W.at[cin_mv * 16:cin_mv * 16 + cin_s, cout_mv * 16:].set(p['W_s2s'])
    if cin_s > 0 and 'W_s2mv' in p:
        W = W.at[cin_mv * 16:cin_mv * 16 + cin_s, out0].set(p['W_s2mv'])
    W = W.at[Kdim - 1, out0].set(p['b_mv'])
    return W


def _split_wb(F):
    return F[:-1, :], F[-1:, :]


# ----------------------------------------------------------------------------
# Offline constant tables (head packing, GA bilinear operators, gating, masks)
# ----------------------------------------------------------------------------
def _head_placement_np():
    """(72, H*128) 0/1 matrix: places [mv c(2h),c(2h+1) | s(4h..4h+3)] into head-h 128-lane block."""
    P = np.zeros((WIDTH, NUM_HEADS * ATTN_DP), np.float32)
    hid_mv = C_LAT // NUM_HEADS
    hid_s = S_OUT // NUM_HEADS
    for h in range(NUM_HEADS):
        base = h * ATTN_DP
        for t in range(hid_mv):
            c = h * hid_mv + t
            for b in range(16):
                P[c * 16 + b, base + t * 16 + b] = 1.0
        for j in range(hid_s):
            P[C_LAT * 16 + h * hid_s + j, base + hid_mv * 16 + j] = 1.0
    return P


def _bilinear_tables_np(ch):
    """Block-diagonal operators so that per-channel bilinear GA products become MXU matmuls:
       bil = ((x @ L) * (y @ B)) @ R  with intermediate lanes [c, j, k]."""
    blk_gp = np.transpose(_GP_NP, (1, 2, 0)).reshape(16, 256)    # [i, j*16+k] = GP[k,i,j]
    blk_jn = np.transpose(_JOIN_NP, (1, 2, 0)).reshape(16, 256)
    blk_b = np.zeros((16, 256), np.float32)
    blk_r = np.zeros((256, 16), np.float32)
    for j in range(16):
        blk_b[j, j * 16:(j + 1) * 16] = 1.0
        blk_r[j * 16:(j + 1) * 16, :] = np.eye(16, dtype=np.float32)
    L_gp = np.zeros((ch * 16, ch * 256), np.float32)
    L_jn = np.zeros((ch * 16, ch * 256), np.float32)
    B = np.zeros((ch * 16, ch * 256), np.float32)
    R = np.zeros((ch * 256, ch * 16), np.float32)
    for c in range(ch):
        L_gp[c * 16:(c + 1) * 16, c * 256:(c + 1) * 256] = blk_gp
        L_jn[c * 16:(c + 1) * 16, c * 256:(c + 1) * 256] = blk_jn
        B[c * 16:(c + 1) * 16, c * 256:(c + 1) * 256] = blk_b
        R[c * 256:(c + 1) * 256, c * 16:(c + 1) * 16] = blk_r
    return L_gp, L_jn, B, R


def _gate_table_np(nch):
    """(nch*16, nch*16): broadcasts the blade-0 lane of each channel across its 16 lanes."""
    G = np.zeros((nch * 16, nch * 16), np.float32)
    for c in range(nch):
        G[c * 16, c * 16:(c + 1) * 16] = 1.0
    return G


def _mask_table_np():
    """(4, 72) lane masks: [inner-product mask on mv lanes, mv lanes, s lanes, blade-15 lanes]."""
    M = np.zeros((4, WIDTH), np.float32)
    M[0, :C_LAT * 16] = np.tile(_MASK_NP, C_LAT)
    M[1, :C_LAT * 16] = 1.0
    M[2, C_LAT * 16:] = 1.0
    M[3, 15:C_LAT * 16:16] = 1.0
    return M


# ----------------------------------------------------------------------------
# Parameter init + one-time fusion into the kernel's constant set
# ----------------------------------------------------------------------------
def init_model(key):
    ks = jax.random.split(key, 12)
    p = {}
    p['input'] = init_equilinear(ks[0], C_IN_MV_SRC, C_LAT, S_IN_SRC, S_OUT)
    blk = {
        'attn_q': init_equilinear(ks[1], C_LAT, C_LAT, S_OUT, S_OUT),
        'attn_k': init_equilinear(ks[2], C_LAT, C_LAT, S_OUT, S_OUT),
        'attn_v': init_equilinear(ks[3], C_LAT, C_LAT, S_OUT, S_OUT),
        'attn_out': init_equilinear(ks[4], C_LAT, C_LAT, S_OUT, S_OUT),
        'mlp_left': init_equilinear(ks[5], C_LAT, 2 * C_LAT, S_OUT, None),
        'mlp_right': init_equilinear(ks[6], C_LAT, 2 * C_LAT, S_OUT, None),
        'mlp_s_w': jax.random.normal(ks[7], (S_OUT, 2 * S_OUT), jnp.float32) / np.sqrt(S_OUT),
        'mlp_s_b': 0.1 * jax.random.normal(ks[8], (2 * S_OUT,), jnp.float32),
        'mlp_out': init_equilinear(ks[9], 2 * C_LAT, C_LAT, 2 * S_OUT, S_OUT),
    }
    p['block'] = blk
    p['output'] = init_equilinear(ks[10], C_LAT, C_OUT_MV, S_OUT, S_OUT)
    return p


CONST_KEYS = ['w_in', 'b_in', 'w_kv', 'b_kv', 'w_q', 'b_q', 'w_ao', 'b_ao',
              'w_mi', 'b_mi', 'w_mo', 'b_mo', 'w_out', 'b_out',
              'bil_lg', 'bil_lj', 'bil_b', 'bil_r', 'gate', 'masks']


def prepare_fused(params):
    """Pre-expand every EquiLinear into dense (W, b); fold softmax scale, e0-mask and head
    packing/padding into the weights (all done once, offline)."""
    c = {}
    c['w_in'], c['b_in'] = _split_wb(
        fuse_equilinear(params['input'], C_IN_MV_SRC, C_LAT, S_IN_SRC, S_OUT))   # (35,72)

    blk = params['block']
    Wq, bq = _split_wb(fuse_equilinear(blk['attn_q'], C_LAT, C_LAT, S_OUT, S_OUT))
    Wk, bk = _split_wb(fuse_equilinear(blk['attn_k'], C_LAT, C_LAT, S_OUT, S_OUT))
    Wv, bv = _split_wb(fuse_equilinear(blk['attn_v'], C_LAT, C_LAT, S_OUT, S_OUT))

    # fold degenerate-metric mask (mv columns) and softmax scale (all columns) into Q
    d_head = 16 * (C_LAT // NUM_HEADS) + S_OUT // NUM_HEADS      # 36 (unpadded per-head width)
    scale = 1.0 / np.sqrt(float(d_head))
    qcol = jnp.concatenate([jnp.tile(INNER_MASK, C_LAT),
                            jnp.ones((S_OUT,), jnp.float32)]) * scale
    Wq = Wq * qcol[None, :]
    bq = bq * qcol[None, :]

    P = jnp.asarray(_head_placement_np())                        # (72, 256)
    c['w_q'], c['b_q'] = Wq @ P, bq @ P                          # (72,256), (1,256)
    c['w_kv'] = jnp.concatenate([Wk @ P, Wv @ P], axis=1)        # (72, 512)
    c['b_kv'] = jnp.concatenate([bk @ P, bv @ P], axis=1)        # (1, 512)

    Wao, bao = _split_wb(fuse_equilinear(blk['attn_out'], C_LAT, C_LAT, S_OUT, S_OUT))
    c['w_ao'], c['b_ao'] = P.T @ Wao, bao                        # (256,72), (1,72)

    Wl, bl = _split_wb(fuse_equilinear(blk['mlp_left'], C_LAT, 2 * C_LAT, S_OUT, 0))
    Wr, br = _split_wb(fuse_equilinear(blk['mlp_right'], C_LAT, 2 * C_LAT, S_OUT, 0))
    Ws_full = jnp.zeros((WIDTH, 2 * S_OUT), jnp.float32).at[C_LAT * 16:, :].set(blk['mlp_s_w'])
    c['w_mi'] = jnp.concatenate([Wl, Wr, Ws_full], axis=1)       # (72, 272)
    c['b_mi'] = jnp.concatenate([bl, br, blk['mlp_s_b'][None, :]], axis=1)   # (1, 272)

    c['w_mo'], c['b_mo'] = _split_wb(
        fuse_equilinear(blk['mlp_out'], 2 * C_LAT, C_LAT, 2 * S_OUT, S_OUT))  # (144,72)
    c['w_out'], c['b_out'] = _split_wb(
        fuse_equilinear(params['output'], C_LAT, C_OUT_MV, S_OUT, S_OUT))     # (72,72)

    Lg, Lj, B, R = _bilinear_tables_np(C_LAT)
    c['bil_lg'] = jnp.asarray(Lg)                                # (64, 1024)
    c['bil_lj'] = jnp.asarray(Lj)                                # (64, 1024)
    c['bil_b'] = jnp.asarray(B)                                  # (64, 1024)
    c['bil_r'] = jnp.asarray(R)                                  # (1024, 64)
    c['gate'] = jnp.asarray(_gate_table_np(2 * C_LAT))           # (128, 128)
    c['masks'] = jnp.asarray(_mask_table_np())                   # (4, 72)
    return c


# ----------------------------------------------------------------------------
# The single fused forward kernel
# ----------------------------------------------------------------------------
def _fused_forward_kernel(
        a_src_ref, a_tgt_ref,
        w_in_ref, b_in_ref, w_kv_ref, b_kv_ref, w_q_ref, b_q_ref,
        w_ao_ref, b_ao_ref, w_mi_ref, b_mi_ref, w_mo_ref, b_mo_ref,
        w_out_ref, b_out_ref,
        bil_lg_ref, bil_lj_ref, bil_b_ref, bil_r_ref, gate_ref, masks_ref,
        o_mv_ref, o_s_ref):
    f32 = jnp.float32
    nt = a_tgt_ref.shape[0]

    masks = masks_ref[...]
    m_inner = masks[0:1, :]      # inner-product mask on mv lanes (e0 components dropped)
    m_mv = masks[1:2, :]         # 1 on multivector lanes
    m_s = masks[2:3, :]          # 1 on scalar lanes
    m_15 = masks[3:4, :]         # 1 on e0123 lanes

    def mm(x, w_ref, b_ref):
        return jnp.dot(x, w_ref[...], preferred_element_type=f32) + b_ref[...]

    def eqln(x):                 # equivariant layer norm on flat [mv(64)|s(8)] rows
        mv_norm = jnp.sum(x * x * m_inner, axis=-1, keepdims=True) * (1.0 / C_LAT)
        inv_mv = lax.rsqrt(mv_norm + 0.01)
        mu = jnp.sum(x * m_s, axis=-1, keepdims=True) * (1.0 / S_OUT)
        var = jnp.sum(jnp.square(x - mu) * m_s, axis=-1, keepdims=True) * (1.0 / S_OUT)
        inv_s = lax.rsqrt(var + 1e-5)
        return x * m_mv * inv_mv + (x - mu) * m_s * inv_s

    # ---- shared input layer ----
    lat_s = mm(a_src_ref[...], w_in_ref, b_in_ref)               # (Ns, 72)
    lat_t = mm(a_tgt_ref[...], w_in_ref, b_in_ref)               # (Nt, 72)

    # construct_reference_multivector('data', target latent): mean e0123 component
    ref15 = jnp.sum(jnp.sum(lat_t * m_15, axis=-1, keepdims=True),
                    axis=0, keepdims=True) * (1.0 / (nt * C_LAT))        # (1,1)

    # ---- cross-attention sub-block (pre-norm, residual) ----
    kv = mm(eqln(lat_s), w_kv_ref, b_kv_ref)                     # (Ns, 512): [K heads | V heads]
    q = mm(eqln(lat_t), w_q_ref, b_q_ref)                        # (Nt, 256): scale+mask folded
    kvw = NUM_HEADS * ATTN_DP
    head_outs = []
    for h in range(NUM_HEADS):                                   # static unroll, tiny head count
        lo = h * ATTN_DP
        qh = q[:, lo:lo + ATTN_DP]
        kh = kv[:, lo:lo + ATTN_DP]
        vh = kv[:, kvw + lo:kvw + lo + ATTN_DP]
        logits = lax.dot_general(qh, kh, (((1,), (1,)), ((), ())),
                                 preferred_element_type=f32)     # (Nt, Ns)
        m = jnp.max(logits, axis=-1, keepdims=True)
        p = jnp.exp(logits - m)
        p = p * pl.reciprocal(jnp.sum(p, axis=-1, keepdims=True), approx=True)
        head_outs.append(jnp.dot(p, vh, preferred_element_type=f32))     # (Nt, 128)
    attn = jnp.concatenate(head_outs, axis=-1)                   # (Nt, 256)
    lat_t = lat_t + mm(attn, w_ao_ref, b_ao_ref)                 # residual

    # ---- geometric MLP sub-block (pre-norm, residual) ----
    # TODO(synk): GeometricBilinear / GeoMLP internal wiring approximates gatr's exact layout.
    hmid = mm(eqln(lat_t), w_mi_ref, b_mi_ref)                   # (Nt, 272): [L 128 | R 128 | s 16]
    CH = 2 * C_LAT
    left = hmid[:, :CH * 16]
    right = hmid[:, CH * 16:2 * CH * 16]
    hs = hmid[:, 2 * CH * 16:]
    half = C_LAT * 16                                            # first 4 ch: gp, last 4 ch: join

    def bilinear(xl, xr, l_ref):                                 # per-channel GA bilinear as MXU
        lhs = jnp.dot(xl, l_ref[...], preferred_element_type=f32)        # (Nt, 1024)
        rhs = jnp.dot(xr, bil_b_ref[...], preferred_element_type=f32)    # (Nt, 1024)
        return jnp.dot(lhs * rhs, bil_r_ref[...], preferred_element_type=f32)   # (Nt, 64)

    gp = bilinear(left[:, :half], right[:, :half], bil_lg_ref)
    jn = bilinear(left[:, half:], right[:, half:], bil_lj_ref) * ref15
    h_mv = jnp.concatenate([gp, jn], axis=-1)                    # (Nt, 128)
    # blade-0 scalar gating (broadcast via 0/1 matmul, gelu on the broadcast copies is exact)
    # TODO(synk): PyTorch uses exact erf-GELU; tanh approximation used here for Mosaic lowering.
    gates = jax.nn.gelu(jnp.dot(h_mv, gate_ref[...], preferred_element_type=f32),
                        approximate=True)
    h_mv = h_mv * gates
    h_s = jax.nn.gelu(hs, approximate=True)
    lat_t = lat_t + mm(jnp.concatenate([h_mv, h_s], axis=-1), w_mo_ref, b_mo_ref)

    # ---- output layer ----
    out = mm(lat_t, w_out_ref, b_out_ref)                        # (Nt, 72)
    o_mv_ref[...] = out[:, :C_OUT_MV * 16]
    o_s_ref[...] = out[:, C_OUT_MV * 16:]


def _pallas_forward(a_src, a_tgt, const_list):
    nt = a_tgt.shape[0]
    vmem = pl.BlockSpec(memory_space=pltpu.MemorySpace.VMEM)
    return pl.pallas_call(
        _fused_forward_kernel,
        out_shape=(jax.ShapeDtypeStruct((nt, C_OUT_MV * 16), jnp.float32),
                   jax.ShapeDtypeStruct((nt, S_OUT), jnp.float32)),
        in_specs=[vmem] * (2 + len(const_list)),
        out_specs=(vmem, vmem),
    )(a_src, a_tgt, *const_list)


# ----------------------------------------------------------------------------
# CrossAttentionHatchling forward
# ----------------------------------------------------------------------------
def forward(consts, mv_src, mv_tgt, s_src, s_tgt, attn_mask=None,
            reference_multivector='data'):
    assert attn_mask is None   # TODO(synk): attn_mask support not needed for this synthetic run
    ns, nt = mv_src.shape[0], mv_tgt.shape[0]
    a_src = jnp.concatenate([mv_src.reshape(ns, -1), s_src], axis=-1)   # (Ns, 35)
    a_tgt = jnp.concatenate([mv_tgt.reshape(nt, -1), s_tgt], axis=-1)   # (Nt, 35)
    o_mv, o_s = _pallas_forward(a_src, a_tgt, [consts[k] for k in CONST_KEYS])
    return o_mv.reshape(nt, C_OUT_MV, 16), o_s


if __name__ == "__main__":
    key = jax.random.PRNGKey(0)
    k_par, k1, k2, k3, k4 = jax.random.split(key, 5)
    params = init_model(k_par)
    consts = prepare_fused(params)      # one-time dense expansion of all EquiLinear layers

    Ns, Nt = 16, 8
    mv_source = jax.random.normal(k1, (Ns, C_IN_MV_SRC, 16), jnp.float32)
    mv_target = jax.random.normal(k2, (Nt, C_IN_MV_TGT, 16), jnp.float32)
    scalars_source = jax.random.normal(k3, (Ns, S_IN_SRC), jnp.float32)
    scalars_target = jax.random.normal(k4, (Nt, S_IN_TGT), jnp.float32)

    fwd = jax.jit(lambda a, b, c, d: forward(consts, a, b, c, d))
    out_mv, out_s = fwd(mv_source, mv_target, scalars_source, scalars_target)
    jax.block_until_ready((out_mv, out_s))
    assert out_mv.shape == (Nt, C_OUT_MV, 16) and out_s.shape == (Nt, S_OUT)
    assert bool(jnp.all(jnp.isfinite(out_mv))) and bool(jnp.all(jnp.isfinite(out_s)))
    print("KERNEL_OK")
</pallas_src>

<mosaic_0001>
module attributes {stable_mosaic.version = 11 : i64} {
  func.func @_fused_forward_kernel(%arg0: memref<16x35xf32, #tpu.memory_space<vmem>>, %arg1: memref<8x35xf32, #tpu.memory_space<vmem>>, %arg2: memref<35x72xf32, #tpu.memory_space<vmem>>, %arg3: memref<1x72xf32, #tpu.memory_space<vmem>>, %arg4: memref<72x512xf32, #tpu.memory_space<vmem>>, %arg5: memref<1x512xf32, #tpu.memory_space<vmem>>, %arg6: memref<72x256xf32, #tpu.memory_space<vmem>>, %arg7: memref<1x256xf32, #tpu.memory_space<vmem>>, %arg8: memref<256x72xf32, #tpu.memory_space<vmem>>, %arg9: memref<1x72xf32, #tpu.memory_space<vmem>>, %arg10: memref<72x272xf32, #tpu.memory_space<vmem>>, %arg11: memref<1x272xf32, #tpu.memory_space<vmem>>, %arg12: memref<144x72xf32, #tpu.memory_space<vmem>>, %arg13: memref<1x72xf32, #tpu.memory_space<vmem>>, %arg14: memref<72x72xf32, #tpu.memory_space<vmem>>, %arg15: memref<1x72xf32, #tpu.memory_space<vmem>>, %arg16: memref<64x1024xf32, #tpu.memory_space<vmem>>, %arg17: memref<64x1024xf32, #tpu.memory_space<vmem>>, %arg18: memref<64x1024xf32, #tpu.memory_space<vmem>>, %arg19: memref<1024x64xf32, #tpu.memory_space<vmem>>, %arg20: memref<128x128xf32, #tpu.memory_space<vmem>>, %arg21: memref<4x72xf32, #tpu.memory_space<vmem>>, %arg22: memref<8x64xf32, #tpu.memory_space<vmem>>, %arg23: memref<8x8xf32, #tpu.memory_space<vmem>>) attributes {dimension_semantics = [], scalar_prefetch = 0 : i64, scratch_operands = 0 : i64, tpu.core_type = #tpu.core_type<tc>} {
    %c0 = arith.constant 0 : index
    %c0_0 = arith.constant 0 : index
    %0 = vector.load %arg21[%c0, %c0_0] : memref<4x72xf32, #tpu.memory_space<vmem>>, vector<4x72xf32>
    %1 = vector.extract_strided_slice %0 {offsets = [0, 0], sizes = [1, 72], strides = [1, 1]} : vector<4x72xf32> to vector<1x72xf32>
    %2 = vector.extract_strided_slice %0 {offsets = [1, 0], sizes = [1, 72], strides = [1, 1]} : vector<4x72xf32> to vector<1x72xf32>
    %3 = vector.extract_strided_slice %0 {offsets = [2, 0], sizes = [1, 72], strides = [1, 1]} : vector<4x72xf32> to vector<1x72xf32>
    %4 = vector.extract_strided_slice %0 {offsets = [3, 0], sizes = [1, 72], strides = [1, 1]} : vector<4x72xf32> to vector<1x72xf32>
    %c0_1 = arith.constant 0 : index
    %c0_2 = arith.constant 0 : index
    %5 = vector.load %arg0[%c0_1, %c0_2] : memref<16x35xf32, #tpu.memory_space<vmem>>, vector<16x35xf32>
    %c0_3 = arith.constant 0 : index
    %c0_4 = arith.constant 0 : index
    %6 = vector.load %arg2[%c0_3, %c0_4] : memref<35x72xf32, #tpu.memory_space<vmem>>, vector<35x72xf32>
    %cst = arith.constant dense<0.000000e+00> : vector<16x72xf32>
    %7 = tpu.matmul %5, %6, %cst {dimension_numbers = #tpu.dot_dimension_numbers<[1], [0], [0], [1], [0, 0, 1, 1], [], []>} : vector<16x35xf32>, vector<35x72xf32>, vector<16x72xf32> -> vector<16x72xf32>
    %c0_5 = arith.constant 0 : index
    %c0_6 = arith.constant 0 : index
    %8 = vector.load %arg3[%c0_5, %c0_6] : memref<1x72xf32, #tpu.memory_space<vmem>>, vector<1x72xf32>
    %9 = vector.broadcast %8 : vector<1x72xf32> to vector<16x72xf32>
    %10 = arith.addf %7, %9 : vector<16x72xf32>
    %c0_7 = arith.constant 0 : index
    %c0_8 = arith.constant 0 : index
    %11 = vector.load %arg1[%c0_7, %c0_8] : memref<8x35xf32, #tpu.memory_space<vmem>>, vector<8x35xf32>
    %c0_9 = arith.constant 0 : index
    %c0_10 = arith.constant 0 : index
    %12 = vector.load %arg2[%c0_9, %c0_10] : memref<35x72xf32, #tpu.memory_space<vmem>>, vector<35x72xf32>
    %cst_11 = arith.constant dense<0.000000e+00> : vector<8x72xf32>
    %13 = tpu.matmul %11, %12, %cst_11 {dimension_numbers = #tpu.dot_dimension_numbers<[1], [0], [0], [1], [0, 0, 1, 1], [], []>} : vector<8x35xf32>, vector<35x72xf32>, vector<8x72xf32> -> vector<8x72xf32>
    %c0_12 = arith.constant 0 : index
    %c0_13 = arith.constant 0 : index
    %14 = vector.load %arg3[%c0_12, %c0_13] : memref<1x72xf32, #tpu.memory_space<vmem>>, vector<1x72xf32>
    %15 = vector.broadcast %14 : vector<1x72xf32> to vector<8x72xf32>
    %16 = arith.addf %13, %15 : vector<8x72xf32>
    %17 = vector.broadcast %4 : vector<1x72xf32> to vector<8x72xf32>
    %18 = arith.mulf %16, %17 : vector<8x72xf32>
    %cst_14 = arith.constant dense<0.000000e+00> : vector<8xf32>
    %19 = vector.multi_reduction <add>, %18, %cst_14 [1] : vector<8x72xf32> to vector<8xf32>
    %20 = vector.shape_cast %19 : vector<8xf32> to vector<8x1xf32>
    %cst_15 = arith.constant dense<0.000000e+00> : vector<1xf32>
    %21 = vector.multi_reduction <add>, %20, %cst_15 [0] : vector<8x1xf32> to vector<1xf32>
    %22 = vector.shape_cast %21 : vector<1xf32> to vector<1x1xf32>
    %cst_16 = arith.constant 3.125000e-02 : f32
    %23 = vector.broadcast %cst_16 : f32 to vector<1x1xf32>
    %24 = arith.mulf %22, %23 : vector<1x1xf32>
    %25 = arith.mulf %10, %10 : vector<16x72xf32>
    %26 = vector.broadcast %1 : vector<1x72xf32> to vector<16x72xf32>
    %27 = arith.mulf %25, %26 : vector<16x72xf32>
    %cst_17 = arith.constant dense<0.000000e+00> : vector<16xf32>
    %28 = vector.multi_reduction <add>, %27, %cst_17 [1] : vector<16x72xf32> to vector<16xf32>
    %29 = vector.shape_cast %28 : vector<16xf32> to vector<16x1xf32>
    %cst_18 = arith.constant 2.500000e-01 : f32
    %30 = vector.broadcast %cst_18 : f32 to vector<16x1xf32>
    %31 = arith.mulf %29, %30 : vector<16x1xf32>
    %cst_19 = arith.constant 0.00999999977 : f32
    %32 = vector.broadcast %cst_19 : f32 to vector<16x1xf32>
    %33 = arith.addf %31, %32 : vector<16x1xf32>
    %34 = math.rsqrt %33 : vector<16x1xf32>
    %35 = vector.broadcast %3 : vector<1x72xf32> to vector<16x72xf32>
    %36 = arith.mulf %10, %35 : vector<16x72xf32>
    %cst_20 = arith.constant dense<0.000000e+00> : vector<16xf32>
    %37 = vector.multi_reduction <add>, %36, %cst_20 [1] : vector<16x72xf32> to vector<16xf32>
    %38 = vector.shape_cast %37 : vector<16xf32> to vector<16x1xf32>
    %cst_21 = arith.constant 1.250000e-01 : f32
    %39 = vector.broadcast %cst_21 : f32 to vector<16x1xf32>
    %40 = arith.mulf %38, %39 : vector<16x1xf32>
    %41 = vector.broadcast %40 : vector<16x1xf32> to vector<16x72xf32>
    %42 = arith.subf %10, %41 : vector<16x72xf32>
    %43 = arith.mulf %42, %42 : vector<16x72xf32>
    %44 = vector.broadcast %3 : vector<1x72xf32> to vector<16x72xf32>
    %45 = arith.mulf %43, %44 : vector<16x72xf32>
    %cst_22 = arith.constant dense<0.000000e+00> : vector<16xf32>
    %46 = vector.multi_reduction <add>, %45, %cst_22 [1] : vector<16x72xf32> to vector<16xf32>
    %47 = vector.shape_cast %46 : vector<16xf32> to vector<16x1xf32>
    %cst_23 = arith.constant 1.250000e-01 : f32
    %48 = vector.broadcast %cst_23 : f32 to vector<16x1xf32>
    %49 = arith.mulf %47, %48 : vector<16x1xf32>
    %cst_24 = arith.constant 9.99999974E-6 : f32
    %50 = vector.broadcast %cst_24 : f32 to vector<16x1xf32>
    %51 = arith.addf %49, %50 : vector<16x1xf32>
    %52 = math.rsqrt %51 : vector<16x1xf32>
    %53 = vector.broadcast %2 : vector<1x72xf32> to vector<16x72xf32>
    %54 = arith.mulf %10, %53 : vector<16x72xf32>
    %55 = vector.broadcast %34 : vector<16x1xf32> to vector<16x72xf32>
    %56 = arith.mulf %54, %55 : vector<16x72xf32>
    %57 = vector.broadcast %40 : vector<16x1xf32> to vector<16x72xf32>
    %58 = arith.subf %10, %57 : vector<16x72xf32>
    %59 = vector.broadcast %3 : vector<1x72xf32> to vector<16x72xf32>
    %60 = arith.mulf %58, %59 : vector<16x72xf32>
    %61 = vector.broadcast %52 : vector<16x1xf32> to vector<16x72xf32>
    %62 = arith.mulf %60, %61 : vector<16x72xf32>
    %63 = arith.addf %56, %62 : vector<16x72xf32>
    %c0_25 = arith.constant 0 : index
    %c0_26 = arith.constant 0 : index
    %64 = vector.load %arg4[%c0_25, %c0_26] : memref<72x512xf32, #tpu.memory_space<vmem>>, vector<72x512xf32>
    %cst_27 = arith.constant dense<0.000000e+00> : vector<16x512xf32>
    %65 = tpu.matmul %63, %64, %cst_27 {dimension_numbers = #tpu.dot_dimension_numbers<[1], [0], [0], [1], [0, 0, 1, 1], [], []>} : vector<16x72xf32>, vector<72x512xf32>, vector<16x512xf32> -> vector<16x512xf32>
    %c0_28 = arith.constant 0 : index
    %c0_29 = arith.constant 0 : index
    %66 = vector.load %arg5[%c0_28, %c0_29] : memref<1x512xf32, #tpu.memory_space<vmem>>, vector<1x512xf32>
    %67 = vector.broadcast %66 : vector<1x512xf32> to vector<16x512xf32>
    %68 = arith.addf %65, %67 : vector<16x512xf32>
    %69 = arith.mulf %16, %16 : vector<8x72xf32>
    %70 = vector.broadcast %1 : vector<1x72xf32> to vector<8x72xf32>
    %71 = arith.mulf %69, %70 : vector<8x72xf32>
    %cst_30 = arith.constant dense<0.000000e+00> : vector<8xf32>
    %72 = vector.multi_reduction <add>, %71, %cst_30 [1] : vector<8x72xf32> to vector<8xf32>
    %73 = vector.shape_cast %72 : vector<8xf32> to vector<8x1xf32>
    %cst_31 = arith.constant 2.500000e-01 : f32
    %74 = vector.broadcast %cst_31 : f32 to vector<8x1xf32>
    %75 = arith.mulf %73, %74 : vector<8x1xf32>
    %cst_32 = arith.constant 0.00999999977 : f32
    %76 = vector.broadcast %cst_32 : f32 to vector<8x1xf32>
    %77 = arith.addf %75, %76 : vector<8x1xf32>
    %78 = math.rsqrt %77 : vector<8x1xf32>
    %79 = vector.broadcast %3 : vector<1x72xf32> to vector<8x72xf32>
    %80 = arith.mulf %16, %79 : vector<8x72xf32>
    %cst_33 = arith.constant dense<0.000000e+00> : vector<8xf32>
    %81 = vector.multi_reduction <add>, %80, %cst_33 [1] : vector<8x72xf32> to vector<8xf32>
    %82 = vector.shape_cast %81 : vector<8xf32> to vector<8x1xf32>
    %cst_34 = arith.constant 1.250000e-01 : f32
    %83 = vector.broadcast %cst_34 : f32 to vector<8x1xf32>
    %84 = arith.mulf %82, %83 : vector<8x1xf32>
    %85 = vector.broadcast %84 : vector<8x1xf32> to vector<8x72xf32>
    %86 = arith.subf %16, %85 : vector<8x72xf32>
    %87 = arith.mulf %86, %86 : vector<8x72xf32>
    %88 = vector.broadcast %3 : vector<1x72xf32> to vector<8x72xf32>
    %89 = arith.mulf %87, %88 : vector<8x72xf32>
    %cst_35 = arith.constant dense<0.000000e+00> : vector<8xf32>
    %90 = vector.multi_reduction <add>, %89, %cst_35 [1] : vector<8x72xf32> to vector<8xf32>
    %91 = vector.shape_cast %90 : vector<8xf32> to vector<8x1xf32>
    %cst_36 = arith.constant 1.250000e-01 : f32
    %92 = vector.broadcast %cst_36 : f32 to vector<8x1xf32>
    %93 = arith.mulf %91, %92 : vector<8x1xf32>
    %cst_37 = arith.constant 9.99999974E-6 : f32
    %94 = vector.broadcast %cst_37 : f32 to vector<8x1xf32>
    %95 = arith.addf %93, %94 : vector<8x1xf32>
    %96 = math.rsqrt %95 : vector<8x1xf32>
    %97 = vector.broadcast %2 : vector<1x72xf32> to vector<8x72xf32>
    %98 = arith.mulf %16, %97 : vector<8x72xf32>
    %99 = vector.broadcast %78 : vector<8x1xf32> to vector<8x72xf32>
    %100 = arith.mulf %98, %99 : vector<8x72xf32>
    %101 = vector.broadcast %84 : vector<8x1xf32> to vector<8x72xf32>
    %102 = arith.subf %16, %101 : vector<8x72xf32>
    %103 = vector.broadcast %3 : vector<1x72xf32> to vector<8x72xf32>
    %104 = arith.mulf %102, %103 : vector<8x72xf32>
    %105 = vector.broadcast %96 : vector<8x1xf32> to vector<8x72xf32>
    %106 = arith.mulf %104, %105 : vector<8x72xf32>
    %107 = arith.addf %100, %106 : vector<8x72xf32>
    %c0_38 = arith.constant 0 : index
    %c0_39 = arith.constant 0 : index
    %108 = vector.load %arg6[%c0_38, %c0_39] : memref<72x256xf32, #tpu.memory_space<vmem>>, vector<72x256xf32>
    %cst_40 = arith.constant dense<0.000000e+00> : vector<8x256xf32>
    %109 = tpu.matmul %107, %108, %cst_40 {dimension_numbers = #tpu.dot_dimension_numbers<[1], [0], [0], [1], [0, 0, 1, 1], [], []>} : vector<8x72xf32>, vector<72x256xf32>, vector<8x256xf32> -> vector<8x256xf32>
    %c0_41 = arith.constant 0 : index
    %c0_42 = arith.constant 0 : index
    %110 = vector.load %arg7[%c0_41, %c0_42] : memref<1x256xf32, #tpu.memory_space<vmem>>, vector<1x256xf32>
    %111 = vector.broadcast %110 : vector<1x256xf32> to vector<8x256xf32>
    %112 = arith.addf %109, %111 : vector<8x256xf32>
    %113 = vector.extract_strided_slice %112 {offsets = [0, 0], sizes = [8, 128], strides = [1, 1]} : vector<8x256xf32> to vector<8x128xf32>
    %114 = vector.extract_strided_slice %68 {offsets = [0, 0], sizes = [16, 128], strides = [1, 1]} : vector<16x512xf32> to vector<16x128xf32>
    %115 = vector.extract_strided_slice %68 {offsets = [0, 256], sizes = [16, 128], strides = [1, 1]} : vector<16x512xf32> to vector<16x128xf32>
    %cst_43 = arith.constant dense<0.000000e+00> : vector<8x16xf32>
    %116 = tpu.matmul %113, %114, %cst_43 {dimension_numbers = #tpu.dot_dimension_numbers<[1], [1], [0], [0], [0, 0, 1, 0], [], []>} : vector<8x128xf32>, vector<16x128xf32>, vector<8x16xf32> -> vector<8x16xf32>
    %cst_44 = arith.constant dense<0xFF800000> : vector<8xf32>
    %117 = vector.multi_reduction <maximumf>, %116, %cst_44 [1] : vector<8x16xf32> to vector<8xf32>
    %118 = vector.shape_cast %117 : vector<8xf32> to vector<8x1xf32>
    %119 = vector.broadcast %118 : vector<8x1xf32> to vector<8x16xf32>
    %120 = arith.subf %116, %119 : vector<8x16xf32>
    %121 = math.exp %120 : vector<8x16xf32>
    %cst_45 = arith.constant dense<0.000000e+00> : vector<8xf32>
    %122 = vector.multi_reduction <add>, %121, %cst_45 [1] : vector<8x16xf32> to vector<8xf32>
    %123 = vector.shape_cast %122 : vector<8xf32> to vector<8x1xf32>
    %124 = tpu.reciprocal %123 {approx = true} : vector<8x1xf32> -> vector<8x1xf32>
    %125 = vector.broadcast %124 : vector<8x1xf32> to vector<8x16xf32>
    %126 = arith.mulf %121, %125 : vector<8x16xf32>
    %cst_46 = arith.constant dense<0.000000e+00> : vector<8x128xf32>
    %127 = tpu.matmul %126, %115, %cst_46 {dimension_numbers = #tpu.dot_dimension_numbers<[1], [0], [0], [1], [0, 0, 1, 1], [], []>} : vector<8x16xf32>, vector<16x128xf32>, vector<8x128xf32> -> vector<8x128xf32>
    %128 = vector.extract_strided_slice %112 {offsets = [0, 128], sizes = [8, 128], strides = [1, 1]} : vector<8x256xf32> to vector<8x128xf32>
    %129 = vector.extract_strided_slice %68 {offsets = [0, 128], sizes = [16, 128], strides = [1, 1]} : vector<16x512xf32> to vector<16x128xf32>
    %130 = vector.extract_strided_slice %68 {offsets = [0, 384], sizes = [16, 128], strides = [1, 1]} : vector<16x512xf32> to vector<16x128xf32>
    %cst_47 = arith.constant dense<0.000000e+00> : vector<8x16xf32>
    %131 = tpu.matmul %128, %129, %cst_47 {dimension_numbers = #tpu.dot_dimension_numbers<[1], [1], [0], [0], [0, 0, 1, 0], [], []>} : vector<8x128xf32>, vector<16x128xf32>, vector<8x16xf32> -> vector<8x16xf32>
    %cst_48 = arith.constant dense<0xFF800000> : vector<8xf32>
    %132 = vector.multi_reduction <maximumf>, %131, %cst_48 [1] : vector<8x16xf32> to vector<8xf32>
    %133 = vector.shape_cast %132 : vector<8xf32> to vector<8x1xf32>
    %134 = vector.broadcast %133 : vector<8x1xf32> to vector<8x16xf32>
    %135 = arith.subf %131, %134 : vector<8x16xf32>
    %136 = math.exp %135 : vector<8x16xf32>
    %cst_49 = arith.constant dense<0.000000e+00> : vector<8xf32>
    %137 = vector.multi_reduction <add>, %136, %cst_49 [1] : vector<8x16xf32> to vector<8xf32>
    %138 = vector.shape_cast %137 : vector<8xf32> to vector<8x1xf32>
    %139 = tpu.reciprocal %138 {approx = true} : vector<8x1xf32> -> vector<8x1xf32>
    %140 = vector.broadcast %139 : vector<8x1xf32> to vector<8x16xf32>
    %141 = arith.mulf %136, %140 : vector<8x16xf32>
    %cst_50 = arith.constant dense<0.000000e+00> : vector<8x128xf32>
    %142 = tpu.matmul %141, %130, %cst_50 {dimension_numbers = #tpu.dot_dimension_numbers<[1], [0], [0], [1], [0, 0, 1, 1], [], []>} : vector<8x16xf32>, vector<16x128xf32>, vector<8x128xf32> -> vector<8x128xf32>
    %143 = tpu.concatenate %127, %142 in 1 : vector<8x128xf32>, vector<8x128xf32> -> vector<8x256xf32>
    %c0_51 = arith.constant 0 : index
    %c0_52 = arith.constant 0 : index
    %144 = vector.load %arg8[%c0_51, %c0_52] : memref<256x72xf32, #tpu.memory_space<vmem>>, vector<256x72xf32>
    %cst_53 = arith.constant dense<0.000000e+00> : vector<8x72xf32>
    %145 = tpu.matmul %143, %144, %cst_53 {dimension_numbers = #tpu.dot_dimension_numbers<[1], [0], [0], [1], [0, 0, 1, 1], [], []>} : vector<8x256xf32>, vector<256x72xf32>, vector<8x72xf32> -> vector<8x72xf32>
    %c0_54 = arith.constant 0 : index
    %c0_55 = arith.constant 0 : index
    %146 = vector.load %arg9[%c0_54, %c0_55] : memref<1x72xf32, #tpu.memory_space<vmem>>, vector<1x72xf32>
    %147 = vector.broadcast %146 : vector<1x72xf32> to vector<8x72xf32>
    %148 = arith.addf %145, %147 : vector<8x72xf32>
    %149 = arith.addf %16, %148 : vector<8x72xf32>
    %150 = arith.mulf %149, %149 : vector<8x72xf32>
    %151 = vector.broadcast %1 : vector<1x72xf32> to vector<8x72xf32>
    %152 = arith.mulf %150, %151 : vector<8x72xf32>
    %cst_56 = arith.constant dense<0.000000e+00> : vector<8xf32>
    %153 = vector.multi_reduction <add>, %152, %cst_56 [1] : vector<8x72xf32> to vector<8xf32>
    %154 = vector.shape_cast %153 : vector<8xf32> to vector<8x1xf32>
    %cst_57 = arith.constant 2.500000e-01 : f32
    %155 = vector.broadcast %cst_57 : f32 to vector<8x1xf32>
    %156 = arith.mulf %154, %155 : vector<8x1xf32>
    %cst_58 = arith.constant 0.00999999977 : f32
    %157 = vector.broadcast %cst_58 : f32 to vector<8x1xf32>
    %158 = arith.addf %156, %157 : vector<8x1xf32>
    %159 = math.rsqrt %158 : vector<8x1xf32>
    %160 = vector.broadcast %3 : vector<1x72xf32> to vector<8x72xf32>
    %161 = arith.mulf %149, %160 : vector<8x72xf32>
    %cst_59 = arith.constant dense<0.000000e+00> : vector<8xf32>
    %162 = vector.multi_reduction <add>, %161, %cst_59 [1] : vector<8x72xf32> to vector<8xf32>
    %163 = vector.shape_cast %162 : vector<8xf32> to vector<8x1xf32>
    %cst_60 = arith.constant 1.250000e-01 : f32
    %164 = vector.broadcast %cst_60 : f32 to vector<8x1xf32>
    %165 = arith.mulf %163, %164 : vector<8x1xf32>
    %166 = vector.broadcast %165 : vector<8x1xf32> to vector<8x72xf32>
    %167 = arith.subf %149, %166 : vector<8x72xf32>
    %168 = arith.mulf %167, %167 : vector<8x72xf32>
    %169 = vector.broadcast %3 : vector<1x72xf32> to vector<8x72xf32>
    %170 = arith.mulf %168, %169 : vector<8x72xf32>
    %cst_61 = arith.constant dense<0.000000e+00> : vector<8xf32>
    %171 = vector.multi_reduction <add>, %170, %cst_61 [1] : vector<8x72xf32> to vector<8xf32>
    %172 = vector.shape_cast %171 : vector<8xf32> to vector<8x1xf32>
    %cst_62 = arith.constant 1.250000e-01 : f32
    %173 = vector.broadcast %cst_62 : f32 to vector<8x1xf32>
    %174 = arith.mulf %172, %173 : vector<8x1xf32>
    %cst_63 = arith.constant 9.99999974E-6 : f32
    %175 = vector.broadcast %cst_63 : f32 to vector<8x1xf32>
    %176 = arith.addf %174, %175 : vector<8x1xf32>
    %177 = math.rsqrt %176 : vector<8x1xf32>
    %178 = vector.broadcast %2 : vector<1x72xf32> to vector<8x72xf32>
    %179 = arith.mulf %149, %178 : vector<8x72xf32>
    %180 = vector.broadcast %159 : vector<8x1xf32> to vector<8x72xf32>
    %181 = arith.mulf %179, %180 : vector<8x72xf32>
    %182 = vector.broadcast %165 : vector<8x1xf32> to vector<8x72xf32>
    %183 = arith.subf %149, %182 : vector<8x72xf32>
    %184 = vector.broadcast %3 : vector<1x72xf32> to vector<8x72xf32>
    %185 = arith.mulf %183, %184 : vector<8x72xf32>
    %186 = vector.broadcast %177 : vector<8x1xf32> to vector<8x72xf32>
    %187 = arith.mulf %185, %186 : vector<8x72xf32>
    %188 = arith.addf %181, %187 : vector<8x72xf32>
    %c0_64 = arith.constant 0 : index
    %c0_65 = arith.constant 0 : index
    %189 = vector.load %arg10[%c0_64, %c0_65] : memref<72x272xf32, #tpu.memory_space<vmem>>, vector<72x272xf32>
    %cst_66 = arith.constant dense<0.000000e+00> : vector<8x272xf32>
    %190 = tpu.matmul %188, %189, %cst_66 {dimension_numbers = #tpu.dot_dimension_numbers<[1], [0], [0], [1], [0, 0, 1, 1], [], []>} : vector<8x72xf32>, vector<72x272xf32>, vector<8x272xf32> -> vector<8x272xf32>
    %c0_67 = arith.constant 0 : index
    %c0_68 = arith.constant 0 : index
    %191 = vector.load %arg11[%c0_67, %c0_68] : memref<1x272xf32, #tpu.memory_space<vmem>>, vector<1x272xf32>
    %192 = vector.broadcast %191 : vector<1x272xf32> to vector<8x272xf32>
    %193 = arith.addf %190, %192 : vector<8x272xf32>
    %194 = vector.extract_strided_slice %193 {offsets = [0, 0], sizes = [8, 128], strides = [1, 1]} : vector<8x272xf32> to vector<8x128xf32>
    %195 = vector.extract_strided_slice %193 {offsets = [0, 128], sizes = [8, 128], strides = [1, 1]} : vector<8x272xf32> to vector<8x128xf32>
    %196 = vector.extract_strided_slice %193 {offsets = [0, 256], sizes = [8, 16], strides = [1, 1]} : vector<8x272xf32> to vector<8x16xf32>
    %197 = vector.extract_strided_slice %194 {offsets = [0, 0], sizes = [8, 64], strides = [1, 1]} : vector<8x128xf32> to vector<8x64xf32>
    %198 = vector.extract_strided_slice %195 {offsets = [0, 0], sizes = [8, 64], strides = [1, 1]} : vector<8x128xf32> to vector<8x64xf32>
    %c0_69 = arith.constant 0 : index
    %c0_70 = arith.constant 0 : index
    %199 = vector.load %arg16[%c0_69, %c0_70] : memref<64x1024xf32, #tpu.memory_space<vmem>>, vector<64x1024xf32>
    %cst_71 = arith.constant dense<0.000000e+00> : vector<8x1024xf32>
    %200 = tpu.matmul %197, %199, %cst_71 {dimension_numbers = #tpu.dot_dimension_numbers<[1], [0], [0], [1], [0, 0, 1, 1], [], []>} : vector<8x64xf32>, vector<64x1024xf32>, vector<8x1024xf32> -> vector<8x1024xf32>
    %c0_72 = arith.constant 0 : index
    %c0_73 = arith.constant 0 : index
    %201 = vector.load %arg18[%c0_72, %c0_73] : memref<64x1024xf32, #tpu.memory_space<vmem>>, vector<64x1024xf32>
    %cst_74 = arith.constant dense<0.000000e+00> : vector<8x1024xf32>
    %202 = tpu.matmul %198, %201, %cst_74 {dimension_numbers = #tpu.dot_dimension_numbers<[1], [0], [0], [1], [0, 0, 1, 1], [], []>} : vector<8x64xf32>, vector<64x1024xf32>, vector<8x1024xf32> -> vector<8x1024xf32>
    %203 = arith.mulf %200, %202 : vector<8x1024xf32>
    %c0_75 = arith.constant 0 : index
    %c0_76 = arith.constant 0 : index
    %204 = vector.load %arg19[%c0_75, %c0_76] : memref<1024x64xf32, #tpu.memory_space<vmem>>, vector<1024x64xf32>
    %cst_77 = arith.constant dense<0.000000e+00> : vector<8x64xf32>
    %205 = tpu.matmul %203, %204, %cst_77 {dimension_numbers = #tpu.dot_dimension_numbers<[1], [0], [0], [1], [0, 0, 1, 1], [], []>} : vector<8x1024xf32>, vector<1024x64xf32>, vector<8x64xf32> -> vector<8x64xf32>
    %206 = vector.extract_strided_slice %194 {offsets = [0, 64], sizes = [8, 64], strides = [1, 1]} : vector<8x128xf32> to vector<8x64xf32>
    %207 = vector.extract_strided_slice %195 {offsets = [0, 64], sizes = [8, 64], strides = [1, 1]} : vector<8x128xf32> to vector<8x64xf32>
    %c0_78 = arith.constant 0 : index
    %c0_79 = arith.constant 0 : index
    %208 = vector.load %arg17[%c0_78, %c0_79] : memref<64x1024xf32, #tpu.memory_space<vmem>>, vector<64x1024xf32>
    %cst_80 = arith.constant dense<0.000000e+00> : vector<8x1024xf32>
    %209 = tpu.matmul %206, %208, %cst_80 {dimension_numbers = #tpu.dot_dimension_numbers<[1], [0], [0], [1], [0, 0, 1, 1], [], []>} : vector<8x64xf32>, vector<64x1024xf32>, vector<8x1024xf32> -> vector<8x1024xf32>
    %c0_81 = arith.constant 0 : index
    %c0_82 = arith.constant 0 : index
    %210 = vector.load %arg18[%c0_81, %c0_82] : memref<64x1024xf32, #tpu.memory_space<vmem>>, vector<64x1024xf32>
    %cst_83 = arith.constant dense<0.000000e+00> : vector<8x1024xf32>
    %211 = tpu.matmul %207, %210, %cst_83 {dimension_numbers = #tpu.dot_dimension_numbers<[1], [0], [0], [1], [0, 0, 1, 1], [], []>} : vector<8x64xf32>, vector<64x1024xf32>, vector<8x1024xf32> -> vector<8x1024xf32>
    %212 = arith.mulf %209, %211 : vector<8x1024xf32>
    %c0_84 = arith.constant 0 : index
    %c0_85 = arith.constant 0 : index
    %213 = vector.load %arg19[%c0_84, %c0_85] : memref<1024x64xf32, #tpu.memory_space<vmem>>, vector<1024x64xf32>
    %cst_86 = arith.constant dense<0.000000e+00> : vector<8x64xf32>
    %214 = tpu.matmul %212, %213, %cst_86 {dimension_numbers = #tpu.dot_dimension_numbers<[1], [0], [0], [1], [0, 0, 1, 1], [], []>} : vector<8x1024xf32>, vector<1024x64xf32>, vector<8x64xf32> -> vector<8x64xf32>
    %215 = vector.broadcast %24 : vector<1x1xf32> to vector<8x64xf32>
    %216 = arith.mulf %214, %215 : vector<8x64xf32>
    %217 = tpu.concatenate %205, %216 in 1 : vector<8x64xf32>, vector<8x64xf32> -> vector<8x128xf32>
    %c0_87 = arith.constant 0 : index
    %c0_88 = arith.constant 0 : index
    %218 = vector.load %arg20[%c0_87, %c0_88] : memref<128x128xf32, #tpu.memory_space<vmem>>, vector<128x128xf32>
    %cst_89 = arith.constant dense<0.000000e+00> : vector<8x128xf32>
    %219 = tpu.matmul %217, %218, %cst_89 {dimension_numbers = #tpu.dot_dimension_numbers<[1], [0], [0], [1], [0, 0, 1, 1], [], []>} : vector<8x128xf32>, vector<128x128xf32>, vector<8x128xf32> -> vector<8x128xf32>
    %220 = arith.mulf %219, %219 : vector<8x128xf32>
    %221 = arith.mulf %219, %220 : vector<8x128xf32>
    %cst_90 = arith.constant 4.471500e-02 : f32
    %222 = vector.broadcast %cst_90 : f32 to vector<8x128xf32>
    %223 = arith.mulf %222, %221 : vector<8x128xf32>
    %224 = arith.addf %219, %223 : vector<8x128xf32>
    %cst_91 = arith.constant 0.797884583 : f32
    %225 = vector.broadcast %cst_91 : f32 to vector<8x128xf32>
    %226 = arith.mulf %225, %224 : vector<8x128xf32>
    %227 = math.tanh %226 : vector<8x128xf32>
    %cst_92 = arith.constant 1.000000e+00 : f32
    %228 = vector.broadcast %cst_92 : f32 to vector<8x128xf32>
    %229 = arith.addf %228, %227 : vector<8x128xf32>
    %cst_93 = arith.constant 5.000000e-01 : f32
    %230 = vector.broadcast %cst_93 : f32 to vector<8x128xf32>
    %231 = arith.mulf %230, %229 : vector<8x128xf32>
    %232 = arith.mulf %219, %231 : vector<8x128xf32>
    %233 = arith.mulf %217, %232 : vector<8x128xf32>
    %234 = arith.mulf %196, %196 : vector<8x16xf32>
    %235 = arith.mulf %196, %234 : vector<8x16xf32>
    %cst_94 = arith.constant 4.471500e-02 : f32
    %236 = vector.broadcast %cst_94 : f32 to vector<8x16xf32>
    %237 = arith.mulf %236, %235 : vector<8x16xf32>
    %238 = arith.addf %196, %237 : vector<8x16xf32>
    %cst_95 = arith.constant 0.797884583 : f32
    %239 = vector.broadcast %cst_95 : f32 to vector<8x16xf32>
    %240 = arith.mulf %239, %238 : vector<8x16xf32>
    %241 = math.tanh %240 : vector<8x16xf32>
    %cst_96 = arith.constant 1.000000e+00 : f32
    %242 = vector.broadcast %cst_96 : f32 to vector<8x16xf32>
    %243 = arith.addf %242, %241 : vector<8x16xf32>
    %cst_97 = arith.constant 5.000000e-01 : f32
    %244 = vector.broadcast %cst_97 : f32 to vector<8x16xf32>
    %245 = arith.mulf %244, %243 : vector<8x16xf32>
    %246 = arith.mulf %196, %245 : vector<8x16xf32>
    %247 = tpu.concatenate %233, %246 in 1 : vector<8x128xf32>, vector<8x16xf32> -> vector<8x144xf32>
    %c0_98 = arith.constant 0 : index
    %c0_99 = arith.constant 0 : index
    %248 = vector.load %arg12[%c0_98, %c0_99] : memref<144x72xf32, #tpu.memory_space<vmem>>, vector<144x72xf32>
    %cst_100 = arith.constant dense<0.000000e+00> : vector<8x72xf32>
    %249 = tpu.matmul %247, %248, %cst_100 {dimension_numbers = #tpu.dot_dimension_numbers<[1], [0], [0], [1], [0, 0, 1, 1], [], []>} : vector<8x144xf32>, vector<144x72xf32>, vector<8x72xf32> -> vector<8x72xf32>
    %c0_101 = arith.constant 0 : index
    %c0_102 = arith.constant 0 : index
    %250 = vector.load %arg13[%c0_101, %c0_102] : memref<1x72xf32, #tpu.memory_space<vmem>>, vector<1x72xf32>
    %251 = vector.broadcast %250 : vector<1x72xf32> to vector<8x72xf32>
    %252 = arith.addf %249, %251 : vector<8x72xf32>
    %253 = arith.addf %149, %252 : vector<8x72xf32>
    %c0_103 = arith.constant 0 : index
    %c0_104 = arith.constant 0 : index
    %254 = vector.load %arg14[%c0_103, %c0_104] : memref<72x72xf32, #tpu.memory_space<vmem>>, vector<72x72xf32>
    %cst_105 = arith.constant dense<0.000000e+00> : vector<8x72xf32>
    %255 = tpu.matmul %253, %254, %cst_105 {dimension_numbers = #tpu.dot_dimension_numbers<[1], [0], [0], [1], [0, 0, 1, 1], [], []>} : vector<8x72xf32>, vector<72x72xf32>, vector<8x72xf32> -> vector<8x72xf32>
    %c0_106 = arith.constant 0 : index
    %c0_107 = arith.constant 0 : index
    %256 = vector.load %arg15[%c0_106, %c0_107] : memref<1x72xf32, #tpu.memory_space<vmem>>, vector<1x72xf32>
    %257 = vector.broadcast %256 : vector<1x72xf32> to vector<8x72xf32>
    %258 = arith.addf %255, %257 : vector<8x72xf32>
    %259 = vector.extract_strided_slice %258 {offsets = [0, 0], sizes = [8, 64], strides = [1, 1]} : vector<8x72xf32> to vector<8x64xf32>
    %c0_108 = arith.constant 0 : index
    %c0_109 = arith.constant 0 : index
    %260 = vector.load %arg22[%c0_108, %c0_109] : memref<8x64xf32, #tpu.memory_space<vmem>>, vector<8x64xf32>
    tpu.vector_store %arg22[%c0_108, %c0_109], %259 {strides = array<i32>} : memref<8x64xf32, #tpu.memory_space<vmem>>, vector<8x64xf32>,
    %261 = vector.extract_strided_slice %258 {offsets = [0, 64], sizes = [8, 8], strides = [1, 1]} : vector<8x72xf32> to vector<8x8xf32>
    %c0_110 = arith.constant 0 : index
    %c0_111 = arith.constant 0 : index
    %262 = vector.load %arg23[%c0_110, %c0_111] : memref<8x8xf32, #tpu.memory_space<vmem>>, vector<8x8xf32>
    tpu.vector_store %arg23[%c0_110, %c0_111], %261 {strides = array<i32>} : memref<8x8xf32, #tpu.memory_space<vmem>>, vector<8x8xf32>,
    return
  }
}

</mosaic_0001>

<bundles_post_ra>
// kernel: _lambda_.1
= control target key start
LH: loop header
LB: loop body
LE: loop exit
PB: predicated region body
PF: predicated region fallthrough
CT: control target
= control target key end

     0   :  { %s6831_s0 = inlined_call_operand.vmem [shape: f32[16,35], index: 0, kind: input, shape index: {}]   ;;  %s6832_s1 = inlined_call_operand.vmem [shape: f32[8,35], index: 1, kind: input, shape index: {}]   ;;  %s6833_s2 = inlined_call_operand.vmem [shape: f32[35,72], index: 2, kind: input, shape index: {}]   ;;  %s6834_s3 = inlined_call_operand.hbm [shape: f32[1,72], index: 3, kind: input, shape index: {}]   ;;  %s6835_s4 = inlined_call_operand.hbm [shape: f32[72,512], index: 4, kind: input, shape index: {}]   ;;  %s6836_s5 = inlined_call_operand.hbm [shape: f32[1,512], index: 5, kind: input, shape index: {}]   ;;  %s6837_s6 = inlined_call_operand.hbm [shape: f32[72,256], index: 6, kind: input, shape index: {}]   ;;  %s6838_s7 = inlined_call_operand.hbm [shape: f32[1,256], index: 7, kind: input, shape index: {}]   ;;  %s6839_s8 = inlined_call_operand.hbm [shape: f32[256,72], index: 8, kind: input, shape index: {}]   ;;  %s6840_s9 = inlined_call_operand.hbm [shape: f32[1,72], index: 9, kind: input, shape index: {}]   ;;  %s6841_s10 = inlined_call_operand.vmem [shape: f32[72,272], index: 10, kind: input, shape index: {}]   ;;  %s6842_s11 = inlined_call_operand.vmem [shape: f32[1,272], index: 11, kind: input, shape index: {}]   ;;  %s6843_s12 = inlined_call_operand.hbm [shape: f32[144,72], index: 12, kind: input, shape index: {}]   ;;  %s6844_s13 = inlined_call_operand.hbm [shape: f32[1,72], index: 13, kind: input, shape index: {}]   ;;  %s6845_s14 = inlined_call_operand.hbm [shape: f32[72,72], index: 14, kind: input, shape index: {}]   ;;  %s6846_s15 = inlined_call_operand.hbm [shape: f32[1,72], index: 15, kind: input, shape index: {}]   ;;  %s6847_s16 = inlined_call_operand.hbm [shape: f32[64,1024], index: 16, kind: input, shape index: {}]   ;;  %s6848_s17 = inlined_call_operand.hbm [shape: f32[64,1024], index: 17, kind: input, shape index: {}]   ;;  %s6849_s18 = inlined_call_operand.hbm [shape: f32[64,1024], index: 18, kind: input, shape index: {}]   ;;  %s6850_s19 = inlined_call_operand.hbm [shape: f32[1024,64], index: 19, kind: input, shape index: {}]   ;;  %s6851_s20 = inlined_call_operand.hbm [shape: f32[128,128], index: 20, kind: input, shape index: {}]   ;;  %s6852_s21 = inlined_call_operand.hbm [shape: f32[4,72], index: 21, kind: input, shape index: {}]   ;;  %s6853_s22 = inlined_call_operand.vmem [shape: f32[8,64], index: 22, kind: output, shape index: {0}]   ;;  %s6854_s23 = inlined_call_operand.hbm [shape: f32[8,8], index: 23, kind: output, shape index: {1}]  }
   0x1   :  { %6927 = sst [smem:[#allocation101_spill]] %s6831_s0 }
   0x2   :  { %6928 = sst [smem:[#allocation102_spill]] %s6832_s1 }
   0x3   :  { %6929 = sst [smem:[#allocation103_spill]] %s6833_s2 }
   0x4   :  { %6930 = sst [smem:[#allocation104_spill]] %s6834_s3 }
   0x5   :  { %6931 = sst [smem:[#allocation105_spill]] %s6835_s4 }
   0x6   :  { %6932 = sst [smem:[#allocation106_spill]] %s6836_s5 }
   0x7   :  { %6933 = sst [smem:[#allocation107_spill]] %s6837_s6 }
   0x8   :  { %6934 = sst [smem:[#allocation108_spill]] %s6838_s7 }
   0x9   :  { %6935 = sst [smem:[#allocation109_spill]] %s6853_s22 }
   0xa   :  { %6936 = sst [smem:[#allocation110_spill]] %s6854_s23 }
   0xb   :  { %29 = vsyncpa [#allocation3], 0 }
   0xc   :  { %30 = vsyncpa [#allocation6], 0 }
   0xd   :  { %31 = vsyncpa [#allocation9], 0 }
   0xe   :  { %32 = vsyncpa [#allocation12], 0 }
   0xf   :  { %33 = vsyncpa [#allocation15], 0 }
  0x10   :  { %34 = vsyncpa [#allocation18], 0 }
  0x11   :  { %35 = vsyncpa [#allocation21], 0 }
  0x12   :  { %36 = vsyncpa [#allocation24], 0 }
  0x13   :  { %37 = vsyncpa [#allocation27], 0 }
  0x14   :  { %38 = vsyncpa [#allocation4], 0  ;;  %s5638_s4 = smov [#allocation5]   ;;  %s6937_s5 = sld [smem:[#allocation105_spill]] }
  0x15   :  { %s60_s30 = sshll.u32 %s5638_s4, 4  ;;  %s61_s30 = int_to_ptr.vmem [resolvable:$true] %s60_s30 }
  0x1a   :  { %s5222_s1 = scalar_lea.hbm %s6937_s5, 4608 }
  0x1b   :  { %p5223_p0 = scmp.ne.s32.totalorder %s6937_s5, %s5222_s1  ;;  %p5226_p1 = scmp.lt.u32.totalorder %s5222_s1, %s6937_s5 }
  0x1d   :  { %p5228_p2 = pnand %p5226_p1, %p5223_p0 }
  0x1f   :  { %5231 = shalt.err (!%p5228_p2)
}
  0x20   :  { %s5232_s7 = scalar_lea.vmem %s61_s30, 4608  ;;  %p5237_p4 = scmp.lt.s32.totalorder %s61_s30, %s61_s30 }
  0x21   :  { %p5233_p3 = scmp.ne.s32.totalorder %s61_s30, %s5232_s7  ;;  %p5238_p5 = scmp.lt.s32.totalorder %s5232_s7, %s5232_s7 }
  0x23   :  { %p5239_p6 = por %p5238_p5, %p5237_p4 }
  0x25   :  { %p5240_p7 = pnand %p5239_p6, %p5233_p3 }
  0x27   :  { %5243 = shalt.err (!%p5240_p7)
}
  0x28   :  { %s5639_s28 = smov 512   ;;  %s5640_s29 = smov 32  }
  0x29   :  { %66 = dma.hbm_to_vmem [thread:$0]  %s6937_s5, 4608, %s61_s30, [#allocation6], %s5639_s28, %s5639_s28, %s5640_s29  }
  0x2a   :  { %s5641_s4 = smov [#allocation8]   ;;  %s6938_s26 = sld [smem:[#allocation107_spill]] }
  0x2b   :  { %s82_s24 = sshll.u32 %s5641_s4, 4  ;;  %s83_s24 = int_to_ptr.vmem [resolvable:$true] %s82_s24 }
  0x30   :  { %s5244_s2 = scalar_lea.hbm %s6938_s26, 2304 }
  0x31   :  { %p5245_p8 = scmp.ne.s32.totalorder %s6938_s26, %s5244_s2  ;;  %p5248_p9 = scmp.lt.u32.totalorder %s5244_s2, %s6938_s26 }
  0x33   :  { %p5250_p10 = pnand %p5248_p9, %p5245_p8 }
  0x35   :  { %5253 = shalt.err (!%p5250_p10)
}
  0x36   :  { %s5254_s22 = scalar_lea.vmem %s83_s24, 2304  ;;  %p5259_p12 = scmp.lt.s32.totalorder %s83_s24, %s83_s24 }
  0x37   :  { %p5255_p11 = scmp.ne.s32.totalorder %s83_s24, %s5254_s22  ;;  %p5260_p13 = scmp.lt.s32.totalorder %s5254_s22, %s5254_s22 }
  0x39   :  { %p5261_p0 = por %p5260_p13, %p5259_p12 }
  0x3b   :  { %p5262_p1 = pnand %p5261_p0, %p5255_p11 }
  0x3d   :  { %5265 = shalt.err (!%p5262_p1)
}
  0x3e   :  { %s5642_s30 = smov 256   ;;  %s5643_s5 = smov 16  }
  0x3f   :  { %88 = dma.hbm_to_vmem [thread:$0]  %s6938_s26, 2304, %s83_s24, [#allocation9], %s5642_s30, %s5642_s30, %s5643_s5  }
  0x40   :  { %s5644_s3 = smov [#allocation11]   ;;  %s5266_s25 = scalar_lea.hbm %s6839_s8, 4096 }
  0x41   :  { %s104_s0 = sshll.u32 %s5644_s3, 4  ;;  %p5267_p2 = scmp.ne.s32.totalorder %s6839_s8, %s5266_s25  ;;  %s105_s0 = int_to_ptr.vmem [resolvable:$true] %s104_s0 }
  0x42   :  { %p5270_p3 = scmp.lt.u32.totalorder %s5266_s25, %s6839_s8 }
  0x44   :  { %p5272_p4 = pnand %p5270_p3, %p5267_p2 }
  0x46   :  { %5275 = shalt.err (!%p5272_p4)
}
  0x47   :  { %s5276_s27 = scalar_lea.vmem %s105_s0, 4096  ;;  %p5281_p6 = scmp.lt.s32.totalorder %s105_s0, %s105_s0 }
  0x48   :  { %p5277_p5 = scmp.ne.s32.totalorder %s105_s0, %s5276_s27  ;;  %p5282_p7 = scmp.lt.s32.totalorder %s5276_s27, %s5276_s27 }
  0x4a   :  { %p5283_p8 = por %p5282_p7, %p5281_p6 }
  0x4c   :  { %p5284_p9 = pnand %p5283_p8, %p5277_p5 }
  0x4e   :  { %5287 = shalt.err (!%p5284_p9)
}
  0x4f   :  { %s5645_s24 = smov 128   ;;  %s5646_s26 = smov 8  }
  0x50   :  { %110 = dma.hbm_to_vmem [thread:$0]  %s6839_s8, 4096, %s105_s0, [#allocation12], %s5645_s24, %s5645_s24, %s5646_s26  }
  0x51   :  { %s5647_s5 = smov [#allocation14]   ;;  %s5648_s29 = smov [#allocation17]  }
  0x52   :  { %s130_s28 = sshll.u32 %s5647_s5, 4  ;;  %s152_s3 = sshll.u32 %s5648_s29, 4  ;;  %s131_s28 = int_to_ptr.vmem [resolvable:$true] %s130_s28  ;;  %s153_s3 = int_to_ptr.vmem [resolvable:$true] %s152_s3 }
  0x53   :  { %s5288_s25 = scalar_lea.hbm %s6843_s12, 2304 }
  0x54   :  { %p5289_p10 = scmp.ne.s32.totalorder %s6843_s12, %s5288_s25  ;;  %p5292_p11 = scmp.lt.u32.totalorder %s5288_s25, %s6843_s12 }
  0x56   :  { %p5294_p12 = pnand %p5292_p11, %p5289_p10 }
  0x58   :  { %5297 = shalt.err (!%p5294_p12)
}
  0x59   :  { %s5298_s8 = scalar_lea.vmem %s131_s28, 2304  ;;  %p5303_p0 = scmp.lt.s32.totalorder %s131_s28, %s131_s28 }
  0x5a   :  { %p5299_p13 = scmp.ne.s32.totalorder %s131_s28, %s5298_s8  ;;  %p5304_p1 = scmp.lt.s32.totalorder %s5298_s8, %s5298_s8 }
  0x5c   :  { %p5305_p2 = por %p5304_p1, %p5303_p0 }
  0x5e   :  { %p5306_p3 = pnand %p5305_p2, %p5299_p13 }
  0x60   :  { %5309 = shalt.err (!%p5306_p3)
}
  0x61   :  { %136 = dma.hbm_to_vmem [thread:$0]  %s6843_s12, 2304, %s131_s28, [#allocation15], %s5645_s24, %s5645_s24, %s5646_s26  }
  0x62   :  { %s5310_s5 = scalar_lea.hbm %s6845_s14, 1152 }
  0x63   :  { %p5311_p4 = scmp.ne.s32.totalorder %s6845_s14, %s5310_s5  ;;  %p5314_p5 = scmp.lt.u32.totalorder %s5310_s5, %s6845_s14 }
  0x65   :  { %p5316_p6 = pnand %p5314_p5, %p5311_p4 }
  0x67   :  { %5319 = shalt.err (!%p5316_p6)
}
  0x68   :  { %s5320_s1 = scalar_lea.vmem %s153_s3, 1152  ;;  %p5325_p8 = scmp.lt.s32.totalorder %s153_s3, %s153_s3 }
  0x69   :  { %p5321_p7 = scmp.ne.s32.totalorder %s153_s3, %s5320_s1  ;;  %p5326_p9 = scmp.lt.s32.totalorder %s5320_s1, %s5320_s1 }
  0x6b   :  { %p5327_p10 = por %p5326_p9, %p5325_p8 }
  0x6d   :  { %p5328_p11 = pnand %p5327_p10, %p5321_p7 }
  0x6f   :  { %5331 = shalt.err (!%p5328_p11)
}
  0x70   :  { %158 = dma.hbm_to_vmem [thread:$0]  %s6845_s14, 1152, %s153_s3, [#allocation18], %s5645_s24, %s5645_s24, %s5646_s26  }
  0x71   :  { %s5649_s2 = smov [#allocation20]   ;;  %s5332_s0 = scalar_lea.hbm %s6847_s16, 8192 }
  0x72   :  { %s174_s22 = sshll.u32 %s5649_s2, 4  ;;  %p5333_p12 = scmp.ne.s32.totalorder %s6847_s16, %s5332_s0  ;;  %s175_s22 = int_to_ptr.vmem [resolvable:$true] %s174_s22 }
  0x73   :  { %p5336_p13 = scmp.lt.u32.totalorder %s5332_s0, %s6847_s16 }
  0x75   :  { %p5338_p0 = pnand %p5336_p13, %p5333_p12 }
  0x77   :  { %5341 = shalt.err (!%p5338_p0)
}
  0x78   :  { %s5342_s29 = scalar_lea.vmem %s175_s22, 8192  ;;  %p5347_p2 = scmp.lt.s32.totalorder %s175_s22, %s175_s22 }
  0x79   :  { %p5343_p1 = scmp.ne.s32.totalorder %s175_s22, %s5342_s29  ;;  %p5348_p3 = scmp.lt.s32.totalorder %s5342_s29, %s5342_s29 }
  0x7b   :  { %p5349_p4 = por %p5348_p3, %p5347_p2 }
  0x7d   :  { %p5350_p5 = pnand %p5349_p4, %p5343_p1 }
  0x7f   :  { %5353 = shalt.err (!%p5350_p5)
}
  0x80   :  { %s5650_s14 = smov 1024   ;;  %s5651_s3 = smov 64  }
  0x81   :  { %180 = dma.hbm_to_vmem [thread:$0]  %s6847_s16, 8192, %s175_s22, [#allocation21], %s5650_s14, %s5650_s14, %s5651_s3  }
  0x82   :  { %s5652_s25 = smov [#allocation23]   ;;  %s5653_s12 = smov [#allocation26]  }
  0x83   :  { %s198_s1 = sshll.u32 %s5652_s25, 4  ;;  %s222_s28 = sshll.u32 %s5653_s12, 4  ;;  %s199_s1 = int_to_ptr.vmem [resolvable:$true] %s198_s1  ;;  %s5871_s28 = int_to_ptr.vmem [resolvable:$true] %s222_s28 }
  0x84   :  { %s5354_s8 = scalar_lea.hbm %s6849_s18, 8192 }
  0x85   :  { %p5355_p6 = scmp.ne.s32.totalorder %s6849_s18, %s5354_s8  ;;  %p5358_p7 = scmp.lt.u32.totalorder %s5354_s8, %s6849_s18 }
  0x87   :  { %p5360_p8 = pnand %p5358_p7, %p5355_p6 }
  0x89   :  { %5363 = shalt.err (!%p5360_p8)
}
  0x8a   :  { %s5364_s16 = scalar_lea.vmem %s199_s1, 8192  ;;  %p5369_p10 = scmp.lt.s32.totalorder %s199_s1, %s199_s1 }
  0x8b   :  { %p5365_p9 = scmp.ne.s32.totalorder %s199_s1, %s5364_s16  ;;  %p5370_p11 = scmp.lt.s32.totalorder %s5364_s16, %s5364_s16 }
  0x8d   :  { %p5371_p12 = por %p5370_p11, %p5369_p10 }
  0x8f   :  { %p5372_p13 = pnand %p5371_p12, %p5365_p9 }
  0x91   :  { %5375 = shalt.err (!%p5372_p13)
}
  0x92   :  { %204 = dma.hbm_to_vmem [thread:$0]  %s6849_s18, 8192, %s199_s1, [#allocation24], %s5650_s14, %s5650_s14, %s5651_s3  }
  0x93   :  { %s5376_s4 = scalar_lea.hbm %s6851_s20, 2048 }
  0x94   :  { %p5377_p0 = scmp.ne.s32.totalorder %s6851_s20, %s5376_s4  ;;  %p5380_p1 = scmp.lt.u32.totalorder %s5376_s4, %s6851_s20 }
  0x96   :  { %p5382_p2 = pnand %p5380_p1, %p5377_p0 }
  0x98   :  { %5385 = shalt.err (!%p5382_p2)
}
  0x99   :  { %s5386_s8 = scalar_lea.vmem %s5871_s28, 2048  ;;  %p5391_p4 = scmp.lt.s32.totalorder %s5871_s28, %s5871_s28 }
  0x9a   :  { %p5387_p3 = scmp.ne.s32.totalorder %s5871_s28, %s5386_s8  ;;  %p5392_p5 = scmp.lt.s32.totalorder %s5386_s8, %s5386_s8 }
  0x9c   :  { %p5393_p6 = por %p5392_p5, %p5391_p4 }
  0x9e   :  { %p5394_p7 = pnand %p5393_p6, %p5387_p3 }
  0xa0   :  { %5397 = shalt.err (!%p5394_p7)
}
  0xa1   :  { %228 = dma.hbm_to_vmem [thread:$0]  %s6851_s20, 2048, %s5871_s28, [#allocation27], %s5645_s24, %s5645_s24, %s5646_s26  }
  0xa2   :  { %s5654_s0 = smov [#allocation2]   ;;  %s5655_s7 = smov [#allocation7]  }
  0xa3   :  { %s51_s27 = sshll.u32 %s5654_s0, 4  ;;  %s73_s30 = sshll.u32 %s5655_s7, 4  ;;  %s52_s27 = int_to_ptr.vmem [resolvable:$true] %s51_s27  ;;  %s74_s30 = int_to_ptr.vmem [resolvable:$true] %s73_s30 }
  0xa4   :  { %s6939_s5 = sld [smem:[#allocation104_spill]] }
  0xaa   :  { %s5398_s29 = scalar_lea.hbm %s6939_s5, 16 }
  0xab   :  { %p5399_p8 = scmp.ne.s32.totalorder %s6939_s5, %s5398_s29  ;;  %p5402_p9 = scmp.lt.u32.totalorder %s5398_s29, %s6939_s5 }
  0xad   :  { %p5404_p10 = pnand %p5402_p9, %p5399_p8 }
  0xaf   :  { %5407 = shalt.err (!%p5404_p10)
}
  0xb0   :  { %s5408_s20 = scalar_lea.vmem %s52_s27, 16  ;;  %s5412_s28 = scalar_lea.vmem %s52_s27, 32 }
  0xb1   :  { %p5409_p11 = scmp.ne.s32.totalorder %s52_s27, %s5408_s20  ;;  %p5413_p12 = scmp.lt.s32.totalorder %s52_s27, %s52_s27 }
  0xb2   :  { %p5414_p13 = scmp.lt.s32.totalorder %s5412_s28, %s5408_s20 }
  0xb4   :  { %p5415_p0 = por %p5414_p13, %p5413_p12 }
  0xb6   :  { %p5416_p1 = pnand %p5415_p0, %p5409_p11 }
  0xb8   :  { %5419 = shalt.err (!%p5416_p1)
}
  0xb9   :  { %54 = dma.hbm_to_vmem [thread:$0]  %s6939_s5, 16, %s52_s27, [#allocation3]  }
  0xba   :  { %s6940_s1 = sld [smem:[#allocation106_spill]] }
  0xc0   :  { %s5420_s0 = scalar_lea.hbm %s6940_s1, 64 }
  0xc1   :  { %p5421_p2 = scmp.ne.s32.totalorder %s6940_s1, %s5420_s0  ;;  %p5424_p3 = scmp.lt.u32.totalorder %s5420_s0, %s6940_s1 }
  0xc3   :  { %p5426_p4 = pnand %p5424_p3, %p5421_p2 }
  0xc5   :  { %5429 = shalt.err (!%p5426_p4)
}
  0xc6   :  { %s5430_s23 = scalar_lea.vmem %s74_s30, 64  ;;  %p5435_p6 = scmp.lt.s32.totalorder %s74_s30, %s74_s30 }
  0xc7   :  { %p5431_p5 = scmp.ne.s32.totalorder %s74_s30, %s5430_s23  ;;  %p5436_p7 = scmp.lt.s32.totalorder %s5430_s23, %s5430_s23 }
  0xc9   :  { %p5437_p8 = por %p5436_p7, %p5435_p6 }
  0xcb   :  { %p5438_p9 = pnand %p5437_p8, %p5431_p5 }
  0xcd   :  { %5441 = shalt.err (!%p5438_p9)
}
  0xce   :  { %76 = dma.hbm_to_vmem [thread:$0]  %s6940_s1, 64, %s74_s30, [#allocation6]  }
  0xcf   :  { %s5656_s4 = smov [#allocation10]   ;;  %s5657_s12 = smov [#allocation13]  }
  0xd0   :  { %s95_s25 = sshll.u32 %s5656_s4, 4  ;;  %s117_s20 = sshll.u32 %s5657_s12, 4  ;;  %s96_s25 = int_to_ptr.vmem [resolvable:$true] %s95_s25  ;;  %s118_s20 = int_to_ptr.vmem [resolvable:$true] %s117_s20 }
  0xd1   :  { %s6941_s6 = sld [smem:[#allocation108_spill]] }
  0xd7   :  { %s5442_s8 = scalar_lea.hbm %s6941_s6, 32 }
  0xd8   :  { %p5443_p10 = scmp.ne.s32.totalorder %s6941_s6, %s5442_s8  ;;  %p5446_p11 = scmp.lt.u32.totalorder %s5442_s8, %s6941_s6 }
  0xda   :  { %p5448_p12 = pnand %p5446_p11, %p5443_p10 }
  0xdc   :  { %5451 = shalt.err (!%p5448_p12)
}
  0xdd   :  { %s5452_s30 = scalar_lea.vmem %s96_s25, 32  ;;  %p5457_p0 = scmp.lt.s32.totalorder %s96_s25, %s96_s25 }
  0xde   :  { %p5453_p13 = scmp.ne.s32.totalorder %s96_s25, %s5452_s30  ;;  %p5458_p1 = scmp.lt.s32.totalorder %s5452_s30, %s5452_s30 }
  0xe0   :  { %p5459_p2 = por %p5458_p1, %p5457_p0 }
  0xe2   :  { %p5460_p3 = pnand %p5459_p2, %p5453_p13 }
  0xe4   :  { %5463 = shalt.err (!%p5460_p3)
}
  0xe5   :  { %98 = dma.hbm_to_vmem [thread:$0]  %s6941_s6, 32, %s96_s25, [#allocation9]  }
  0xe6   :  { %s5464_s27 = scalar_lea.hbm %s6840_s9, 16 }
  0xe7   :  { %p5465_p4 = scmp.ne.s32.totalorder %s6840_s9, %s5464_s27  ;;  %p5468_p5 = scmp.lt.u32.totalorder %s5464_s27, %s6840_s9 }
  0xe9   :  { %p5470_p6 = pnand %p5468_p5, %p5465_p4 }
  0xeb   :  { %5473 = shalt.err (!%p5470_p6)
}
  0xec   :  { %s5474_s2 = scalar_lea.vmem %s118_s20, 16  ;;  %s5478_s8 = scalar_lea.vmem %s118_s20, 32 }
  0xed   :  { %p5475_p7 = scmp.ne.s32.totalorder %s118_s20, %s5474_s2  ;;  %p5479_p8 = scmp.lt.s32.totalorder %s118_s20, %s118_s20 }
  0xee   :  { %p5480_p9 = scmp.lt.s32.totalorder %s5478_s8, %s5474_s2 }
  0xf0   :  { %p5481_p10 = por %p5480_p9, %p5479_p8 }
  0xf2   :  { %p5482_p11 = pnand %p5481_p10, %p5475_p7 }
  0xf4   :  { %5485 = shalt.err (!%p5482_p11)
}
  0xf5   :  { %120 = dma.hbm_to_vmem [thread:$0]  %s6840_s9, 16, %s118_s20, [#allocation12]  }
  0xf6   :  { %s5658_s18 = smov [#allocation16]   ;;  %s5659_s7 = smov [#allocation19]  }
  0xf7   :  { %s143_s0 = sshll.u32 %s5658_s18, 4  ;;  %s165_s16 = sshll.u32 %s5659_s7, 4  ;;  %s144_s0 = int_to_ptr.vmem [resolvable:$true] %s143_s0  ;;  %s166_s16 = int_to_ptr.vmem [resolvable:$true] %s165_s16 }
  0xf8   :  { %s5486_s22 = scalar_lea.hbm %s6844_s13, 16 }
  0xf9   :  { %p5487_p12 = scmp.ne.s32.totalorder %s6844_s13, %s5486_s22  ;;  %p5490_p13 = scmp.lt.u32.totalorder %s5486_s22, %s6844_s13 }
  0xfb   :  { %p5492_p0 = pnand %p5490_p13, %p5487_p12 }
  0xfd   :  { %5495 = shalt.err (!%p5492_p0)
}
  0xfe   :  { %s5496_s9 = scalar_lea.vmem %s144_s0, 16  ;;  %s5500_s20 = scalar_lea.vmem %s144_s0, 32 }
  0xff   :  { %p5497_p1 = scmp.ne.s32.totalorder %s144_s0, %s5496_s9  ;;  %p5501_p2 = scmp.lt.s32.totalorder %s144_s0, %s144_s0 }
 0x100   :  { %p5502_p3 = scmp.lt.s32.totalorder %s5500_s20, %s5496_s9 }
 0x102   :  { %p5503_p4 = por %p5502_p3, %p5501_p2 }
 0x104   :  { %p5504_p5 = pnand %p5503_p4, %p5497_p1 }
 0x106   :  { %5507 = shalt.err (!%p5504_p5)
}
 0x107   :  { %146 = dma.hbm_to_vmem [thread:$0]  %s6844_s13, 16, %s144_s0, [#allocation15]  }
 0x108   :  { %s5508_s8 = scalar_lea.hbm %s6846_s15, 16 }
 0x109   :  { %p5509_p6 = scmp.ne.s32.totalorder %s6846_s15, %s5508_s8  ;;  %p5512_p7 = scmp.lt.u32.totalorder %s5508_s8, %s6846_s15 }
 0x10b   :  { %p5514_p8 = pnand %p5512_p7, %p5509_p6 }
 0x10d   :  { %5517 = shalt.err (!%p5514_p8)
}
 0x10e   :  { %s5518_s30 = scalar_lea.vmem %s166_s16, 16  ;;  %s5522_s1 = scalar_lea.vmem %s166_s16, 32 }
 0x10f   :  { %p5519_p9 = scmp.ne.s32.totalorder %s166_s16, %s5518_s30  ;;  %p5523_p10 = scmp.lt.s32.totalorder %s166_s16, %s166_s16 }
 0x110   :  { %p5524_p11 = scmp.lt.s32.totalorder %s5522_s1, %s5518_s30 }
 0x112   :  { %p5525_p12 = por %p5524_p11, %p5523_p10 }
 0x114   :  { %p5526_p13 = pnand %p5525_p12, %p5519_p9 }
 0x116   :  { %5529 = shalt.err (!%p5526_p13)
}
 0x117   :  { %168 = dma.hbm_to_vmem [thread:$0]  %s6846_s15, 16, %s166_s16, [#allocation18]  }
 0x118   :  { %s5660_s22 = smov [#allocation22]   ;;  %s5661_s23 = smov [#allocation25]  }
 0x119   :  { %s186_s29 = sshll.u32 %s5660_s22, 4  ;;  %s210_s27 = sshll.u32 %s5661_s23, 4  ;;  %s187_s29 = int_to_ptr.vmem [resolvable:$true] %s186_s29  ;;  %s5980_s27 = int_to_ptr.vmem [resolvable:$true] %s210_s27 }
 0x11a   :  { %s5530_s20 = scalar_lea.hbm %s6848_s17, 8192 }
 0x11b   :  { %p5531_p0 = scmp.ne.s32.totalorder %s6848_s17, %s5530_s20  ;;  %p5534_p1 = scmp.lt.u32.totalorder %s5530_s20, %s6848_s17 }
 0x11d   :  { %p5536_p2 = pnand %p5534_p1, %p5531_p0 }
 0x11f   :  { %5539 = shalt.err (!%p5536_p2)
}
 0x120   :  { %s5540_s15 = scalar_lea.vmem %s187_s29, 8192  ;;  %p5545_p4 = scmp.lt.s32.totalorder %s187_s29, %s187_s29 }
 0x121   :  { %p5541_p3 = scmp.ne.s32.totalorder %s187_s29, %s5540_s15  ;;  %p5546_p5 = scmp.lt.s32.totalorder %s5540_s15, %s5540_s15 }
 0x123   :  { %p5547_p6 = por %p5546_p5, %p5545_p4 }
 0x125   :  { %p5548_p7 = pnand %p5547_p6, %p5541_p3 }
 0x127   :  { %5551 = shalt.err (!%p5548_p7)
}
 0x128   :  { %192 = dma.hbm_to_vmem [thread:$0]  %s6848_s17, 8192, %s187_s29, [#allocation21], %s5650_s14, %s5650_s14, %s5651_s3  }
 0x129   :  { %s5552_s18 = scalar_lea.hbm %s6850_s19, 16384 }
 0x12a   :  { %p5553_p8 = scmp.ne.s32.totalorder %s6850_s19, %s5552_s18  ;;  %p5556_p9 = scmp.lt.u32.totalorder %s5552_s18, %s6850_s19 }
 0x12c   :  { %p5558_p10 = pnand %p5556_p9, %p5553_p8 }
 0x12e   :  { %5561 = shalt.err (!%p5558_p10)
}
 0x12f   :  { %s5562_s0 = scalar_lea.vmem %s5980_s27, 16384  ;;  %p5567_p12 = scmp.lt.s32.totalorder %s5980_s27, %s5980_s27 }
 0x130   :  { %p5563_p11 = scmp.ne.s32.totalorder %s5980_s27, %s5562_s0  ;;  %p5568_p13 = scmp.lt.s32.totalorder %s5562_s0, %s5562_s0 }
 0x132   :  { %p5569_p0 = por %p5568_p13, %p5567_p12 }
 0x134   :  { %p5570_p1 = pnand %p5569_p0, %p5563_p11 }
 0x136   :  { %5573 = shalt.err (!%p5570_p1)
}
 0x137   :  { %216 = dma.hbm_to_vmem [thread:$0]  %s6850_s19, 16384, %s5980_s27, [#allocation24], %s5645_s24, %s5645_s24, %s5646_s26  }
 0x138   :  { %s5662_s22 = smov [#allocation28]   ;;  %s5574_s9 = scalar_lea.hbm %s6852_s21, 64 }
 0x139   :  { %s235_s29 = sshll.u32 %s5662_s22, 4  ;;  %p5575_p2 = scmp.ne.s32.totalorder %s6852_s21, %s5574_s9  ;;  %s236_s29 = int_to_ptr.vmem [resolvable:$true] %s235_s29 }
 0x13a   :  { %p5578_p3 = scmp.lt.u32.totalorder %s5574_s9, %s6852_s21 }
 0x13c   :  { %p5580_p4 = pnand %p5578_p3, %p5575_p2 }
 0x13e   :  { %5583 = shalt.err (!%p5580_p4)
}
 0x13f   :  { %s5584_s2 = scalar_lea.vmem %s236_s29, 64  ;;  %p5589_p6 = scmp.lt.s32.totalorder %s236_s29, %s236_s29 }
 0x140   :  { %p5585_p5 = scmp.ne.s32.totalorder %s236_s29, %s5584_s2  ;;  %p5590_p7 = scmp.lt.s32.totalorder %s5584_s2, %s5584_s2 }
 0x142   :  { %p5591_p8 = por %p5590_p7, %p5589_p6 }
 0x144   :  { %p5592_p9 = pnand %p5591_p8, %p5585_p5 }
 0x146   :  { %5595 = shalt.err (!%p5592_p9)
}
 0x147   :  { %238 = dma.hbm_to_vmem [thread:$0]  %s6852_s21, 64, %s236_s29, [#allocation27]  }
 0x148   :  { %5618 = dma.done.wait [#allocation3], 16  }
 0x149   :  { %5619 = vsyncadd [#allocation3], 4294967280 }
 0x14a   :  { %5620 = dma.done.wait [#allocation6], 4672  }
 0x14b   :  { %5621 = vsyncadd [#allocation6], 4294962624 }
 0x14c   :  { %5622 = dma.done.wait [#allocation9], 2336  }
 0x14d   :  { %5623 = vsyncadd [#allocation9], 4294964960 }
 0x14e   :  { %5624 = dma.done.wait [#allocation12], 4112  }
 0x14f   :  { %5625 = vsyncadd [#allocation12], 4294963184 }
 0x150   :  { %5626 = dma.done.wait [#allocation15], 2320  }
 0x151   :  { %5627 = vsyncadd [#allocation15], 4294964976 }
 0x152   :  { %5628 = dma.done.wait [#allocation18], 1168  }
 0x153   :  { %5629 = vsyncadd [#allocation18], 4294966128 }
 0x154   :  { %5630 = dma.done.wait [#allocation21], 16384  }
 0x155   :  { %5631 = vsyncadd [#allocation21], 4294950912 }
 0x156   :  { %5632 = dma.done.wait [#allocation24], 24576  }
 0x157   :  { %5633 = vsyncadd [#allocation24], 4294942720 }
 0x158   :  { %5634 = dma.done.wait [#allocation27], 2112  }
 0x159   :  { %5635 = vsyncadd [#allocation27], 4294965184  ;;  %v6863_v0 = vmov 0.0|0.0   ;;  %vm5664_vm0 = vmmov 0   ;;  %v6865_v1 = vmov 0.0   ;;  %vm305_vm1 = vcmask 285696  }
 0x15a   :  { %4462 = vmatprep.subr.bf16.mxu1 %v6863_v0  ;;  %4346 = vmatprep.mubr.msk.f32.mxu1 %vm5664_vm0, %v6865_v1  ;;  %s6942_s27 = sld [smem:[#allocation103_spill]]  ;;  %s6943_s1 = sld [smem:[#allocation101_spill]]  ;;  %vm312_vm2 = vcmask 1042432   ;;  %v465_v12 = vlaneseq  ;;  %v6068_v15 = vld [vmem:[#allocation28] sm:$0xf]  ;;  %vm470_vm3 = vcmask 588800  }
 0x15b   :  { %s6944_s22 = sld [smem:[#allocation102_spill]]  ;;  %v3910_v16 = vld [vmem:[#allocation2] ss:$0 sm:$0xff]  ;;  %v548_v60 = vld [vmem:[#allocation5 + $0x8] sm:$0xff]  ;;  %v547_v63 = vld [vmem:[#allocation5] sm:$0xff]  ;;  %vm966_vm4 = vcmask 130048  }
 0x15c   :  { %v6063_v13 = vshrl.u32 %v465_v12, 7  ;;  %v552_v61 = vld [vmem:[#allocation5 + $0x28] sm:$0xff]  ;;  %vm1594_vm5 = vcmask 523264   ;;  %s7069_s20 = sld [smem:[#allocation109_spill]]  ;;  %s5666_s4 = smov [#allocation29]   ;;  %vm3881_vm6 = vcmask 64512  }
 0x15d   :  { %v4468_v62 = vpack.c.bf16 %v552_v61, %v548_v60  ;;  %v795_v60 = vld [vmem:[#allocation8 + $0x18] sm:$0xff]  ;;  %s3891_s12 = sshll.u32 %s5666_s4, 4  ;;  %s3892_s12 = int_to_ptr.vmem [resolvable:$true] %s3891_s12 }
 0x15e   :  { %v6066_v14 = vsub.s32 2, %v6063_v13  ;;  %v6075_v18 = vsub.s32 0, %v6063_v13  ;;  %v579_v61 = vld [vmem:[#allocation5 + $0x100] sm:$0xff]  ;;  %s5596_s28 = scalar_lea.vmem %s3892_s12, 128  ;;  %p5601_p11 = scmp.lt.s32.totalorder %s3892_s12, %s3892_s12 }
 0x15f   :  { %p5597_p10 = scmp.ne.s32.totalorder %s3892_s12, %s5596_s28  ;;  %p5602_p12 = scmp.lt.s32.totalorder %s5596_s28, %s5596_s28 }
 0x160   :  { %v293_v2 = vld [vmem:[%s6942_s27] sm:$0xff]  ;;  %v294_v3 = vld [vmem:[%s6942_s27 + $0x8] sm:$0xff]  ;;  %v295_v4 = vld [vmem:[%s6942_s27 + $0x10] sm:$0xff]  ;;  %6945 = vst [vmem:[#allocation40_spill] sm:$0xff] %v6066_v14  ;;  %v6072_v17 = vrot.slane %v6068_v15, %v6066_v14  ;;  %v6087_v27 = vrot.slane %v6068_v15, %v6075_v18 }
 0x161   :  { %v4454_v5 = vpack.c.bf16 %v294_v3, %v293_v2  ;;  %v296_v6 = vld [vmem:[%s6942_s27 + $0x18] sm:$0xff]  ;;  %v291_v7 = vld [vmem:[%s6943_s1] sm:$0xff]  ;;  %v292_v11 = vld [vmem:[%s6943_s1 + $0x8] sm:$0xff]  ;;  %p5603_p13 = por %p5602_p12, %p5601_p11 }
 0x162   :  { %v4458_v8 = vpack.c.bf16 %v296_v6, %v295_v4  ;;  %4333 = vmatprep.mubr.msk.f32.mxu0 %vm305_vm1, %v291_v7  ;;  %v297_v9 = vld [vmem:[%s6942_s27 + $0x20] sm:$0x7]  ;;  %v549_v6 = vld [vmem:[#allocation5 + $0x10] sm:$0xff] }
 0x163   :  { %4455 = vmatprep.subr.bf16.mxu0 %v4454_v5  ;;  %4464 = vmatpush3.bf16.msra.mxu1 %v4454_v5  ;;  %v391_v10 = vld [vmem:[%s6944_s22] sm:$0xff]  ;;  %v553_v7 = vld [vmem:[#allocation5 + $0x30] sm:$0xff]  ;;  %p5604_p0 = pnand %p5603_p13, %p5597_p10 }
 0x164   :  { %4457 = vmatpush3.bf16.msra.mxu0 %v4454_v5  ;;  %4465 = vmatprep.subr.bf16.mxu1 %v6863_v0  ;;  %v551_v2 = vld [vmem:[#allocation5 + $0x20] sm:$0xff]  ;;  %v550_v3 = vld [vmem:[#allocation5 + $0x18] sm:$0xff] }
 0x165   :  { %4459 = vmatprep.subr.bf16.mxu0 %v4458_v8  ;;  %v4470_v4 = vpack.c.bf16 %v551_v2, %v547_v63  ;;  %v554_v5 = vld [vmem:[#allocation5 + $0x38] sm:$0xff]  ;;  %v581_v2 = vld [vmem:[#allocation5 + $0x110] sm:$0xff] }
 0x167   :  { %4467 = vmatpush3.bf16.msra.mxu1 %v4458_v8 }
 0x168   :  { %4461 = vmatpush3.bf16.msra.mxu0 %v4458_v8  ;;  %4344 = vmatprep.subr.mxu1 %v6865_v1  ;;  %v4484_v8 = vpack.c.bf16 %v554_v5, %v550_v3 }
 0x169   :  { %4331 = vmatprep.subr.msk.mxu0 %vm312_vm2, %v297_v9 }
 0x16b   :  { %4345 = vmatpush3.msk.msra.mxu1 %vm312_vm2, %v297_v9 }
 0x16c   :  { %4332 = vmatpush3.msk.msra.mxu0 %vm312_vm2, %v297_v9  ;;  %4347 = vmatmul.mubr.msk.f32.vlgmr.msra.gmra.mrb[0].mxu1 %vm305_vm1, %v391_v10  ;;  %v4486_v9 = vpack.c.bf16 %v553_v7, %v549_v6  ;;  %v556_v10 = vld [vmem:[#allocation5 + $0x48] sm:$0xff] }
 0x16d   :  { %4334 = vmatmul.mubr.msk.f32.vlgmr.msra.gmra.mrb[0].mxu0 %vm305_vm1, %v292_v11  ;;  %752 = vmatprep.mubr.f32.mxu1 %v6865_v1  ;;  %v560_v11 = vld [vmem:[#allocation5 + $0x68] sm:$0xff] }
 0x16e   :  { %675 = vmatprep.mubr.f32.mxu0 %v6865_v1  ;;  %4469 = vmatprep.subr.bf16.mxu0 %v4468_v62  ;;  %v4472_v12 = vpack.c.bf16 %v560_v11, %v556_v10  ;;  %v582_v62 = vld [vmem:[#allocation5 + $0x118] sm:$0xff] }
 0x16f   :  { %4471 = vmatpush1.bf16.msra.mxu0 %v4470_v4  ;;  %4485 = vmatprep.subr.bf16.mxu1 %v4484_v8 }
 0x170   :  { %4487 = vmatpush1.bf16.msra.mxu1 %v4486_v9  ;;  %4473 = vmatprep.subr.bf16.mxu0 %v4472_v12 }
 0x23f   :  { %v461_v19 = vpop.f32.mrb[0].mxu1 }
 0x240   :  { %v6077_v20 = vadd.f32 %v3910_v16, %v461_v19  ;;  %v4335_v21 = vpop.f32.mrb[0].mxu0  ;;  %v4348_v22 = vpop.f32.mrb[1].mxu1  ;;  %v559_v19 = vld [vmem:[#allocation5 + $0x60] sm:$0xff] }
 0x241   :  { %v6079_v23 = vadd.f32 %v4335_v21, %v3910_v16  ;;  %v382_v24 = vpop.f32.mrb[1].mxu0  ;;  %v558_v21 = vld [vmem:[#allocation5 + $0x58] sm:$0xff] }
 0x242   :  { %v6081_v25 = vadd.f32 %v3910_v16, %v382_v24  ;;  %v773_v26 = vmul.f32 %v6072_v17, %v6077_v20  ;;  %v765_v35 = vmul.f32 %v6077_v20, %v6077_v20  ;;  %v555_v16 = vld [vmem:[#allocation5 + $0x40] sm:$0xff]  ;;  %v562_v24 = vld [vmem:[#allocation5 + $0x78] sm:$0xff] }
 0x243   :  { %v482_v31 = vmul.f32 %v6079_v23, %v6079_v23  ;;  %v506_v34 = vmul.f32 %v6072_v17, %v6079_v23  ;;  %v4474_v22 = vpack.c.bf16 %v559_v19, %v555_v16  ;;  %v6131_v19 = vsub.s32 1, %v6063_v13 }
 0x244   :  { %v774_v28 = vsel %vm470_vm3, %v773_v26, 0.0  ;;  %v505_v29 = vmul.f32 %v6072_v17, %v6081_v25  ;;  %v481_v30 = vmul.f32 %v6081_v25, %v6081_v25  ;;  %v766_v39 = vmul.f32 %v765_v35, %v6087_v27  ;;  %v557_v26 = vld [vmem:[#allocation5 + $0x50] sm:$0xff]  ;;  %v567_v35 = vld [vmem:[#allocation5 + $0xa0] sm:$0xff] }
 0x245   :  { %775 = vadd.xlane.f32.xlu1 %v774_v28  ;;  %v488_v37 = vmul.f32 %v6087_v27, %v482_v31  ;;  %v510_v38 = vsel %vm470_vm3, %v506_v34, 0.0  ;;  %v561_v28 = vld [vmem:[#allocation5 + $0x70] sm:$0xff]  ;;  %4475 = vmatpush1.bf16.msra.mxu0 %v4474_v22  ;;  %v564_v31 = vld [vmem:[#allocation5 + $0x88] sm:$0xff]  ;;  %v563_v34 = vld [vmem:[#allocation5 + $0x80] sm:$0xff] }
 0x246   :  { %v507_v32 = vsel %vm470_vm3, %v505_v29, 0.0  ;;  %v487_v33 = vmul.f32 %v6087_v27, %v481_v30  ;;  %v767_v41 = vsel %vm470_vm3, %v766_v39, 0.0  ;;  %v4488_v29 = vpack.c.bf16 %v562_v24, %v558_v21  ;;  %v565_v39 = vld [vmem:[#allocation5 + $0x90] sm:$0xff] }
 0x247   :  { %508 = vadd.xlane.f32.xlu0 %v507_v32  ;;  %v492_v40 = vsel %vm470_vm3, %v488_v37, 0.0  ;;  %v4490_v30 = vpack.c.bf16 %v561_v28, %v557_v26  ;;  %v568_v32 = vld [vmem:[#allocation5 + $0xa8] sm:$0xff]  ;;  %v4478_v37 = vpack.c.bf16 %v567_v35, %v563_v34  ;;  %v6135_v24 = vrot.slane %v6068_v15, %v6131_v19  ;;  %v794_v34 = vld [vmem:[#allocation8 + $0x10] sm:$0xff] }
 0x248   :  { %v489_v36 = vsel %vm470_vm3, %v487_v33, 0.0  ;;  %4489 = vmatprep.subr.bf16.mxu1 %v4488_v29  ;;  %v4476_v33 = vpack.c.bf16 %v568_v32, %v564_v31 }
 0x249   :  { %490 = vadd.xlane.f32.xlu1 %v489_v36  ;;  %v566_v36 = vld [vmem:[#allocation5 + $0x98] sm:$0xff]  ;;  %4491 = vmatpush1.bf16.msra.mxu1 %v4490_v30  ;;  %v537_v31 = vmul.f32 %v6135_v24, %v6081_v25 }
 0x24a   :  { %4477 = vmatprep.subr.bf16.mxu0 %v4476_v33  ;;  %v792_v33 = vld [vmem:[#allocation8] sm:$0xff] }
 0x24b   :  { %511 = vadd.xlane.f32.xlu0 %v510_v38  ;;  %v570_v38 = vld [vmem:[#allocation5 + $0xb8] sm:$0xff]  ;;  %4479 = vmatpush1.bf16.msra.mxu0 %v4478_v37  ;;  %v797_v37 = vld [vmem:[#allocation8 + $0x28] sm:$0xff] }
 0x24d   :  { %493 = vadd.xlane.f32.xlu1 %v492_v40  ;;  %v569_v40 = vld [vmem:[#allocation5 + $0xb0] sm:$0xff] }
 0x251   :  { %768 = vadd.xlane.f32.xlu1 %v767_v41  ;;  %v4492_v41 = vpack.c.bf16 %v570_v38, %v566_v36  ;;  %v799_v38 = vld [vmem:[#allocation8 + $0x38] sm:$0xff] }
 0x253   :  { %4493 = vmatprep.subr.bf16.mxu1 %v4492_v41 }
 0x2d2   :  { %v776_v42 = vpop.xlane.xlu1 %775 }
 0x2d3   :  { %v777_v44 = vmul.f32 0.125, %v776_v42  ;;  %v4494_v42 = vpack.c.bf16 %v569_v40, %v565_v39 }
 0x2d4   :  { %v509_v43 = vpop.xlane.xlu0 %508 }
 0x2d5   :  { %v513_v45 = vmul.f32 0.125, %v509_v43  ;;  %v6112_v48 = vsub.f32 %v6077_v20, %v777_v44  ;;  %v572_v43 = vld [vmem:[#allocation5 + $0xc8] sm:$0xff]  ;;  %4495 = vmatpush1.bf16.msra.mxu1 %v4494_v42  ;;  %v4502_v42 = vpack.c.bf16 %v794_v34, %v792_v33 }
 0x2d6   :  { %v576_v44 = vld [vmem:[#allocation5 + $0xe8] sm:$0xff]  ;;  %v491_v3 = vpop.xlane.xlu1 %490 }
 0x2d7   :  { %v6109_v46 = vsub.f32 %v6081_v25, %v513_v45  ;;  %v779_v55 = vmul.f32 %v6112_v48, %v6112_v48  ;;  %v4480_v45 = vpack.c.bf16 %v576_v44, %v572_v43  ;;  %v495_v4 = vmul.f32 0.25, %v491_v3 }
 0x2d8   :  { %v512_v47 = vpop.xlane.xlu0 %511  ;;  %v538_v43 = vmul.f32 %v6135_v24, %v6079_v23 }
 0x2d9   :  { %v514_v49 = vmul.f32 0.125, %v512_v47  ;;  %v517_v50 = vmul.f32 %v6109_v46, %v6109_v46  ;;  %v780_v58 = vmul.f32 %v779_v55, %v6072_v17  ;;  %v571_v47 = vld [vmem:[#allocation5 + $0xc0] sm:$0xff]  ;;  %v577_v55 = vld [vmem:[#allocation5 + $0xf0] sm:$0xff]  ;;  %4481 = vmatprep.subr.bf16.mxu0 %v4480_v45  ;;  %v497_v6 = vadd.f32 0.01, %v495_v4 }
 0x2da   :  { %v494_v5 = vpop.xlane.xlu1 %493  ;;  %v541_v32 = vmul.f32 %v6109_v46, %v6072_v17  ;;  %v4504_v45 = vpack.c.bf16 %v799_v38, %v797_v37  ;;  %v796_v46 = vld [vmem:[#allocation8 + $0x20] sm:$0xff]  ;;  %v789_v4 = vmul.f32 %v6112_v48, %v6072_v17  ;;  %v583_v48 = vld [vmem:[#allocation7] sm:$0xf] }
 0x2db   :  { %v6117_v51 = vsub.f32 %v6079_v23, %v514_v49  ;;  %v519_v52 = vmul.f32 %v517_v50, %v6072_v17  ;;  %v781_v59 = vsel %vm470_vm3, %v780_v58, 0.0  ;;  %v575_v49 = vld [vmem:[#allocation5 + $0xe0] sm:$0xff]  ;;  %v574_v50 = vld [vmem:[#allocation5 + $0xd8] sm:$0xff]  ;;  %v580_v58 = vld [vmem:[#allocation5 + $0x108] sm:$0xff]  ;;  %v496_v7 = vmul.f32 0.25, %v494_v5 }
 0x2dc   :  { %5192 = vrsqrt.f32 %v497_v6  ;;  %v809_v6 = vld [vmem:[#allocation8 + $0x88] sm:$0xff] }
 0x2dd   :  { %v521_v53 = vsel %vm470_vm3, %v519_v52, 0.0  ;;  %v518_v54 = vmul.f32 %v6117_v51, %v6117_v51  ;;  %v4482_v52 = vpack.c.bf16 %v575_v49, %v571_v47  ;;  %v498_v10 = vadd.f32 0.01, %v496_v7  ;;  %v798_v47 = vld [vmem:[#allocation8 + $0x30] sm:$0xff] }
 0x2de   :  { %522 = vadd.xlane.f32.xlu0 %v521_v53  ;;  %v578_v53 = vld [vmem:[#allocation5 + $0xf8] sm:$0xff]  ;;  %v769_v26 = vpop.xlane.xlu1 %768  ;;  %v542_v25 = vmul.f32 %v6117_v51, %v6072_v17  ;;  %v4506_v23 = vpack.c.bf16 %v798_v47, %v796_v46  ;;  %v787_v7 = vmul.f32 %v6135_v24, %v6077_v20  ;;  %v810_v46 = vld [vmem:[#allocation10] sm:$0x3] }
 0x2df   :  { %v520_v56 = vmul.f32 %v518_v54, %v6072_v17  ;;  %v573_v54 = vld [vmem:[#allocation5 + $0xd0] sm:$0xff]  ;;  %4483 = vmatpush1.bf16.msra.mxu0 %v4482_v52  ;;  %v770_v30 = vmul.f32 0.25, %v769_v26  ;;  %v803_v52 = vld [vmem:[#allocation8 + $0x58] sm:$0xff]  ;;  %v596_v26 = vrot.slane %v583_v48, %v6066_v14  ;;  %v815_v47 = vrot.slane %v810_v46, %v6075_v18 }
 0x2e0   :  { %627 = vmatprep.subr.mxu0 %v580_v58  ;;  %v805_v58 = vld [vmem:[#allocation8 + $0x68] sm:$0xff] }
 0x2e1   :  { %v524_v57 = vsel %vm470_vm3, %v520_v56, 0.0  ;;  %v4496_v56 = vpack.c.bf16 %v578_v53, %v574_v50  ;;  %v771_v41 = vadd.f32 0.01, %v770_v30  ;;  %v801_v50 = vld [vmem:[#allocation8 + $0x48] sm:$0xff]  ;;  %v592_v30 = vrot.slane %v583_v48, %v6131_v19 }
 0x2e2   :  { %525 = vadd.xlane.f32.xlu0 %v524_v57  ;;  %v4498_v57 = vpack.c.bf16 %v577_v55, %v573_v54  ;;  %v4508_v55 = vpack.c.bf16 %v803_v52, %v801_v50  ;;  %v2300_v14 = vld [vmem:[#allocation25 + $0x1d8] sm:$0xff] }
 0x2e3   :  { %4497 = vmatprep.subr.bf16.mxu1 %v4496_v56  ;;  %628 = vmatpush1.msra.mxu0 %v579_v61  ;;  %v800_v56 = vld [vmem:[#allocation8 + $0x40] sm:$0xff] }
 0x2e4   :  { %4499 = vmatpush1.bf16.msra.mxu1 %v4498_v57  ;;  %v802_v57 = vld [vmem:[#allocation8 + $0x50] sm:$0xff] }
 0x2e5   :  { %704 = vmatprep.subr.mxu1 %v582_v62  ;;  %v804_v62 = vld [vmem:[#allocation8 + $0x60] sm:$0xff] }
 0x2e6   :  { %782 = vadd.xlane.f32.xlu0 %v781_v59  ;;  %v793_v59 = vld [vmem:[#allocation8 + $0x8] sm:$0xff]  ;;  %v5193_v29 = vpop.eup %5192 }
 0x2e7   :  { %v4500_v63 = vpack.c.bf16 %v795_v60, %v793_v59  ;;  %v539_v39 = vmul.f32 %v5193_v29, %v537_v31  ;;  %v807_v59 = vld [vmem:[#allocation8 + $0x78] sm:$0xff]  ;;  %v4510_v60 = vpack.c.bf16 %v802_v57, %v800_v56 }
 0x2e8   :  { %705 = vmatpush1.msra.mxu1 %v581_v2  ;;  %v4512_v61 = vpack.c.bf16 %v807_v59, %v805_v58 }
 0x2e9   :  { %4501 = vmatprep.subr.bf16.mxu0 %v4500_v63  ;;  %4516 = vmatprep.subr.bf16.mxu1 %v6863_v0  ;;  %v806_v63 = vld [vmem:[#allocation8 + $0x70] sm:$0xff] }
 0x2ea   :  { %v4514_v3 = vpack.c.bf16 %v806_v63, %v804_v62 }
 0x36b   :  { %v523_v8 = vpop.xlane.xlu0 %522 }
 0x36c   :  { %v527_v9 = vmul.f32 0.125, %v523_v8 }
 0x36e   :  { %v529_v11 = vadd.f32 1e-05, %v527_v9 }
 0x36f   :  { %v526_v12 = vpop.xlane.xlu0 %525 }
 0x370   :  { %5194 = vrsqrt.f32 %v529_v11  ;;  %v528_v16 = vmul.f32 0.125, %v526_v12 }
 0x371   :  { %5196 = vrsqrt.f32 %v498_v10  ;;  %v808_v10 = vld [vmem:[#allocation8 + $0x80] sm:$0xff] }
 0x372   :  { %v530_v21 = vadd.f32 1e-05, %v528_v16 }
 0x373   :  { %v783_v22 = vpop.xlane.xlu0 %782 }
 0x374   :  { %5198 = vrsqrt.f32 %v530_v21  ;;  %v784_v28 = vmul.f32 0.125, %v783_v22  ;;  %v467_v21 = vsub.s32 3, %v6063_v13  ;;  %v588_v22 = vrot.slane %v583_v48, %v6075_v18  ;;  %v1927_v13 = vld [vmem:[#allocation23 + $0x168] sm:$0xff] }
 0x376   :  { %v785_v36 = vadd.f32 1e-05, %v784_v28  ;;  %v600_v31 = vrot.slane %v583_v48, %v467_v21  ;;  %v1223_v48 = vld [vmem:[#allocation11 + $0x90] sm:$0xff] }
 0x378   :  { %5200 = vrsqrt.f32 %v785_v36 }
 0x379   :  { %5202 = vrsqrt.f32 %v771_v41 }
 0x37a   :  { %v5195_v35 = vpop.eup %5194 }
 0x37b   :  { %v543_v40 = vmul.f32 %v5195_v35, %v541_v32  ;;  %v5197_v15 = vpop.eup %5196 }
 0x37c   :  { %v540_v53 = vmul.f32 %v5197_v15, %v538_v43 }
 0x37d   :  { %v545_v44 = vadd.f32 %v543_v40, %v539_v39 }
 0x37e   :  { %v5199_v49 = vpop.eup %5198 }
 0x37f   :  { %3916 = vmatmul.mubr.msk.f32.vlgmr.msra.gmra.mrb[2].mxu0 %vm470_vm3, %v545_v44  ;;  %3918 = vmatmul.mubr.msk.f32.vlgmr.msra.gmra.mrb[2].mxu1 %vm470_vm3, %v545_v44  ;;  %v544_v54 = vmul.f32 %v5199_v49, %v542_v25 }
 0x380   :  { %4503 = vmatpush1.bf16.msra.mxu0 %v4502_v42  ;;  %681 = vmatprep.mubr.f32.mxu0 %v6865_v1 }
 0x381   :  { %758 = vmatprep.mubr.f32.mxu1 %v6865_v1  ;;  %4505 = vmatprep.subr.bf16.mxu0 %v4504_v45  ;;  %v546_v51 = vadd.f32 %v544_v54, %v540_v53  ;;  %v819_v53 = vrot.slane %v810_v46, %v6131_v19  ;;  %v1213_v46 = vld [vmem:[#allocation11 + $0x40] sm:$0xff] }
 0x382   :  { %v5201_v2 = vpop.eup %5200 }
 0x383   :  { %3917 = vmatmul.mubr.msk.f32.gmra.mrb[4].mxu0 %vm470_vm3, %v546_v51  ;;  %3919 = vmatmul.mubr.msk.f32.gmra.mrb[4].mxu1 %vm470_vm3, %v546_v51  ;;  %v5203_v5 = vpop.eup %5202  ;;  %v790_v8 = vmul.f32 %v5201_v2, %v789_v4 }
 0x384   :  { %4507 = vmatpush1.bf16.msra.mxu0 %v4506_v23  ;;  %889 = vmatprep.mubr.f32.mxu0 %v6865_v1  ;;  %v788_v9 = vmul.f32 %v5203_v5, %v787_v7  ;;  %v1221_v7 = vld [vmem:[#allocation11 + $0x80] sm:$0xff] }
 0x385   :  { %4509 = vmatprep.subr.bf16.mxu0 %v4508_v55  ;;  %4353 = vmatprep.mubr.msk.f32.mxu1 %vm5664_vm0, %v6865_v1 }
 0x386   :  { %v791_v11 = vadd.f32 %v790_v8, %v788_v9  ;;  %v1222_v8 = vld [vmem:[#allocation11 + $0x88] sm:$0xff]  ;;  %v1205_v9 = vld [vmem:[#allocation11] sm:$0xff] }
 0x388   :  { %4511 = vmatpush1.bf16.msra.mxu0 %v4510_v60 }
 0x389   :  { %4513 = vmatprep.subr.bf16.mxu0 %v4512_v61 }
 0x38c   :  { %4515 = vmatpush1.bf16.msra.mxu0 %v4514_v3 }
 0x38d   :  { %841 = vmatprep.subr.mxu0 %v809_v6 }
 0x390   :  { %842 = vmatpush1.msra.mxu0 %v808_v10  ;;  %v4528_v10 = vpack.c.bf16 %v1222_v8, %v1221_v7  ;;  %v1236_v7 = vld [vmem:[#allocation11 + $0xf8] sm:$0xff]  ;;  %v1219_v8 = vld [vmem:[#allocation11 + $0x70] sm:$0xff] }
 0x391   :  { %3920 = vmatmul.mubr.msk.f32.vlgmr.msra.gmra.mrb[6].mxu0 %vm470_vm3, %v791_v11  ;;  %4519 = vmatprep.subr.bf16.mxu0 %v6863_v0  ;;  %v1206_v11 = vld [vmem:[#allocation11 + $0x8] sm:$0xff] }
 0x392   :  { %4360 = vmatprep.mubr.msk.f32.mxu0 %vm5664_vm0, %v6865_v1 }
 0x452   :  { %v677_v12 = vpop.f32.mrb[2].mxu0  ;;  %v754_v16 = vpop.f32.mrb[2].mxu1 }
 0x453   :  { %v679_v28 = vpop.f32.mrb[3].mxu0  ;;  %v756_v29 = vpop.f32.mrb[3].mxu1  ;;  %v678_v34 = vadd.f32 %v677_v12, %v588_v22  ;;  %v755_v35 = vadd.f32 %v754_v16, %v596_v26  ;;  %v1224_v12 = vld [vmem:[#allocation11 + $0x98] sm:$0xff]  ;;  %v4530_v16 = vpack.c.bf16 %v1206_v11, %v1205_v9 }
 0x454   :  { %v680_v40 = vadd.f32 %v679_v28, %v592_v30  ;;  %v6168_v15 = vadd.f32 %v756_v29, %v600_v31  ;;  %v1208_v28 = vld [vmem:[#allocation11 + $0x18] sm:$0xff]  ;;  %v1225_v29 = vld [vmem:[#allocation11 + $0xa0] sm:$0xff] }
 0x456   :  { %v683_v32 = vpop.f32.mrb[4].mxu0  ;;  %v760_v33 = vpop.f32.mrb[4].mxu1 }
 0x457   :  { %v684_v36 = vadd.f32 %v683_v32, %v588_v22  ;;  %v761_v37 = vadd.f32 %v760_v33, %v596_v26  ;;  %v685_v38 = vpop.f32.mrb[5].mxu0  ;;  %v762_v39 = vpop.f32.mrb[5].mxu1  ;;  %v4532_v22 = vpack.c.bf16 %v1224_v12, %v1223_v48  ;;  %v1207_v26 = vld [vmem:[#allocation11 + $0x10] sm:$0xff]  ;;  %v1209_v33 = vld [vmem:[#allocation11 + $0x20] sm:$0xff] }
 0x458   :  { %v686_v41 = vadd.f32 %v685_v38, %v592_v30  ;;  %v6170_v42 = vadd.f32 %v762_v39, %v600_v31  ;;  %v1226_v30 = vld [vmem:[#allocation11 + $0xa8] sm:$0xff]  ;;  %v4534_v31 = vpack.c.bf16 %v1208_v28, %v1207_v26  ;;  %v1211_v39 = vld [vmem:[#allocation11 + $0x30] sm:$0xff]  ;;  %v3923_v12 = vld [vmem:[#allocation13] ss:$0 sm:$0xff] }
 0x459   :  { %v4517_v43 = vpack.c.bf16 %v684_v36, %v678_v34  ;;  %v4520_v25 = vpack.c.bf16 %v761_v37, %v755_v35  ;;  %v4536_v32 = vpack.c.bf16 %v1226_v30, %v1225_v29  ;;  %v1210_v34 = vld [vmem:[#allocation11 + $0x28] sm:$0xff]  ;;  %v1227_v35 = vld [vmem:[#allocation11 + $0xb0] sm:$0xff]  ;;  %v1228_v36 = vld [vmem:[#allocation11 + $0xb8] sm:$0xff] }
 0x45a   :  { %v4523_v44 = vpack.c.bf16 %v686_v41, %v680_v40  ;;  %v4526_v45 = vpack.c.bf16 %v6170_v42, %v6168_v15  ;;  %v4538_v37 = vpack.c.bf16 %v1210_v34, %v1209_v33  ;;  %v4540_v38 = vpack.c.bf16 %v1228_v36, %v1227_v35  ;;  %v1212_v40 = vld [vmem:[#allocation11 + $0x38] sm:$0xff]  ;;  %v1229_v41 = vld [vmem:[#allocation11 + $0xc0] sm:$0xff] }
 0x45b   :  { %4518 = vmatpush3.bf16.xpose.msra.mxu1 %v4517_v43  ;;  %4521 = vmatpush3.bf16.msra.mxu0 %v4520_v25  ;;  %v1230_v43 = vld [vmem:[#allocation11 + $0xc8] sm:$0xff]  ;;  %v4542_v25 = vpack.c.bf16 %v1212_v40, %v1211_v39  ;;  %v1220_v42 = vld [vmem:[#allocation11 + $0x78] sm:$0xff] }
 0x45c   :  { %4522 = vmatprep.subr.bf16.mxu1 %v6863_v0  ;;  %4525 = vmatprep.subr.bf16.mxu0 %v6863_v0  ;;  %v1346_v40 = vld [vmem:[%s6841_s10 + $0x20] sm:$0xff] }
 0x464   :  { %v891_v49 = vpop.f32.mrb[6].mxu0 }
 0x465   :  { %v892_v50 = vadd.f32 %v891_v49, %v815_v47  ;;  %v893_v52 = vpop.f32.mrb[7].mxu0  ;;  %v1214_v47 = vld [vmem:[#allocation11 + $0x48] sm:$0xff]  ;;  %v1231_v49 = vld [vmem:[#allocation11 + $0xd0] sm:$0xff] }
 0x466   :  { %v894_v54 = vadd.f32 %v893_v52, %v819_v53  ;;  %v4546_v52 = vpack.c.bf16 %v1214_v47, %v1213_v46  ;;  %v1349_v46 = vld [vmem:[%s6841_s10 + $0x38] sm:$0xff]  ;;  %v1352_v47 = vld [vmem:[%s6841_s10 + $0x50] sm:$0xff] }
 0x467   :  { %4354 = vmatmul.mubr.f32.vlgmr.msra.gmra.mrb[6].mxu1 %v892_v50  ;;  %v1232_v50 = vld [vmem:[#allocation11 + $0xd8] sm:$0xff] }
 0x468   :  { %4524 = vmatpush3.bf16.xpose.msra.mxu1 %v4523_v44  ;;  %4367 = vmatprep.mubr.msk.f32.mxu1 %vm5664_vm0, %v6865_v1  ;;  %v4544_v44 = vpack.c.bf16 %v1230_v43, %v1229_v41  ;;  %v4548_v53 = vpack.c.bf16 %v1232_v50, %v1231_v49  ;;  %v1342_v43 = vld [vmem:[%s6841_s10] sm:$0xff]  ;;  %v4564_v49 = vpack.c.bf16 %v1352_v47, %v1349_v46  ;;  %v1348_v50 = vld [vmem:[%s6841_s10 + $0x30] sm:$0xff] }
 0x469   :  { %4529 = vmatprep.subr.bf16.mxu1 %v4528_v10  ;;  %v1344_v47 = vld [vmem:[%s6841_s10 + $0x10] sm:$0xff] }
 0x46f   :  { %4368 = vmatmul.mubr.f32.vlgmr.msra.gmra.mrb[8].mxu1 %v894_v54  ;;  %v1215_v54 = vld [vmem:[#allocation11 + $0x50] sm:$0xff] }
 0x470   :  { %4531 = vmatpush3.bf16.msra.mxu1 %v4530_v16 }
 0x471   :  { %4533 = vmatprep.subr.bf16.mxu1 %v4532_v22 }
 0x474   :  { %4535 = vmatpush3.bf16.msra.mxu1 %v4534_v31 }
 0x475   :  { %4537 = vmatprep.subr.bf16.mxu1 %v4536_v32 }
 0x478   :  { %4539 = vmatpush3.bf16.msra.mxu1 %v4538_v37 }
 0x479   :  { %4541 = vmatprep.subr.bf16.mxu1 %v4540_v38 }
 0x47c   :  { %4543 = vmatpush3.bf16.msra.mxu1 %v4542_v25  ;;  %v1345_v25 = vld [vmem:[%s6841_s10 + $0x18] sm:$0xff] }
 0x47d   :  { %4545 = vmatprep.subr.bf16.mxu1 %v4544_v44  ;;  %v4562_v44 = vpack.c.bf16 %v1345_v25, %v1342_v43 }
 0x480   :  { %4547 = vmatpush3.bf16.msra.mxu1 %v4546_v52  ;;  %v1351_v52 = vld [vmem:[%s6841_s10 + $0x48] sm:$0xff] }
 0x481   :  { %4549 = vmatprep.subr.bf16.mxu1 %v4548_v53  ;;  %v4566_v53 = vpack.c.bf16 %v1351_v52, %v1348_v50 }
 0x53a   :  { %v962_v23 = vpop.f32.mrb[6].mxu1 }
 0x53b   :  { %v4355_v51 = vpop.f32.mrb[7].mxu1  ;;  %v967_v55 = vsel %vm966_vm4, %v962_v23, -inf }
 0x53c   :  { %968 = vmax.xlane.f32.xlu1 %v967_v55 }
 0x542   :  { %v1117_v56 = vpop.f32.mrb[8].mxu1 }
 0x543   :  { %v4369_v57 = vpop.f32.mrb[9].mxu1  ;;  %v1121_v58 = vsel %vm966_vm4, %v1117_v56, -inf }
 0x544   :  { %1122 = vmax.xlane.f32.xlu0 %v1121_v58 }
 0x5c9   :  { %v969_v59 = vpop.xlane.xlu1 %968 }
 0x5ca   :  { %v970_v60 = vsub.f32 %v962_v23, %v969_v59  ;;  %v1216_v23 = vld [vmem:[#allocation11 + $0x58] sm:$0xff] }
 0x5cb   :  { %v4550_v51 = vpack.c.bf16 %v1216_v23, %v1215_v54  ;;  %v1355_v54 = vld [vmem:[%s6841_s10 + $0x68] sm:$0xff]  ;;  %v1358_v23 = vld [vmem:[%s6841_s10 + $0x80] sm:$0xff] }
 0x5cc   :  { %v971_v61 = vmul.f32 1.442695, %v970_v60 }
 0x5cd   :  { %4551 = vmatpush3.bf16.msra.mxu1 %v4550_v51  ;;  %v4568_v51 = vpack.c.bf16 %v1358_v23, %v1355_v54 }
 0x5ce   :  { %5204 = vpow2.f32 %v971_v61  ;;  %v1233_v61 = vld [vmem:[#allocation11 + $0xe0] sm:$0xff] }
 0x5d1   :  { %v1123_v62 = vpop.xlane.xlu0 %1122 }
 0x5d2   :  { %v1124_v63 = vsub.f32 %v1117_v56, %v1123_v62  ;;  %v1234_v62 = vld [vmem:[#allocation11 + $0xe8] sm:$0xff] }
 0x5d4   :  { %v1125_v2 = vmul.f32 1.442695, %v1124_v63  ;;  %v4552_v63 = vpack.c.bf16 %v1234_v62, %v1233_v61  ;;  %v1360_v61 = vld [vmem:[%s6841_s10 + $0x90] sm:$0xff]  ;;  %v1363_v62 = vld [vmem:[%s6841_s10 + $0xa8] sm:$0xff] }
 0x5d6   :  { %5206 = vpow2.f32 %v1125_v2  ;;  %v1217_v2 = vld [vmem:[#allocation11 + $0x60] sm:$0xff]  ;;  %4553 = vmatprep.subr.bf16.mxu1 %v4552_v63  ;;  %v4574_v63 = vpack.c.bf16 %v1363_v62, %v1360_v61  ;;  %v1541_v61 = vld [vmem:[#allocation20 + $0x58] sm:$0xff]  ;;  %v1532_v62 = vld [vmem:[#allocation20 + $0x10] sm:$0xff] }
 0x5d8   :  { %v5205_v3 = vpop.eup %5204 }
 0x5d9   :  { %v973_v4 = vsel %vm966_vm4, %v5205_v3, 0.0 }
 0x5da   :  { %974 = vadd.xlane.f32.xlu1 %v973_v4 }
 0x5e0   :  { %v5207_v5 = vpop.eup %5206 }
 0x5e1   :  { %v1127_v6 = vsel %vm966_vm4, %v5207_v5, 0.0 }
 0x5e2   :  { %1128 = vadd.xlane.f32.xlu0 %v1127_v6  ;;  %v1235_v6 = vld [vmem:[#allocation11 + $0xf0] sm:$0xff] }
 0x5e3   :  { %v4556_v15 = vpack.c.bf16 %v1236_v7, %v1235_v6  ;;  %v1539_v6 = vld [vmem:[#allocation20 + $0x48] sm:$0xff] }
 0x667   :  { %v975_v55 = vpop.xlane.xlu1 %974 }
 0x668   :  { %5208 = vrcp.f32 %v975_v55  ;;  %v1354_v55 = vld [vmem:[%s6841_s10 + $0x60] sm:$0xff] }
 0x66f   :  { %v1129_v56 = vpop.xlane.xlu0 %1128 }
 0x670   :  { %5210 = vrcp.f32 %v1129_v56  ;;  %v1357_v56 = vld [vmem:[%s6841_s10 + $0x78] sm:$0xff] }
 0x672   :  { %v5209_v57 = vpop.eup %5208 }
 0x673   :  { %v977_v58 = vmul.f32 %v5209_v57, %v5205_v3  ;;  %v1218_v3 = vld [vmem:[#allocation11 + $0x68] sm:$0xff]  ;;  %v4570_v57 = vpack.c.bf16 %v1357_v56, %v1354_v55  ;;  %v1359_v55 = vld [vmem:[%s6841_s10 + $0x88] sm:$0xff] }
 0x674   :  { %v4554_v4 = vpack.c.bf16 %v1218_v3, %v1217_v2  ;;  %v1367_v2 = vld [vmem:[%s6841_s10 + $0xc8] sm:$0xff]  ;;  %v1366_v3 = vld [vmem:[%s6841_s10 + $0xc0] sm:$0xff] }
 0x675   :  { %4361 = vmatmul.mubr.msk.f32.vlgmr.msra.gmra.mrb[8].mxu0 %vm966_vm4, %v977_v58  ;;  %v1361_v58 = vld [vmem:[%s6841_s10 + $0x98] sm:$0xff] }
 0x676   :  { %4527 = vmatpush3.bf16.msra.mxu0 %v4526_v45  ;;  %4374 = vmatprep.mubr.msk.f32.mxu0 %vm5664_vm0, %v6865_v1  ;;  %v4558_v45 = vpack.c.bf16 %v1220_v42, %v1219_v8  ;;  %v1530_v8 = vld [vmem:[#allocation20] sm:$0xff] }
 0x677   :  { %4555 = vmatpush3.bf16.msra.mxu1 %v4554_v4  ;;  %v1531_v4 = vld [vmem:[#allocation20 + $0x8] sm:$0xff] }
 0x678   :  { %4557 = vmatprep.subr.bf16.mxu1 %v4556_v15  ;;  %v4588_v7 = vpack.c.bf16 %v1539_v6, %v1531_v4  ;;  %v1538_v15 = vld [vmem:[#allocation20 + $0x40] sm:$0xff] }
 0x679   :  { %v4590_v42 = vpack.c.bf16 %v1538_v15, %v1530_v8  ;;  %v1368_v4 = vld [vmem:[%s6841_s10 + $0xd0] sm:$0xff]  ;;  %v1548_v15 = vld [vmem:[#allocation20 + $0x90] sm:$0xff] }
 0x67a   :  { %v5211_v59 = vpop.eup %5210 }
 0x67b   :  { %v1131_v60 = vmul.f32 %v5211_v59, %v5207_v5  ;;  %4559 = vmatpush3.bf16.msra.mxu1 %v4558_v45  ;;  %v1364_v59 = vld [vmem:[%s6841_s10 + $0xb0] sm:$0xff]  ;;  %v1547_v45 = vld [vmem:[#allocation20 + $0x88] sm:$0xff] }
 0x67c   :  { %4589 = vmatprep.subr.bf16.mxu1 %v4588_v7 }
 0x67d   :  { %4375 = vmatmul.mubr.msk.f32.vlgmr.msra.gmra.mrb[10].mxu0 %vm966_vm4, %v1131_v60  ;;  %v4572_v60 = vpack.c.bf16 %v1364_v59, %v1361_v58  ;;  %v1365_v58 = vld [vmem:[%s6841_s10 + $0xb8] sm:$0xff] }
 0x67e   :  { %1453 = vmatprep.mubr.f32.mxu0 %v6865_v1 }
 0x748   :  { %v1047_v5 = vpop.f32.mrb[8].mxu0 }
 0x749   :  { %v4362_v9 = vpop.f32.mrb[9].mxu0 }
 0x750   :  { %v1201_v10 = vpop.f32.mrb[10].mxu0 }
 0x751   :  { %v4376_v11 = vpop.f32.mrb[11].mxu0  ;;  %1308 = vmatprep.mubr.f32.mxu1 %v1201_v10  ;;  %v1546_v10 = vld [vmem:[#allocation20 + $0x80] sm:$0xff] }
 0x752   :  { %1309 = vmatmul.mubr.f32.vlgmr.msra.gmra.mrb[10].mxu1 %v1047_v5  ;;  %v1555_v5 = vld [vmem:[#allocation20 + $0xc8] sm:$0xff]  ;;  %v1554_v11 = vld [vmem:[#allocation20 + $0xc0] sm:$0xff] }
 0x753   :  { %1662 = vmatprep.mubr.f32.mxu1 %v6865_v1  ;;  %4591 = vmatpush1.bf16.msra.mxu1 %v4590_v42  ;;  %v4592_v9 = vpack.c.bf16 %v1555_v5, %v1547_v45  ;;  %v1556_v42 = vld [vmem:[#allocation20 + $0xd0] sm:$0xff]  ;;  %v1565_v45 = vld [vmem:[#allocation20 + $0x118] sm:$0xff] }
 0x754   :  { %v1573_v5 = vld [vmem:[#allocation20 + $0x158] sm:$0xff] }
 0x755   :  { %4593 = vmatprep.subr.bf16.mxu1 %v4592_v9  ;;  %v4610_v9 = vpack.c.bf16 %v1556_v42, %v1548_v15  ;;  %v1591_v15 = vld [vmem:[#allocation20 + $0x1e8] sm:$0xff]  ;;  %v1585_v42 = vld [vmem:[#allocation20 + $0x1b8] sm:$0xff] }
 0x825   :  { %v4003_v48 = vpop.f32.mrb[10].mxu1 }
 0x826   :  { %v4004_v16 = vpop.f32.mrb[11].mxu1 }
 0x827   :  { %v4005_v22 = vadd.f32 %v4004_v16, %v4003_v48  ;;  %v4594_v48 = vpack.c.bf16 %v1554_v11, %v1546_v10  ;;  %v1571_v16 = vld [vmem:[#allocation20 + $0x148] sm:$0xff]  ;;  %v4612_v10 = vpack.c.bf16 %v1573_v5, %v1565_v45  ;;  %v1564_v11 = vld [vmem:[#allocation20 + $0x110] sm:$0xff]  ;;  %v1593_v45 = vld [vmem:[#allocation20 + $0x1f8] sm:$0xff] }
 0x829   :  { %v1311_v26 = vadd.f32 %v4005_v22, %v3923_v12  ;;  %v1563_v12 = vld [vmem:[#allocation20 + $0x108] sm:$0xff]  ;;  %4595 = vmatpush1.bf16.msra.mxu1 %v4594_v48  ;;  %v1572_v48 = vld [vmem:[#allocation20 + $0x150] sm:$0xff] }
 0x82a   :  { %v4596_v22 = vpack.c.bf16 %v1571_v16, %v1563_v12  ;;  %v1581_v12 = vld [vmem:[#allocation20 + $0x198] sm:$0xff] }
 0x82b   :  { %v6194_v28 = vadd.f32 %v1311_v26, %v6077_v20  ;;  %v1562_v26 = vld [vmem:[#allocation20 + $0x100] sm:$0xff]  ;;  %v1589_v16 = vld [vmem:[#allocation20 + $0x1d8] sm:$0xff] }
 0x82c   :  { %4597 = vmatprep.subr.bf16.mxu1 %v4596_v22  ;;  %v4614_v22 = vpack.c.bf16 %v1572_v48, %v1564_v11  ;;  %v1582_v11 = vld [vmem:[#allocation20 + $0x1a0] sm:$0xff] }
 0x82d   :  { %6946 = vst [vmem:[#allocation41_spill] sm:$0xff] %v6194_v28  ;;  %v1323_v29 = vmul.f32 %v6194_v28, %v6072_v17  ;;  %v1315_v30 = vmul.f32 %v6194_v28, %v6194_v28  ;;  %v1337_v46 = vmul.f32 %v6194_v28, %v6135_v24  ;;  %v1353_v24 = vld [vmem:[%s6841_s10 + $0x58] sm:$0xff] }
 0x82e   :  { %v1590_v48 = vld [vmem:[#allocation20 + $0x1e0] sm:$0xff] }
 0x82f   :  { %v1324_v31 = vsel %vm470_vm3, %v1323_v29, 0.0  ;;  %v1316_v32 = vmul.f32 %v1315_v30, %v6087_v27  ;;  %v1343_v27 = vld [vmem:[%s6841_s10 + $0x8] sm:$0xff]  ;;  %v1570_v29 = vld [vmem:[#allocation20 + $0x140] sm:$0xff] }
 0x830   :  { %1325 = vadd.xlane.f32.xlu1 %v1324_v31  ;;  %v4560_v41 = vpack.c.bf16 %v1346_v40, %v1343_v27  ;;  %v4598_v30 = vpack.c.bf16 %v1570_v29, %v1562_v26  ;;  %v1579_v31 = vld [vmem:[#allocation20 + $0x188] sm:$0xff]  ;;  %v4616_v26 = vpack.c.bf16 %v1589_v16, %v1581_v12  ;;  %v1580_v29 = vld [vmem:[#allocation20 + $0x190] sm:$0xff]  ;;  %v4648_v16 = vpack.c.bf16 %v1593_v45, %v1585_v42  ;;  %v1938_v42 = vld [vmem:[#allocation23 + $0x1c0] sm:$0xff] }
 0x831   :  { %v1317_v33 = vsel %vm470_vm3, %v1316_v32, 0.0  ;;  %v1587_v32 = vld [vmem:[#allocation20 + $0x1c8] sm:$0xff]  ;;  %v1584_v12 = vld [vmem:[#allocation20 + $0x1b0] sm:$0xff] }
 0x832   :  { %1318 = vadd.xlane.f32.xlu0 %v1317_v33  ;;  %4561 = vmatprep.subr.bf16.mxu0 %v4560_v41  ;;  %v4600_v33 = vpack.c.bf16 %v1587_v32, %v1579_v31  ;;  %v1535_v32 = vld [vmem:[#allocation20 + $0x28] sm:$0xff]  ;;  %v1932_v45 = vld [vmem:[#allocation23 + $0x190] sm:$0xff] }
 0x833   :  { %4563 = vmatpush1.bf16.msra.mxu0 %v4562_v44  ;;  %4599 = vmatpush1.bf16.msra.mxu1 %v4598_v30  ;;  %v1588_v30 = vld [vmem:[#allocation20 + $0x1d0] sm:$0xff] }
 0x834   :  { %4565 = vmatprep.subr.bf16.mxu0 %v4564_v49  ;;  %4601 = vmatprep.subr.bf16.mxu1 %v4600_v33  ;;  %v1347_v49 = vld [vmem:[%s6841_s10 + $0x28] sm:$0xff]  ;;  %v4618_v31 = vpack.c.bf16 %v1588_v30, %v1580_v29  ;;  %v1543_v33 = vld [vmem:[#allocation20 + $0x68] sm:$0xff] }
 0x835   :  { %v4577_v54 = vpack.c.bf16 %v1347_v49, %v1344_v47  ;;  %v1559_v47 = vld [vmem:[#allocation20 + $0xe8] sm:$0xff]  ;;  %v1553_v49 = vld [vmem:[#allocation20 + $0xb8] sm:$0xff] }
 0x836   :  { %v1891_v29 = vld [vmem:[#allocation23 + $0x48] sm:$0xff]  ;;  %v1885_v30 = vld [vmem:[#allocation23 + $0x18] sm:$0xff] }
 0x837   :  { %4567 = vmatpush1.bf16.msra.mxu0 %v4566_v53 }
 0x838   :  { %4569 = vmatprep.subr.bf16.mxu0 %v4568_v51  ;;  %v1356_v51 = vld [vmem:[%s6841_s10 + $0x70] sm:$0xff] }
 0x839   :  { %v4583_v56 = vpack.c.bf16 %v1359_v55, %v1356_v51 }
 0x83b   :  { %4571 = vmatpush1.bf16.msra.mxu0 %v4570_v57  ;;  %v1362_v57 = vld [vmem:[%s6841_s10 + $0xa0] sm:$0xff] }
 0x83c   :  { %4573 = vmatprep.subr.bf16.mxu0 %v4572_v60  ;;  %v4586_v59 = vpack.c.bf16 %v1365_v58, %v1362_v57  ;;  %v1533_v60 = vld [vmem:[#allocation20 + $0x18] sm:$0xff]  ;;  %v1567_v57 = vld [vmem:[#allocation20 + $0x128] sm:$0xff] }
 0x83d   :  { %v4604_v6 = vpack.c.bf16 %v1541_v61, %v1533_v60  ;;  %v1575_v58 = vld [vmem:[#allocation20 + $0x168] sm:$0xff]  ;;  %v1577_v60 = vld [vmem:[#allocation20 + $0x178] sm:$0xff] }
 0x83f   :  { %4575 = vmatpush1.bf16.msra.mxu0 %v4574_v63  ;;  %v1540_v63 = vld [vmem:[#allocation20 + $0x50] sm:$0xff] }
 0x840   :  { %1405 = vmatprep.subr.mxu0 %v1367_v2  ;;  %v1549_v2 = vld [vmem:[#allocation20 + $0x98] sm:$0xff]  ;;  %v4606_v7 = vpack.c.bf16 %v1540_v63, %v1532_v62  ;;  %v4628_v63 = vpack.c.bf16 %v1575_v58, %v1567_v57 }
 0x843   :  { %1406 = vmatpush1.msra.mxu0 %v1366_v3  ;;  %v1557_v3 = vld [vmem:[#allocation20 + $0xd8] sm:$0xff] }
 0x844   :  { %4576 = vmatprep.subr.bf16.mxu0 %v6863_v0  ;;  %v4608_v8 = vpack.c.bf16 %v1557_v3, %v1549_v2  ;;  %v1566_v2 = vld [vmem:[#allocation20 + $0x120] sm:$0xff] }
 0x845   :  { %v1574_v3 = vld [vmem:[#allocation20 + $0x160] sm:$0xff] }
 0x846   :  { %v4630_v5 = vpack.c.bf16 %v1574_v3, %v1566_v2  ;;  %v1939_v2 = vld [vmem:[#allocation23 + $0x1c8] sm:$0xff]  ;;  %v1933_v3 = vld [vmem:[#allocation23 + $0x198] sm:$0xff] }
 0x8bd   :  { %v1326_v34 = vpop.xlane.xlu1 %1325 }
 0x8be   :  { %v1327_v35 = vmul.f32 0.125, %v1326_v34  ;;  %v1578_v34 = vld [vmem:[#allocation20 + $0x180] sm:$0xff] }
 0x8c0   :  { %v6204_v36 = vsub.f32 %v6194_v28, %v1327_v35  ;;  %v1586_v35 = vld [vmem:[#allocation20 + $0x1c0] sm:$0xff]  ;;  %v2268_v28 = vld [vmem:[#allocation25 + $0xd8] sm:$0xff] }
 0x8c2   :  { %v1329_v37 = vmul.f32 %v6204_v36, %v6204_v36  ;;  %v1339_v44 = vmul.f32 %v6204_v36, %v6072_v17 }
 0x8c4   :  { %v1330_v38 = vmul.f32 %v1329_v37, %v6072_v17  ;;  %v4602_v37 = vpack.c.bf16 %v1586_v35, %v1578_v34  ;;  %v1350_v17 = vld [vmem:[%s6841_s10 + $0x40] sm:$0xff]  ;;  %v1537_v34 = vld [vmem:[#allocation20 + $0x38] sm:$0xff]  ;;  %v4620_v35 = vpack.c.bf16 %v1543_v33, %v1535_v32  ;;  %v4634_v32 = vpack.c.bf16 %v1590_v48, %v1582_v11 }
 0x8c5   :  { %v4580_v36 = vpack.c.bf16 %v1353_v24, %v1350_v17  ;;  %v1550_v24 = vld [vmem:[#allocation20 + $0xa0] sm:$0xff]  ;;  %v1895_v11 = vld [vmem:[#allocation23 + $0x68] sm:$0xff]  ;;  %v1889_v48 = vld [vmem:[#allocation23 + $0x38] sm:$0xff] }
 0x8c6   :  { %v1331_v39 = vsel %vm470_vm3, %v1330_v38, 0.0  ;;  %4603 = vmatpush1.bf16.msra.mxu1 %v4602_v37  ;;  %v1319_v38 = vpop.xlane.xlu0 %1318  ;;  %v1545_v37 = vld [vmem:[#allocation20 + $0x78] sm:$0xff] }
 0x8c7   :  { %1332 = vadd.xlane.f32.xlu1 %v1331_v39  ;;  %v1320_v39 = vmul.f32 0.25, %v1319_v38  ;;  %v4636_v38 = vpack.c.bf16 %v1545_v37, %v1537_v34  ;;  %4621 = vmatprep.subr.bf16.mxu1 %v4620_v35  ;;  %v1882_v35 = vld [vmem:[#allocation23] sm:$0xff] }
 0x8c8   :  { %v1890_v37 = vld [vmem:[#allocation23 + $0x40] sm:$0xff] }
 0x8c9   :  { %v1321_v27 = vadd.f32 0.01, %v1320_v39  ;;  %v1369_v39 = vld [vmem:[%s6842_s11] sm:$0x7] }
 0x8cb   :  { %5212 = vrsqrt.f32 %v1321_v27  ;;  %v1374_v27 = vrot.slane %v1369_v39, %v6075_v18  ;;  %v1552_v18 = vld [vmem:[#allocation20 + $0xb0] sm:$0xff] }
 0x8d5   :  { %v5213_v25 = vpop.eup %5212 }
 0x8d6   :  { %v1338_v52 = vmul.f32 %v5213_v25, %v1337_v46  ;;  %v1536_v25 = vld [vmem:[#allocation20 + $0x30] sm:$0xff]  ;;  %v1551_v46 = vld [vmem:[#allocation20 + $0xa8] sm:$0xff] }
 0x8d7   :  { %v4624_v55 = vpack.c.bf16 %v1559_v47, %v1551_v46 }
 0x954   :  { %v1333_v40 = vpop.xlane.xlu1 %1332 }
 0x955   :  { %v1334_v41 = vmul.f32 0.125, %v1333_v40  ;;  %v1534_v40 = vld [vmem:[#allocation20 + $0x20] sm:$0xff] }
 0x957   :  { %v1335_v43 = vadd.f32 1e-05, %v1334_v41  ;;  %v1542_v41 = vld [vmem:[#allocation20 + $0x60] sm:$0xff] }
 0x959   :  { %5214 = vrsqrt.f32 %v1335_v43  ;;  %v1378_v43 = vrot.slane %v1369_v39, %v6131_v19 }
 0x963   :  { %v5215_v50 = vpop.eup %5214 }
 0x964   :  { %v1340_v53 = vmul.f32 %v5215_v50, %v1339_v44  ;;  %v1544_v44 = vld [vmem:[#allocation20 + $0x70] sm:$0xff]  ;;  %v1561_v50 = vld [vmem:[#allocation20 + $0xf8] sm:$0xff] }
 0x965   :  { %v4638_v17 = vpack.c.bf16 %v1544_v44, %v1536_v25  ;;  %v4640_v19 = vpack.c.bf16 %v1561_v50, %v1553_v49  ;;  %v1909_v25 = vld [vmem:[#allocation23 + $0xd8] sm:$0xff]  ;;  %v6328_v44 = vpack.c.bf16 %v1890_v37, %v1882_v35  ;;  %v1898_v49 = vld [vmem:[#allocation23 + $0x80] sm:$0xff]  ;;  %v1903_v35 = vld [vmem:[#allocation23 + $0xa8] sm:$0xff] }
 0x966   :  { %v1341_v23 = vadd.f32 %v1340_v53, %v1338_v52  ;;  %v4622_v53 = vpack.c.bf16 %v1542_v41, %v1534_v40  ;;  %v1899_v40 = vld [vmem:[#allocation23 + $0x88] sm:$0xff]  ;;  %v1906_v50 = vld [vmem:[#allocation23 + $0xc0] sm:$0xff] }
 0x967   :  { %v1907_v41 = vld [vmem:[#allocation23 + $0xc8] sm:$0xff] }
 0x968   :  { %3924 = vmatmul.mubr.msk.f32.vlgmr.msra.gmra.mrb[12].mxu0 %vm470_vm3, %v1341_v23  ;;  %v6333_v47 = vpack.c.bf16 %v1907_v41, %v1899_v40  ;;  %v1911_v37 = vld [vmem:[#allocation23 + $0xe8] sm:$0xff]  ;;  %v5220_v41 = vld [vmem:[#allocation28] sm:$0xf] }
 0x969   :  { %4578 = vmatpush3.bf16.msra.mxu0 %v4577_v54  ;;  %4395 = vmatprep.mubr.msk.f32.mxu0 %vm5664_vm0, %v6865_v1 }
 0x96a   :  { %4579 = vmatprep.subr.bf16.mxu0 %v6863_v0 }
 0x96d   :  { %4581 = vmatpush3.bf16.msra.mxu0 %v4580_v36  ;;  %v1558_v36 = vld [vmem:[#allocation20 + $0xe0] sm:$0xff] }
 0x96e   :  { %4582 = vmatprep.subr.bf16.mxu0 %v6863_v0  ;;  %v4626_v61 = vpack.c.bf16 %v1558_v36, %v1550_v24  ;;  %v1915_v24 = vld [vmem:[#allocation23 + $0x108] sm:$0xff] }
 0x96f   :  { %v1923_v36 = vld [vmem:[#allocation23 + $0x148] sm:$0xff] }
 0x970   :  { %v6351_v58 = vpack.c.bf16 %v1923_v36, %v1915_v24  ;;  %v1904_v24 = vld [vmem:[#allocation23 + $0xb0] sm:$0xff] }
 0x971   :  { %4584 = vmatpush3.bf16.msra.mxu0 %v4583_v56  ;;  %v1560_v56 = vld [vmem:[#allocation20 + $0xf0] sm:$0xff] }
 0x972   :  { %4585 = vmatprep.subr.bf16.mxu0 %v6863_v0  ;;  %v4642_v62 = vpack.c.bf16 %v1560_v56, %v1552_v18  ;;  %v6345_v56 = vpack.c.bf16 %v1906_v50, %v1898_v49  ;;  %v6391_v49 = vpack.c.bf16 %v1911_v37, %v1903_v35  ;;  %v1902_v50 = vld [vmem:[#allocation23 + $0xa0] sm:$0xff]  ;;  %v1912_v36 = vld [vmem:[#allocation23 + $0xf0] sm:$0xff] }
 0x973   :  { %v2267_v0 = vld [vmem:[#allocation25 + $0xd0] sm:$0xff] }
 0x975   :  { %4587 = vmatpush3.bf16.msra.mxu0 %v4586_v59  ;;  %v1569_v59 = vld [vmem:[#allocation20 + $0x138] sm:$0xff] }
 0x976   :  { %4393 = vmatprep.subr.mxu0 %v6865_v1 }
 0x979   :  { %4394 = vmatpush3.msra.mxu0 %v1368_v4  ;;  %v1568_v4 = vld [vmem:[#allocation20 + $0x130] sm:$0xff] }
 0x97a   :  { %4396 = vmatmul.mubr.msk.f32.vlgmr.msra.gmra.mrb[14].mxu0 %vm470_vm3, %v1341_v23  ;;  %4605 = vmatprep.subr.bf16.mxu0 %v4604_v6  ;;  %v4644_v6 = vpack.c.bf16 %v1577_v60, %v1569_v59  ;;  %v1914_v59 = vld [vmem:[#allocation23 + $0x100] sm:$0xff] }
 0x97b   :  { %4607 = vmatpush1.bf16.msra.mxu0 %v4606_v7  ;;  %1733 = vmatprep.mubr.f32.mxu0 %v6865_v1  ;;  %v1576_v7 = vld [vmem:[#allocation20 + $0x170] sm:$0xff]  ;;  %v1922_v60 = vld [vmem:[#allocation23 + $0x140] sm:$0xff] }
 0x97c   :  { %4609 = vmatprep.subr.bf16.mxu0 %v4608_v8  ;;  %v1583_v8 = vld [vmem:[#allocation20 + $0x1a8] sm:$0xff] }
 0x97f   :  { %4611 = vmatpush1.bf16.msra.mxu0 %v4610_v9  ;;  %v4646_v9 = vpack.c.bf16 %v1576_v7, %v1568_v4  ;;  %v1941_v4 = vld [vmem:[#allocation23 + $0x1d8] sm:$0xff] }
 0x980   :  { %4613 = vmatprep.subr.bf16.mxu0 %v4612_v10  ;;  %v4632_v10 = vpack.c.bf16 %v1591_v15, %v1583_v8  ;;  %v1930_v15 = vld [vmem:[#allocation23 + $0x180] sm:$0xff] }
 0x983   :  { %4615 = vmatpush1.bf16.msra.mxu0 %v4614_v22  ;;  %v1592_v22 = vld [vmem:[#allocation20 + $0x1f0] sm:$0xff] }
 0x984   :  { %4617 = vmatprep.subr.bf16.mxu0 %v4616_v26  ;;  %v1883_v26 = vld [vmem:[#allocation23 + $0x8] sm:$0xff]  ;;  %v4650_v33 = vpack.c.bf16 %v1592_v22, %v1584_v12  ;;  %v1897_v12 = vld [vmem:[#allocation23 + $0x78] sm:$0xff] }
 0x985   :  { %v6324_v34 = vpack.c.bf16 %v1891_v29, %v1883_v26  ;;  %v1886_v29 = vld [vmem:[#allocation23 + $0x20] sm:$0xff] }
 0x987   :  { %4619 = vmatpush1.bf16.msra.mxu0 %v4618_v31  ;;  %v1893_v31 = vld [vmem:[#allocation23 + $0x58] sm:$0xff] }
 0x988   :  { %4637 = vmatprep.subr.bf16.mxu0 %v4636_v38  ;;  %v1884_v38 = vld [vmem:[#allocation23 + $0x10] sm:$0xff]  ;;  %v6326_v39 = vpack.c.bf16 %v1893_v31, %v1885_v30  ;;  %v1894_v30 = vld [vmem:[#allocation23 + $0x60] sm:$0xff] }
 0x989   :  { %v1888_v31 = vld [vmem:[#allocation23 + $0x30] sm:$0xff]  ;;  %v6383_v40 = vpack.c.bf16 %v1894_v30, %v1886_v29  ;;  %v1942_v29 = vld [vmem:[#allocation23 + $0x1e0] sm:$0xff] }
 0xa3b   :  { %v1455_v52 = vpop.f32.mrb[12].mxu0 }
 0xa3c   :  { %v6310_v54 = vadd.f32 %v1455_v52, %v1374_v27  ;;  %v1457_v23 = vpop.f32.mrb[13].mxu0  ;;  %v1892_v27 = vld [vmem:[#allocation23 + $0x50] sm:$0xff] }
 0xa3d   :  { %v6312_v51 = vadd.f32 %v1457_v23, %v1378_v43  ;;  %v1901_v43 = vld [vmem:[#allocation23 + $0x98] sm:$0xff]  ;;  %v6331_v46 = vpack.c.bf16 %v1892_v27, %v1884_v38  ;;  %v1900_v52 = vld [vmem:[#allocation23 + $0x90] sm:$0xff] }
 0xa3e   :  { %2713 = vrot.lane.b32.xlu0 %v6310_v54, %s5651_s3  ;;  %3926 = vmatmul.mubr.msk.f32.vlgmr.msra.gmra.mrb[12].mxu1 %vm1594_vm5, %v6310_v54  ;;  %v6338_v23 = vpack.c.bf16 %v1909_v25, %v1901_v43  ;;  %v1905_v38 = vld [vmem:[#allocation23 + $0xb8] sm:$0xff]  ;;  %v468_v43 = vrot.slane %v5220_v41, %v467_v21  ;;  %v2289_v41 = vld [vmem:[#allocation25 + $0x180] sm:$0xff] }
 0xa3f   :  { %3927 = vmatmul.mubr.msk.f32.vlgmr.msra.gmra.mrb[16].mxu0 %vm1594_vm5, %v6310_v54  ;;  %4623 = vmatpush1.bf16.msra.mxu1 %v4622_v53  ;;  %v1913_v27 = vld [vmem:[#allocation23 + $0xf8] sm:$0xff] }
 0xa40   :  { %4639 = vmatpush1.bf16.msra.mxu0 %v4638_v17  ;;  %3001 = vrot.lane.b32.xlu1 %v6312_v51, %s5651_s3  ;;  %v1908_v17 = vld [vmem:[#allocation23 + $0xd0] sm:$0xff]  ;;  %v1921_v21 = vld [vmem:[#allocation23 + $0x138] sm:$0xff] }
 0xa41   :  { %4625 = vmatprep.subr.bf16.mxu1 %v4624_v55  ;;  %4641 = vmatprep.subr.bf16.mxu0 %v4640_v19  ;;  %v1917_v55 = vld [vmem:[#allocation23 + $0x118] sm:$0xff]  ;;  %v6349_v57 = vpack.c.bf16 %v1908_v17, %v1900_v52  ;;  %v1910_v52 = vld [vmem:[#allocation23 + $0xe0] sm:$0xff]  ;;  %v6394_v17 = vpack.c.bf16 %v1913_v27, %v1905_v38  ;;  %v2258_v27 = vld [vmem:[#allocation25 + $0x88] sm:$0xff] }
 0xa42   :  { %1804 = vmatprep.mubr.f32.mxu1 %v6865_v1  ;;  %1875 = vmatprep.mubr.f32.mxu0 %v6865_v1  ;;  %v1925_v19 = vld [vmem:[#allocation23 + $0x158] sm:$0xff]  ;;  %v2257_v38 = vld [vmem:[#allocation25 + $0x80] sm:$0xff] }
 0xa43   :  { %4627 = vmatpush1.bf16.msra.mxu1 %v4626_v61  ;;  %v1916_v61 = vld [vmem:[#allocation23 + $0x110] sm:$0xff] }
 0xa44   :  { %4643 = vmatpush1.bf16.msra.mxu0 %v4642_v62  ;;  %4629 = vmatprep.subr.bf16.mxu1 %v4628_v63  ;;  %v6354_v62 = vpack.c.bf16 %v1925_v19, %v1917_v55  ;;  %v1931_v63 = vld [vmem:[#allocation23 + $0x188] sm:$0xff]  ;;  %v1929_v55 = vld [vmem:[#allocation23 + $0x178] sm:$0xff]  ;;  %v6401_v19 = vpack.c.bf16 %v1910_v52, %v1902_v50  ;;  %v2241_v52 = vld [vmem:[#allocation25] sm:$0xff] }
 0xa45   :  { %4645 = vmatprep.subr.bf16.mxu0 %v4644_v6  ;;  %v6359_v6 = vpack.c.bf16 %v1922_v60, %v1914_v59  ;;  %v6365_v8 = vpack.c.bf16 %v1939_v2, %v1931_v63  ;;  %v469_v59 = vmul.f32 %v468_v43, %v6077_v20  ;;  %v6406_v60 = vpack.c.bf16 %v1912_v36, %v1904_v24  ;;  %v1920_v63 = vld [vmem:[#allocation23 + $0x130] sm:$0xff]  ;;  %v1937_v20 = vld [vmem:[#allocation23 + $0x1b8] sm:$0xff]  ;;  %v2290_v50 = vld [vmem:[#allocation25 + $0x188] sm:$0xff] }
 0xa46   :  { %v6442_v43 = vpack.c.bf16 %v2258_v27, %v2257_v38  ;;  %v2242_v24 = vld [vmem:[#allocation25 + $0x8] sm:$0xff]  ;;  %v6444_v36 = vpack.c.bf16 %v2290_v50, %v2289_v41  ;;  %v2293_v38 = vld [vmem:[#allocation25 + $0x1a0] sm:$0xff] }
 0xa47   :  { %4631 = vmatpush1.bf16.msra.mxu1 %v4630_v5  ;;  %v6368_v5 = vpack.c.bf16 %v1941_v4, %v1933_v3  ;;  %v6411_v3 = vpack.c.bf16 %v1929_v55, %v1921_v21  ;;  %v1928_v4 = vld [vmem:[#allocation23 + $0x170] sm:$0xff]  ;;  %v2274_v21 = vld [vmem:[#allocation25 + $0x108] sm:$0xff]  ;;  %v2245_v41 = vld [vmem:[#allocation25 + $0x20] sm:$0xff] }
 0xa48   :  { %4647 = vmatpush1.bf16.msra.mxu0 %v4646_v9  ;;  %4633 = vmatprep.subr.bf16.mxu1 %v4632_v10  ;;  %v1940_v9 = vld [vmem:[#allocation23 + $0x1d0] sm:$0xff]  ;;  %v1887_v10 = vld [vmem:[#allocation23 + $0x28] sm:$0xff]  ;;  %6948 = vst [vmem:[#allocation43_spill] sm:$0xff] %v6442_v43  ;;  %6949 = vst [vmem:[#allocation44_spill] sm:$0xff] %v6444_v36 }
 0xa49   :  { %4649 = vmatprep.subr.bf16.mxu0 %v4648_v16  ;;  %v6371_v16 = vpack.c.bf16 %v1938_v42, %v1930_v15  ;;  %v6375_v22 = vpack.c.bf16 %v1940_v9, %v1932_v45  ;;  %v6377_v26 = vpack.c.bf16 %v1895_v11, %v1887_v10  ;;  %v1935_v15 = vld [vmem:[#allocation23 + $0x1a8] sm:$0xff]  ;;  %v1945_v45 = vld [vmem:[#allocation23 + $0x1f8] sm:$0xff]  ;;  %v471_v9 = vsel %vm470_vm3, %v469_v59, 0.0  ;;  %v2259_v55 = vld [vmem:[#allocation25 + $0x90] sm:$0xff] }
 0xa4a   :  { %v1943_v42 = vld [vmem:[#allocation23 + $0x1e8] sm:$0xff]  ;;  %v6420_v11 = vpack.c.bf16 %v1928_v4, %v1920_v63  ;;  %v6426_v30 = vpack.c.bf16 %v1945_v45, %v1937_v20  ;;  %v2275_v20 = vld [vmem:[#allocation25 + $0x110] sm:$0xff] }
 0xa4b   :  { %4635 = vmatpush1.bf16.msra.mxu1 %v4634_v32  ;;  %v6380_v32 = vpack.c.bf16 %v1897_v12, %v1889_v48  ;;  %v6422_v48 = vpack.c.bf16 %v1943_v42, %v1935_v15  ;;  %v1934_v12 = vld [vmem:[#allocation23 + $0x1a0] sm:$0xff]  ;;  %v2243_v15 = vld [vmem:[#allocation25 + $0x10] sm:$0xff]  ;;  %v2244_v42 = vld [vmem:[#allocation25 + $0x18] sm:$0xff] }
 0xa4c   :  { %4651 = vmatpush1.bf16.msra.mxu0 %v4650_v33  ;;  %4653 = vmatprep.subr.bf16.mxu1 %v6324_v34  ;;  %v1896_v33 = vld [vmem:[#allocation23 + $0x70] sm:$0xff]  ;;  %v6429_v35 = vpack.c.bf16 %v1942_v29, %v1934_v12  ;;  %v6458_v45 = vpack.c.bf16 %v2244_v42, %v2243_v15  ;;  %v2261_v12 = vld [vmem:[#allocation25 + $0xa0] sm:$0xff]  ;;  %v2262_v29 = vld [vmem:[#allocation25 + $0xa8] sm:$0xff] }
 0xa4d   :  { %v6335_v53 = vpop.f32.mrb[14].mxu0  ;;  %4669 = vmatprep.subr.bf16.mxu0 %v6326_v39  ;;  %v6389_v25 = vpack.c.bf16 %v1896_v33, %v1888_v31  ;;  %v1936_v31 = vld [vmem:[#allocation23 + $0x1b0] sm:$0xff]  ;;  %v2294_v27 = vld [vmem:[#allocation25 + $0x1a8] sm:$0xff]  ;;  %v2296_v42 = vld [vmem:[#allocation25 + $0x1b8] sm:$0xff] }
 0xa4e   :  { %6947 = vst [vmem:[#allocation42_spill] sm:$0xff] %v6335_v53  ;;  %v4397_v18 = vpop.f32.mrb[15].mxu0  ;;  %3928 = vmatmul.mubr.msk.f32.vlgmr.msra.gmra.mrb[14].mxu1 %vm1594_vm5, %v6310_v54  ;;  %v1944_v33 = vld [vmem:[#allocation23 + $0x1f0] sm:$0xff]  ;;  %6954 = vst [vmem:[#allocation49_spill] sm:$0xff] %v6458_v45  ;;  %v6466_v50 = vpack.c.bf16 %v2294_v27, %v2293_v38  ;;  %v2280_v27 = vld [vmem:[#allocation25 + $0x138] sm:$0xff] }
 0xa4f   :  { %3929 = vmatmul.mubr.msk.f32.vlgmr.msra.gmra.mrb[18].mxu0 %vm1594_vm5, %v6310_v54  ;;  %4655 = vmatpush1.bf16.msra.mxu1 %v6328_v44  ;;  %v1924_v54 = vld [vmem:[#allocation23 + $0x150] sm:$0xff]  ;;  %v1919_v18 = vld [vmem:[#allocation23 + $0x128] sm:$0xff]  ;;  %v6433_v37 = vpack.c.bf16 %v1944_v33, %v1936_v31  ;;  %v6464_v33 = vpack.c.bf16 %v2262_v29, %v2261_v12 }
 0xa50   :  { %4671 = vmatpush1.bf16.msra.mxu0 %v6331_v46  ;;  %4657 = vmatprep.subr.bf16.mxu1 %v6333_v47  ;;  %v6363_v7 = vpack.c.bf16 %v1924_v54, %v1916_v61  ;;  %v1918_v61 = vld [vmem:[#allocation23 + $0x120] sm:$0xff]  ;;  %v6409_v2 = vpack.c.bf16 %v1927_v13, %v1919_v18  ;;  %v6446_v18 = vpack.c.bf16 %v2242_v24, %v2241_v52  ;;  %v2246_v52 = vld [vmem:[#allocation25 + $0x28] sm:$0xff]  ;;  %v2279_v38 = vld [vmem:[#allocation25 + $0x130] sm:$0xff] }
 0xa51   :  { %4673 = vmatprep.subr.bf16.mxu0 %v6338_v23  ;;  %2013 = vmatprep.mubr.f32.mxu1 %v6865_v1  ;;  %v1926_v54 = vld [vmem:[#allocation23 + $0x160] sm:$0xff]  ;;  %6956 = vst [vmem:[#allocation51_spill] sm:$0xff] %v6464_v33  ;;  %6957 = vst [vmem:[#allocation52_spill] sm:$0xff] %v6466_v50  ;;  %v2299_v53 = vld [vmem:[#allocation25 + $0x1d0] sm:$0xff] }
 0xa52   :  { %2084 = vmatprep.mubr.f32.mxu0 %v6865_v1  ;;  %v6417_v10 = vpack.c.bf16 %v1926_v54, %v1918_v61  ;;  %6950 = vst [vmem:[#allocation45_spill] sm:$0xff] %v6446_v18  ;;  %v2273_v13 = vld [vmem:[#allocation25 + $0x100] sm:$0xff]  ;;  %v2291_v61 = vld [vmem:[#allocation25 + $0x190] sm:$0xff]  ;;  %v2292_v54 = vld [vmem:[#allocation25 + $0x198] sm:$0xff] }
 0xa53   :  { %4659 = vmatpush1.bf16.msra.mxu1 %v6345_v56  ;;  %v6449_v59 = vpack.c.bf16 %v2274_v21, %v2273_v13  ;;  %v6455_v4 = vpack.c.bf16 %v2292_v54, %v2291_v61  ;;  %v2277_v24 = vld [vmem:[#allocation25 + $0x120] sm:$0xff]  ;;  %v2278_v13 = vld [vmem:[#allocation25 + $0x128] sm:$0xff]  ;;  %v6469_v21 = vpack.c.bf16 %v2246_v52, %v2245_v41  ;;  %v2264_v61 = vld [vmem:[#allocation25 + $0xb8] sm:$0xff]  ;;  %v6485_v41 = vpack.c.bf16 %v2280_v27, %v2279_v38 }
 0xa54   :  { %4675 = vmatpush1.bf16.msra.mxu0 %v6349_v57  ;;  %4661 = vmatprep.subr.bf16.mxu1 %v6351_v58  ;;  %v2295_v54 = vld [vmem:[#allocation25 + $0x1b0] sm:$0xff]  ;;  %v2265_v52 = vld [vmem:[#allocation25 + $0xc0] sm:$0xff]  ;;  %v2282_v27 = vld [vmem:[#allocation25 + $0x148] sm:$0xff] }
 0xa55   :  { %4677 = vmatprep.subr.bf16.mxu0 %v6354_v62  ;;  %6951 = vst [vmem:[#allocation46_spill] sm:$0xff] %v6449_v59  ;;  %6953 = vst [vmem:[#allocation48_spill] sm:$0xff] %v6455_v4  ;;  %v6480_v12 = vpack.c.bf16 %v2296_v42, %v2295_v54  ;;  %v2249_v54 = vld [vmem:[#allocation25 + $0x40] sm:$0xff]  ;;  %v2250_v42 = vld [vmem:[#allocation25 + $0x48] sm:$0xff] }
 0xa56   :  { %6958 = vst [vmem:[#allocation53_spill] sm:$0xff] %v6469_v21  ;;  %6963 = vst [vmem:[#allocation58_spill] sm:$0xff] %v6485_v41  ;;  %v2281_v38 = vld [vmem:[#allocation25 + $0x140] sm:$0xff] }
 0xa57   :  { %4663 = vmatpush1.bf16.msra.mxu1 %v6359_v6  ;;  %6961 = vst [vmem:[#allocation56_spill] sm:$0xff] %v6480_v12 }
 0xa58   :  { %4679 = vmatpush1.bf16.msra.mxu0 %v6363_v7  ;;  %4665 = vmatprep.subr.bf16.mxu1 %v6365_v8 }
 0xa59   :  { %4681 = vmatprep.subr.bf16.mxu0 %v6368_v5 }
 0xa5b   :  { %4667 = vmatpush1.bf16.msra.mxu1 %v6371_v16 }
 0xa5c   :  { %4683 = vmatpush1.bf16.msra.mxu0 %v6375_v22  ;;  %4685 = vmatprep.subr.bf16.mxu1 %v6377_v26 }
 0xa5d   :  { %4701 = vmatprep.subr.bf16.mxu0 %v6380_v32 }
 0xa5e   :  { %3930 = vmatmul.mubr.msk.f32.vlgmr.msra.gmra.mrb[16].mxu1 %vm1594_vm5, %v6312_v51 }
 0xa5f   :  { %3931 = vmatmul.mubr.msk.f32.vlgmr.msra.gmra.mrb[20].mxu0 %vm1594_vm5, %v6312_v51  ;;  %4687 = vmatpush1.bf16.msra.mxu1 %v6383_v40 }
 0xa60   :  { %4703 = vmatpush1.bf16.msra.mxu0 %v6389_v25  ;;  %4689 = vmatprep.subr.bf16.mxu1 %v6391_v49 }
 0xa61   :  { %4705 = vmatprep.subr.bf16.mxu0 %v6394_v17  ;;  %2155 = vmatprep.mubr.f32.mxu1 %v6865_v1 }
 0xa62   :  { %2226 = vmatprep.mubr.f32.mxu0 %v6865_v1  ;;  %v6497_v1 = vpack.c.bf16 %v2282_v27, %v2281_v38  ;;  %v2284_v38 = vld [vmem:[#allocation25 + $0x158] sm:$0xff]  ;;  %v2269_v27 = vld [vmem:[#allocation25 + $0xe0] sm:$0xff] }
 0xa63   :  { %4691 = vmatpush1.bf16.msra.mxu1 %v6401_v19 }
 0xa64   :  { %4707 = vmatpush1.bf16.msra.mxu0 %v6406_v60  ;;  %472 = vadd.xlane.f32.xlu1 %v471_v9  ;;  %v2276_v9 = vld [vmem:[#allocation25 + $0x118] sm:$0xff]  ;;  %6967 = vst [vmem:[#allocation62_spill] sm:$0xff] %v6497_v1 }
 0xa65   :  { %4693 = vmatprep.subr.bf16.mxu1 %v6409_v2  ;;  %4709 = vmatprep.subr.bf16.mxu0 %v6411_v3  ;;  %v6462_v31 = vpack.c.bf16 %v2276_v9, %v2275_v20  ;;  %v2247_v20 = vld [vmem:[#allocation25 + $0x30] sm:$0xff]  ;;  %v2248_v9 = vld [vmem:[#allocation25 + $0x38] sm:$0xff] }
 0xa66   :  { %v6482_v29 = vpack.c.bf16 %v2248_v9, %v2247_v20  ;;  %v6494_v9 = vpack.c.bf16 %v2250_v42, %v2249_v54  ;;  %v2283_v54 = vld [vmem:[#allocation25 + $0x150] sm:$0xff] }
 0xa67   :  { %4695 = vmatpush1.bf16.msra.mxu1 %v6417_v10  ;;  %6955 = vst [vmem:[#allocation50_spill] sm:$0xff] %v6462_v31 }
 0xa68   :  { %4711 = vmatpush1.bf16.msra.mxu0 %v6420_v11  ;;  %4697 = vmatprep.subr.bf16.mxu1 %v6422_v48  ;;  %6962 = vst [vmem:[#allocation57_spill] sm:$0xff] %v6482_v29  ;;  %6966 = vst [vmem:[#allocation61_spill] sm:$0xff] %v6494_v9 }
 0xa69   :  { %4713 = vmatprep.subr.bf16.mxu0 %v6426_v30 }
 0xa6b   :  { %4699 = vmatpush1.bf16.msra.mxu1 %v6429_v35 }
 0xa6c   :  { %4715 = vmatpush1.bf16.msra.mxu0 %v6433_v37  ;;  %4717 = vmatprep.subr.bf16.mxu1 %v6442_v43  ;;  %v2326_v43 = vld [vmem:[#allocation25 + $0x2a8] sm:$0xff] }
 0xa6d   :  { %4749 = vmatprep.subr.bf16.mxu0 %v6444_v36 }
 0xa6e   :  { %3932 = vmatmul.mubr.msk.f32.vlgmr.msra.gmra.mrb[18].mxu1 %vm1594_vm5, %v6312_v51 }
 0xa6f   :  { %3933 = vmatmul.mubr.msk.f32.vlgmr.msra.gmra.mrb[22].mxu0 %vm1594_vm5, %v6312_v51  ;;  %v2260_v51 = vld [vmem:[#allocation25 + $0x98] sm:$0xff]  ;;  %4719 = vmatpush3.bf16.msra.mxu1 %v6446_v18  ;;  %v2339_v18 = vld [vmem:[#allocation25 + $0x310] sm:$0xff] }
 0xa70   :  { %v6453_v63 = vpack.c.bf16 %v2260_v51, %v2259_v55  ;;  %4751 = vmatpush3.bf16.msra.mxu0 %v6449_v59  ;;  %v6473_v55 = vpack.c.bf16 %v2278_v13, %v2277_v24  ;;  %v2263_v51 = vld [vmem:[#allocation25 + $0xb0] sm:$0xff]  ;;  %v2266_v24 = vld [vmem:[#allocation25 + $0xc8] sm:$0xff]  ;;  %v2297_v13 = vld [vmem:[#allocation25 + $0x1c0] sm:$0xff] }
 0xa71   :  { %4753 = vmatprep.subr.bf16.mxu0 %v6455_v4  ;;  %v6478_v15 = vpack.c.bf16 %v2264_v61, %v2263_v51  ;;  %v6490_v51 = vpack.c.bf16 %v2266_v24, %v2265_v52  ;;  %v2298_v61 = vld [vmem:[#allocation25 + $0x1c8] sm:$0xff]  ;;  %v6501_v52 = vpack.c.bf16 %v2268_v28, %v2267_v0  ;;  %v6503_v24 = vpack.c.bf16 %v2300_v14, %v2299_v53  ;;  %v2301_v14 = vld [vmem:[#allocation25 + $0x1e0] sm:$0xff]  ;;  %v2308_v59 = vld [vmem:[#allocation25 + $0x218] sm:$0xff] }
 0xa72   :  { %6952 = vst [vmem:[#allocation47_spill] sm:$0xff] %v6453_v63  ;;  %4721 = vmatprep.subr.bf16.mxu1 %v6453_v63  ;;  %6959 = vst [vmem:[#allocation54_spill] sm:$0xff] %v6473_v55  ;;  %v6492_v20 = vpack.c.bf16 %v2298_v61, %v2297_v13  ;;  %v2251_v13 = vld [vmem:[#allocation25 + $0x50] sm:$0xff]  ;;  %v2252_v61 = vld [vmem:[#allocation25 + $0x58] sm:$0xff] }
 0xa73   :  { %4723 = vmatpush3.bf16.msra.mxu1 %v6458_v45  ;;  %6960 = vst [vmem:[#allocation55_spill] sm:$0xff] %v6478_v15  ;;  %6964 = vst [vmem:[#allocation59_spill] sm:$0xff] %v6490_v51  ;;  %v6506_v42 = vpack.c.bf16 %v2252_v61, %v2251_v13  ;;  %v2302_v28 = vld [vmem:[#allocation25 + $0x1e8] sm:$0xff]  ;;  %v2253_v53 = vld [vmem:[#allocation25 + $0x60] sm:$0xff] }
 0xa74   :  { %4755 = vmatpush3.bf16.msra.mxu0 %v6462_v31  ;;  %4725 = vmatprep.subr.bf16.mxu1 %v6464_v33  ;;  %6965 = vst [vmem:[#allocation60_spill] sm:$0xff] %v6492_v20  ;;  %6968 = vst [vmem:[#allocation63_spill] sm:$0xff] %v6501_v52  ;;  %v2286_v13 = vld [vmem:[#allocation25 + $0x168] sm:$0xff]  ;;  %v2307_v63 = vld [vmem:[#allocation25 + $0x210] sm:$0xff] }
 0xa75   :  { %4757 = vmatprep.subr.bf16.mxu0 %v6466_v50  ;;  %6969 = vst [vmem:[#allocation64_spill] sm:$0xff] %v6503_v24  ;;  %6970 = vst [vmem:[#allocation65_spill] sm:$0xff] %v6506_v42 }
 0xa77   :  { %4727 = vmatpush3.bf16.msra.mxu1 %v6469_v21 }
 0xa78   :  { %4759 = vmatpush3.bf16.msra.mxu0 %v6473_v55  ;;  %4729 = vmatprep.subr.bf16.mxu1 %v6478_v15  ;;  %v2356_v15 = vld [vmem:[#allocation25 + $0x398] sm:$0xff] }
 0xa79   :  { %4761 = vmatprep.subr.bf16.mxu0 %v6480_v12  ;;  %v2355_v12 = vld [vmem:[#allocation25 + $0x390] sm:$0xff] }
 0xa7a   :  { %v6558_v36 = vpack.c.bf16 %v2356_v15, %v2355_v12  ;;  %v2309_v15 = vld [vmem:[#allocation25 + $0x220] sm:$0xff]  ;;  %v2310_v12 = vld [vmem:[#allocation25 + $0x228] sm:$0xff] }
 0xa7b   :  { %4731 = vmatpush3.bf16.msra.mxu1 %v6482_v29 }
 0xa7c   :  { %4763 = vmatpush3.bf16.msra.mxu0 %v6485_v41  ;;  %4733 = vmatprep.subr.bf16.mxu1 %v6490_v51  ;;  %v2270_v51 = vld [vmem:[#allocation25 + $0xe8] sm:$0xff] }
 0xa7d   :  { %4765 = vmatprep.subr.bf16.mxu0 %v6492_v20  ;;  %v6510_v20 = vpack.c.bf16 %v2284_v38, %v2283_v54  ;;  %v6512_v0 = vpack.c.bf16 %v2270_v51, %v2269_v27  ;;  %v2254_v41 = vld [vmem:[#allocation25 + $0x68] sm:$0xff]  ;;  %v2271_v51 = vld [vmem:[#allocation25 + $0xf0] sm:$0xff]  ;;  %v2272_v38 = vld [vmem:[#allocation25 + $0xf8] sm:$0xff] }
 0xa7e   :  { %v6517_v61 = vpack.c.bf16 %v2254_v41, %v2253_v53  ;;  %v2303_v27 = vld [vmem:[#allocation25 + $0x1f0] sm:$0xff]  ;;  %v2256_v53 = vld [vmem:[#allocation25 + $0x78] sm:$0xff] }
 0xa7f   :  { %4735 = vmatpush3.bf16.msra.mxu1 %v6494_v9  ;;  %6971 = vst [vmem:[#allocation66_spill] sm:$0xff] %v6510_v20  ;;  %6972 = vst [vmem:[#allocation67_spill] sm:$0xff] %v6512_v0  ;;  %v6514_v9 = vpack.c.bf16 %v2302_v28, %v2301_v14  ;;  %v6526_v14 = vpack.c.bf16 %v2272_v38, %v2271_v51  ;;  %v2304_v28 = vld [vmem:[#allocation25 + $0x1f8] sm:$0xff]  ;;  %v2255_v41 = vld [vmem:[#allocation25 + $0x70] sm:$0xff] }
 0xa80   :  { %4767 = vmatpush3.bf16.msra.mxu0 %v6497_v1  ;;  %4737 = vmatprep.subr.bf16.mxu1 %v6501_v52  ;;  %v2285_v1 = vld [vmem:[#allocation25 + $0x160] sm:$0xff]  ;;  %6974 = vst [vmem:[#allocation69_spill] sm:$0xff] %v6517_v61  ;;  %v2322_v51 = vld [vmem:[#allocation25 + $0x288] sm:$0xff] }
 0xa81   :  { %4769 = vmatprep.subr.bf16.mxu0 %v6503_v24  ;;  %6973 = vst [vmem:[#allocation68_spill] sm:$0xff] %v6514_v9  ;;  %v6521_v54 = vpack.c.bf16 %v2286_v13, %v2285_v1  ;;  %6976 = vst [vmem:[#allocation71_spill] sm:$0xff] %v6526_v14  ;;  %v2287_v1 = vld [vmem:[#allocation25 + $0x170] sm:$0xff]  ;;  %v2288_v13 = vld [vmem:[#allocation25 + $0x178] sm:$0xff] }
 0xa82   :  { %v2353_v38 = vld [vmem:[#allocation25 + $0x380] sm:$0xff]  ;;  %v2324_v24 = vld [vmem:[#allocation25 + $0x298] sm:$0xff] }
 0xa83   :  { %4739 = vmatpush3.bf16.msra.mxu1 %v6506_v42  ;;  %6975 = vst [vmem:[#allocation70_spill] sm:$0xff] %v6521_v54  ;;  %v6528_v42 = vpack.c.bf16 %v2304_v28, %v2303_v27  ;;  %v2354_v27 = vld [vmem:[#allocation25 + $0x388] sm:$0xff] }
 0xa84   :  { %4771 = vmatpush3.bf16.msra.mxu0 %v6510_v20  ;;  %4741 = vmatprep.subr.bf16.mxu1 %v6512_v0  ;;  %v6530_v20 = vpack.c.bf16 %v2256_v53, %v2255_v41  ;;  %v6540_v28 = vpack.c.bf16 %v2354_v27, %v2353_v38  ;;  %v2337_v38 = vld [vmem:[#allocation25 + $0x300] sm:$0xff]  ;;  %v2338_v0 = vld [vmem:[#allocation25 + $0x308] sm:$0xff] }
 0xa85   :  { %4773 = vmatprep.subr.bf16.mxu0 %v6514_v9  ;;  %6977 = vst [vmem:[#allocation72_spill] sm:$0xff] %v6528_v42  ;;  %v6533_v9 = vpack.c.bf16 %v2288_v13, %v2287_v1  ;;  %v6554_v45 = vpack.c.bf16 %v2338_v0, %v2337_v38  ;;  %v2341_v0 = vld [vmem:[#allocation25 + $0x320] sm:$0xff]  ;;  %v2344_v38 = vld [vmem:[#allocation25 + $0x338] sm:$0xff] }
 0xa86   :  { %6978 = vst [vmem:[#allocation73_spill] sm:$0xff] %v6530_v20  ;;  %6981 = vst [vmem:[#allocation76_spill] sm:$0xff] %v6540_v28 }
 0xa87   :  { %4743 = vmatpush3.bf16.msra.mxu1 %v6517_v61  ;;  %6979 = vst [vmem:[#allocation74_spill] sm:$0xff] %v6533_v9 }
 0xa88   :  { %4775 = vmatpush3.bf16.msra.mxu0 %v6521_v54  ;;  %4745 = vmatprep.subr.bf16.mxu1 %v6526_v14  ;;  %v2321_v54 = vld [vmem:[#allocation25 + $0x280] sm:$0xff] }
 0xa89   :  { %4777 = vmatprep.subr.bf16.mxu0 %v6528_v42  ;;  %v6538_v61 = vpack.c.bf16 %v2322_v51, %v2321_v54  ;;  %v2305_v54 = vld [vmem:[#allocation25 + $0x200] sm:$0xff]  ;;  %v2306_v51 = vld [vmem:[#allocation25 + $0x208] sm:$0xff] }
 0xa8a   :  { %v6552_v33 = vpack.c.bf16 %v2306_v51, %v2305_v54  ;;  %v2343_v54 = vld [vmem:[#allocation25 + $0x330] sm:$0xff] }
 0xa8b   :  { %4747 = vmatpush3.bf16.msra.mxu1 %v6530_v20  ;;  %6980 = vst [vmem:[#allocation75_spill] sm:$0xff] %v6538_v61 }
 0xa8c   :  { %4779 = vmatpush3.bf16.msra.mxu0 %v6533_v9  ;;  %4781 = vmatprep.subr.bf16.mxu1 %v6538_v61  ;;  %v2323_v61 = vld [vmem:[#allocation25 + $0x290] sm:$0xff] }
 0xa8d   :  { %4813 = vmatprep.subr.bf16.mxu0 %v6540_v28  ;;  %v6556_v4 = vpack.c.bf16 %v2324_v24, %v2323_v61  ;;  %v2327_v61 = vld [vmem:[#allocation25 + $0x2b0] sm:$0xff] }
 0xb11   :  { %v1664_v41 = vpop.f32.mrb[12].mxu1 }
 0xb12   :  { %v1735_v53 = vpop.f32.mrb[16].mxu0  ;;  %v1666_v1 = vpop.f32.mrb[13].mxu1 }
 0xb13   :  { %v1737_v13 = vpop.f32.mrb[17].mxu0 }
 0xb21   :  { %v6544_v42 = vpop.f32.mrb[14].mxu1 }
 0xb22   :  { %v6546_v20 = vpop.f32.mrb[18].mxu0  ;;  %v6548_v14 = vpop.f32.mrb[15].mxu1 }
 0xb23   :  { %v6550_v9 = vpop.f32.mrb[19].mxu0 }
 0xb31   :  { %v2015_v27 = vpop.f32.mrb[16].mxu1 }
 0xb32   :  { %v2233_v28 = vmul.f32 %v2015_v27, %v1664_v41  ;;  %v2086_v52 = vpop.f32.mrb[20].mxu0  ;;  %v2017_v29 = vpop.f32.mrb[17].mxu1  ;;  %v2340_v41 = vld [vmem:[#allocation25 + $0x318] sm:$0xff]  ;;  %v2325_v27 = vld [vmem:[#allocation25 + $0x2a0] sm:$0xff] }
 0xb33   :  { %v2235_v55 = vmul.f32 %v2086_v52, %v1735_v53  ;;  %v2234_v21 = vmul.f32 %v2017_v29, %v1666_v1  ;;  %v2088_v50 = vpop.f32.mrb[21].mxu0  ;;  %v2357_v29 = vld [vmem:[#allocation25 + $0x3a0] sm:$0xff]  ;;  %v2358_v52 = vld [vmem:[#allocation25 + $0x3a8] sm:$0xff]  ;;  %v6565_v24 = vpack.c.bf16 %v2340_v41, %v2339_v18  ;;  %v6573_v53 = vpack.c.bf16 %v2310_v12, %v2309_v15  ;;  %v2311_v1 = vld [vmem:[#allocation25 + $0x230] sm:$0xff] }
 0xb34   :  { %v2236_v31 = vmul.f32 %v2088_v50, %v1737_v13  ;;  %v6561_v50 = vpack.c.bf16 %v2308_v59, %v2307_v63  ;;  %v2359_v59 = vld [vmem:[#allocation25 + $0x3b0] sm:$0xff]  ;;  %v2360_v63 = vld [vmem:[#allocation25 + $0x3b8] sm:$0xff]  ;;  %v2329_v41 = vld [vmem:[#allocation25 + $0x2c0] sm:$0xff]  ;;  %v6589_v12 = vpack.c.bf16 %v2344_v38, %v2343_v54 }
 0xb35   :  { %2433 = vmatprep.mubr.f32.mxu1 %v2234_v21  ;;  %v6567_v21 = vpack.c.bf16 %v2326_v43, %v2325_v27  ;;  %6984 = vst [vmem:[#allocation79_spill] sm:$0xff] %v6573_v53  ;;  %v2312_v13 = vld [vmem:[#allocation25 + $0x238] sm:$0xff]  ;;  %v6582_v51 = vpack.c.bf16 %v2360_v63, %v2359_v59  ;;  %v2330_v27 = vld [vmem:[#allocation25 + $0x2c8] sm:$0xff]  ;;  %v2363_v54 = vld [vmem:[#allocation25 + $0x3d0] sm:$0xff] }
 0xb36   :  { %2503 = vmatprep.mubr.f32.mxu0 %v2236_v31  ;;  %2434 = vmatmul.mubr.f32.vlgmr.msra.gmra.mrb[20].mxu1 %v2233_v28  ;;  %v6570_v31 = vpack.c.bf16 %v2358_v52, %v2357_v29  ;;  %v2328_v28 = vld [vmem:[#allocation25 + $0x2b8] sm:$0xff]  ;;  %v2361_v29 = vld [vmem:[#allocation25 + $0x3c0] sm:$0xff]  ;;  %v2362_v52 = vld [vmem:[#allocation25 + $0x3c8] sm:$0xff]  ;;  %v6585_v15 = vpack.c.bf16 %v2312_v13, %v2311_v1  ;;  %6989 = vst [vmem:[#allocation84_spill] sm:$0xff] %v6589_v12 }
 0xb37   :  { %2504 = vmatmul.mubr.f32.vlgmr.msra.gmra.mrb[24].mxu0 %v2235_v55  ;;  %4783 = vmatpush3.bf16.msra.mxu1 %v6552_v33  ;;  %6982 = vst [vmem:[#allocation77_spill] sm:$0xff] %v6567_v21  ;;  %v2342_v55 = vld [vmem:[#allocation25 + $0x328] sm:$0xff]  ;;  %v6579_v18 = vpack.c.bf16 %v2328_v28, %v2327_v61  ;;  %6987 = vst [vmem:[#allocation82_spill] sm:$0xff] %v6582_v51  ;;  %v2345_v28 = vld [vmem:[#allocation25 + $0x340] sm:$0xff]  ;;  %v6594_v63 = vpack.c.bf16 %v2362_v52, %v2361_v29 }
 0xb38   :  { %4815 = vmatpush3.bf16.msra.mxu0 %v6554_v45  ;;  %4785 = vmatprep.subr.bf16.mxu1 %v6556_v4  ;;  %6983 = vst [vmem:[#allocation78_spill] sm:$0xff] %v6570_v31  ;;  %v6577_v43 = vpack.c.bf16 %v2342_v55, %v2341_v0  ;;  %6988 = vst [vmem:[#allocation83_spill] sm:$0xff] %v6585_v15  ;;  %v6591_v0 = vpack.c.bf16 %v2330_v27, %v2329_v41  ;;  %v2313_v55 = vld [vmem:[#allocation25 + $0x240] sm:$0xff]  ;;  %v2314_v61 = vld [vmem:[#allocation25 + $0x248] sm:$0xff] }
 0xb39   :  { %4817 = vmatprep.subr.bf16.mxu0 %v6558_v36  ;;  %6986 = vst [vmem:[#allocation81_spill] sm:$0xff] %v6579_v18  ;;  %6991 = vst [vmem:[#allocation86_spill] sm:$0xff] %v6594_v63  ;;  %v2332_v1 = vld [vmem:[#allocation25 + $0x2d8] sm:$0xff]  ;;  %v6604_v29 = vpack.c.bf16 %v2314_v61, %v2313_v55  ;;  %v2333_v55 = vld [vmem:[#allocation25 + $0x2e0] sm:$0xff] }
 0xb3a   :  { %6985 = vst [vmem:[#allocation80_spill] sm:$0xff] %v6577_v43  ;;  %6990 = vst [vmem:[#allocation85_spill] sm:$0xff] %v6591_v0  ;;  %v2364_v38 = vld [vmem:[#allocation25 + $0x3d8] sm:$0xff]  ;;  %v2334_v61 = vld [vmem:[#allocation25 + $0x2e8] sm:$0xff] }
 0xb3b   :  { %4787 = vmatpush3.bf16.msra.mxu1 %v6561_v50  ;;  %6992 = vst [vmem:[#allocation87_spill] sm:$0xff] %v6604_v29 }
 0xb3c   :  { %4819 = vmatpush3.bf16.msra.mxu0 %v6565_v24  ;;  %4789 = vmatprep.subr.bf16.mxu1 %v6567_v21 }
 0xb3d   :  { %4821 = vmatprep.subr.bf16.mxu0 %v6570_v31  ;;  %v2346_v31 = vld [vmem:[#allocation25 + $0x348] sm:$0xff] }
 0xb3f   :  { %4791 = vmatpush3.bf16.msra.mxu1 %v6573_v53  ;;  %v2331_v53 = vld [vmem:[#allocation25 + $0x2d0] sm:$0xff] }
 0xb40   :  { %4823 = vmatpush3.bf16.msra.mxu0 %v6577_v43  ;;  %4793 = vmatprep.subr.bf16.mxu1 %v6579_v18 }
 0xb41   :  { %v2157_v59 = vpop.f32.mrb[18].mxu1  ;;  %4825 = vmatprep.subr.bf16.mxu0 %v6582_v51  ;;  %v2315_v51 = vld [vmem:[#allocation25 + $0x250] sm:$0xff] }
 0xb42   :  { %v6597_v13 = vmul.f32 %v2157_v59, %v6544_v42  ;;  %v2228_v43 = vpop.f32.mrb[22].mxu0  ;;  %v2159_v18 = vpop.f32.mrb[19].mxu1  ;;  %v6609_v42 = vpack.c.bf16 %v2346_v31, %v2345_v28  ;;  %v6611_v59 = vpack.c.bf16 %v2332_v1, %v2331_v53  ;;  %v6623_v28 = vpack.c.bf16 %v2334_v61, %v2333_v55  ;;  %v2317_v1 = vld [vmem:[#allocation25 + $0x260] sm:$0xff]  ;;  %v2319_v55 = vld [vmem:[#allocation25 + $0x270] sm:$0xff]  ;;  %v2320_v61 = vld [vmem:[#allocation25 + $0x278] sm:$0xff] }
 0xb43   :  { %v6600_v41 = vmul.f32 %v2228_v43, %v6546_v20  ;;  %v2238_v27 = vmul.f32 %v2159_v18, %v6548_v14  ;;  %v2230_v21 = vpop.f32.mrb[23].mxu0  ;;  %4795 = vmatpush3.bf16.msra.mxu1 %v6585_v15  ;;  %v2316_v20 = vld [vmem:[#allocation25 + $0x258] sm:$0xff]  ;;  %v2347_v43 = vld [vmem:[#allocation25 + $0x350] sm:$0xff]  ;;  %v6614_v14 = vpack.c.bf16 %v2364_v38, %v2363_v54  ;;  %v2318_v54 = vld [vmem:[#allocation25 + $0x268] sm:$0xff] }
 0xb44   :  { %v2240_v52 = vmul.f32 %v2230_v21, %v6550_v9  ;;  %4827 = vmatpush3.bf16.msra.mxu0 %v6589_v12  ;;  %4797 = vmatprep.subr.bf16.mxu1 %v6591_v0  ;;  %6993 = vst [vmem:[#allocation88_spill] sm:$0xff] %v6609_v42  ;;  %6994 = vst [vmem:[#allocation89_spill] sm:$0xff] %v6611_v59  ;;  %v2348_v18 = vld [vmem:[#allocation25 + $0x358] sm:$0xff]  ;;  %v2365_v9 = vld [vmem:[#allocation25 + $0x3e0] sm:$0xff]  ;;  %v6617_v31 = vpack.c.bf16 %v2316_v20, %v2315_v51 }
 0xb45   :  { %2573 = vmatprep.mubr.f32.mxu1 %v2238_v27  ;;  %4829 = vmatprep.subr.bf16.mxu0 %v6594_v63  ;;  %6995 = vst [vmem:[#allocation90_spill] sm:$0xff] %v6614_v14  ;;  %v2366_v21 = vld [vmem:[#allocation25 + $0x3e8] sm:$0xff]  ;;  %v6621_v53 = vpack.c.bf16 %v2348_v18, %v2347_v43  ;;  %6998 = vst [vmem:[#allocation93_spill] sm:$0xff] %v6623_v28  ;;  %v2349_v38 = vld [vmem:[#allocation25 + $0x360] sm:$0xff] }
 0xb46   :  { %2643 = vmatprep.mubr.f32.mxu0 %v2240_v52  ;;  %6996 = vst [vmem:[#allocation91_spill] sm:$0xff] %v6617_v31  ;;  %v6626_v27 = vpack.c.bf16 %v2366_v21, %v2365_v9  ;;  %v2350_v52 = vld [vmem:[#allocation25 + $0x368] sm:$0xff]  ;;  %v2335_v63 = vld [vmem:[#allocation25 + $0x2f0] sm:$0xff]  ;;  %v2368_v20 = vld [vmem:[#allocation25 + $0x3f8] sm:$0xff] }
 0xb47   :  { %4799 = vmatpush3.bf16.msra.mxu1 %v6604_v29  ;;  %6997 = vst [vmem:[#allocation92_spill] sm:$0xff] %v6621_v53  ;;  %v2336_v29 = vld [vmem:[#allocation25 + $0x2f8] sm:$0xff]  ;;  %v2367_v51 = vld [vmem:[#allocation25 + $0x3f0] sm:$0xff]  ;;  %v6633_v43 = vpack.c.bf16 %v2350_v52, %v2349_v38  ;;  %v2649_v38 = vld [vmem:[#allocation22] sm:$0xff] }
 0xb48   :  { %4831 = vmatpush3.bf16.msra.mxu0 %v6609_v42  ;;  %4801 = vmatprep.subr.bf16.mxu1 %v6611_v59  ;;  %6999 = vst [vmem:[#allocation94_spill] sm:$0xff] %v6626_v27  ;;  %v6629_v42 = vpack.c.bf16 %v2318_v54, %v2317_v1  ;;  %v6635_v18 = vpack.c.bf16 %v2336_v29, %v2335_v63  ;;  %v2351_v9 = vld [vmem:[#allocation25 + $0x370] sm:$0xff]  ;;  %v2650_v59 = vld [vmem:[#allocation22 + $0x8] sm:$0xff]  ;;  %v2652_v1 = vld [vmem:[#allocation22 + $0x18] sm:$0xff] }
 0xb49   :  { %4833 = vmatprep.subr.bf16.mxu0 %v6614_v14  ;;  %7001 = vst [vmem:[#allocation96_spill] sm:$0xff] %v6633_v43  ;;  %v6638_v21 = vpack.c.bf16 %v2368_v20, %v2367_v51  ;;  %v2352_v14 = vld [vmem:[#allocation25 + $0x378] sm:$0xff]  ;;  %v2657_v52 = vld [vmem:[#allocation22 + $0x40] sm:$0xff]  ;;  %v2651_v51 = vld [vmem:[#allocation22 + $0x10] sm:$0xff] }
 0xb4a   :  { %7000 = vst [vmem:[#allocation95_spill] sm:$0xff] %v6629_v42  ;;  %7002 = vst [vmem:[#allocation97_spill] sm:$0xff] %v6635_v18  ;;  %v2660_v54 = vld [vmem:[#allocation22 + $0x58] sm:$0xff]  ;;  %v6645_v63 = vpack.c.bf16 %v2352_v14, %v2351_v9  ;;  %v2674_v0 = vld [vmem:[#allocation22 + $0xc8] sm:$0xff] }
 0xb4b   :  { %4803 = vmatpush3.bf16.msra.mxu1 %v6617_v31  ;;  %7003 = vst [vmem:[#allocation98_spill] sm:$0xff] %v6638_v21  ;;  %v2658_v31 = vld [vmem:[#allocation22 + $0x48] sm:$0xff]  ;;  %v4860_v20 = vpack.c.bf16 %v2660_v54, %v2652_v1  ;;  %v2668_v12 = vld [vmem:[#allocation22 + $0x98] sm:$0xff]  ;;  %v2667_v9 = vld [vmem:[#allocation22 + $0x90] sm:$0xff] }
 0xb4c   :  { %4835 = vmatpush3.bf16.msra.mxu0 %v6621_v53  ;;  %4805 = vmatprep.subr.bf16.mxu1 %v6623_v28  ;;  %v6641_v53 = vpack.c.bf16 %v2320_v61, %v2319_v55  ;;  %7005 = vst [vmem:[#allocation100_spill] sm:$0xff] %v6645_v63  ;;  %v4844_v29 = vpack.c.bf16 %v2658_v31, %v2650_v59  ;;  %v2666_v28 = vld [vmem:[#allocation22 + $0x88] sm:$0xff]  ;;  %v2665_v59 = vld [vmem:[#allocation22 + $0x80] sm:$0xff]  ;;  %v2692_v15 = vld [vmem:[#allocation22 + $0x158] sm:$0xff] }
 0xb4d   :  { %4837 = vmatprep.subr.bf16.mxu0 %v6626_v27  ;;  %v2659_v27 = vld [vmem:[#allocation22 + $0x50] sm:$0xff]  ;;  %v4846_v55 = vpack.c.bf16 %v2657_v52, %v2649_v38  ;;  %v4848_v61 = vpack.c.bf16 %v2674_v0, %v2666_v28  ;;  %v2673_v31 = vld [vmem:[#allocation22 + $0xc0] sm:$0xff]  ;;  %v2682_v1 = vld [vmem:[#allocation22 + $0x108] sm:$0xff] }
 0xb4e   :  { %7004 = vst [vmem:[#allocation99_spill] sm:$0xff] %v6641_v53  ;;  %v4862_v14 = vpack.c.bf16 %v2659_v27, %v2651_v51  ;;  %v2690_v54 = vld [vmem:[#allocation22 + $0x148] sm:$0xff]  ;;  %v4850_v38 = vpack.c.bf16 %v2673_v31, %v2665_v59  ;;  %v2681_v28 = vld [vmem:[#allocation22 + $0x100] sm:$0xff]  ;;  %v2683_v52 = vld [vmem:[#allocation22 + $0x110] sm:$0xff] }
 0xb4f   :  { %4807 = vmatpush3.bf16.msra.mxu1 %v6629_v42  ;;  %v2676_v42 = vld [vmem:[#allocation22 + $0xd8] sm:$0xff]  ;;  %v4852_v0 = vpack.c.bf16 %v2690_v54, %v2682_v1  ;;  %v2698_v51 = vld [vmem:[#allocation22 + $0x188] sm:$0xff]  ;;  %v2699_v59 = vld [vmem:[#allocation22 + $0x190] sm:$0xff] }
 0xb50   :  { %4839 = vmatpush3.bf16.msra.mxu0 %v6633_v43  ;;  %4809 = vmatprep.subr.bf16.mxu1 %v6635_v18  ;;  %v4864_v18 = vpack.c.bf16 %v2676_v42, %v2668_v12  ;;  %v2684_v43 = vld [vmem:[#allocation22 + $0x118] sm:$0xff]  ;;  %v2691_v42 = vld [vmem:[#allocation22 + $0x150] sm:$0xff]  ;;  %v2662_v31 = vld [vmem:[#allocation22 + $0x68] sm:$0xff] }
 0xb51   :  { %4841 = vmatprep.subr.bf16.mxu0 %v6638_v21  ;;  %v2675_v21 = vld [vmem:[#allocation22 + $0xd0] sm:$0xff]  ;;  %v4868_v12 = vpack.c.bf16 %v2692_v15, %v2684_v43  ;;  %v2664_v1 = vld [vmem:[#allocation22 + $0x78] sm:$0xff] }
 0xb52   :  { %v4866_v27 = vpack.c.bf16 %v2675_v21, %v2667_v9  ;;  %v4870_v21 = vpack.c.bf16 %v2691_v42, %v2683_v52  ;;  %v2707_v43 = vld [vmem:[#allocation22 + $0x1d0] sm:$0xff]  ;;  %v2656_v9 = vld [vmem:[#allocation22 + $0x38] sm:$0xff] }
 0xb53   :  { %4811 = vmatpush3.bf16.msra.mxu1 %v6641_v53  ;;  %v2708_v53 = vld [vmem:[#allocation22 + $0x1d8] sm:$0xff]  ;;  %v4892_v52 = vpack.c.bf16 %v2664_v1, %v2656_v9  ;;  %v2663_v42 = vld [vmem:[#allocation22 + $0x70] sm:$0xff] }
 0xb54   :  { %4843 = vmatpush3.bf16.msra.mxu0 %v6645_v63  ;;  %4845 = vmatprep.subr.bf16.mxu1 %v4844_v29  ;;  %v2689_v29 = vld [vmem:[#allocation22 + $0x140] sm:$0xff]  ;;  %v7006_v63 = vmov 0.0   ;;  %v2688_v9 = vld [vmem:[#allocation22 + $0x138] sm:$0xff] }
 0xb55   :  { %4861 = vmatprep.subr.bf16.mxu0 %v4860_v20  ;;  %v2706_v20 = vld [vmem:[#allocation22 + $0x1c8] sm:$0xff]  ;;  %v2696_v1 = vld [vmem:[#allocation22 + $0x178] sm:$0xff] }
 0xb56   :  { %2574 = vmatmul.mubr.f32.vlgmr.msra.gmra.mrb[22].mxu1 %v6597_v13  ;;  %v2700_v13 = vld [vmem:[#allocation22 + $0x198] sm:$0xff] }
 0xb57   :  { %2644 = vmatmul.mubr.f32.vlgmr.msra.gmra.mrb[26].mxu0 %v6600_v41  ;;  %4847 = vmatpush1.bf16.msra.mxu1 %v4846_v55  ;;  %v4854_v41 = vpack.c.bf16 %v2689_v29, %v2681_v28  ;;  %v4856_v55 = vpack.c.bf16 %v2706_v20, %v2698_v51  ;;  %v4872_v15 = vpack.c.bf16 %v2708_v53, %v2700_v13  ;;  %v2655_v29 = vld [vmem:[#allocation22 + $0x30] sm:$0xff]  ;;  %v2670_v51 = vld [vmem:[#allocation22 + $0xa8] sm:$0xff]  ;;  %v2672_v53 = vld [vmem:[#allocation22 + $0xb8] sm:$0xff] }
 0xb58   :  { %4863 = vmatpush1.bf16.msra.mxu0 %v4862_v14  ;;  %4849 = vmatprep.subr.bf16.mxu1 %v4848_v61  ;;  %v2697_v14 = vld [vmem:[#allocation22 + $0x180] sm:$0xff]  ;;  %v2680_v20 = vld [vmem:[#allocation22 + $0xf8] sm:$0xff] }
 0xb59   :  { %4865 = vmatprep.subr.bf16.mxu0 %v4864_v18  ;;  %2781 = vmatprep.mubr.f32.mxu1 %v7006_v63  ;;  %v2705_v61 = vld [vmem:[#allocation22 + $0x1c0] sm:$0xff]  ;;  %v2654_v18 = vld [vmem:[#allocation22 + $0x28] sm:$0xff] }
 0xb5a   :  { %2852 = vmatprep.mubr.f32.mxu0 %v7006_v63  ;;  %v4858_v54 = vpack.c.bf16 %v2705_v61, %v2697_v14  ;;  %v4876_v28 = vpack.c.bf16 %v2662_v31, %v2654_v18  ;;  %v2671_v61 = vld [vmem:[#allocation22 + $0xb0] sm:$0xff]  ;;  %v2694_v31 = vld [vmem:[#allocation22 + $0x168] sm:$0xff] }
 0xb5b   :  { %4851 = vmatpush1.bf16.msra.mxu1 %v4850_v38  ;;  %v4874_v38 = vpack.c.bf16 %v2707_v43, %v2699_v59  ;;  %v2714_v59 = vpop.permute.xlu0 %2713  ;;  %v4896_v43 = vpack.c.bf16 %v2680_v20, %v2672_v53  ;;  %v2679_v18 = vld [vmem:[#allocation22 + $0xf0] sm:$0xff]  ;;  %v2704_v53 = vld [vmem:[#allocation22 + $0x1b8] sm:$0xff] }
 0xb5c   :  { %4867 = vmatpush1.bf16.msra.mxu0 %v4866_v27  ;;  %4853 = vmatprep.subr.bf16.mxu1 %v4852_v0  ;;  %v2653_v27 = vld [vmem:[#allocation22 + $0x20] sm:$0xff]  ;;  %v2712_v20 = vld [vmem:[#allocation22 + $0x1f8] sm:$0xff] }
 0xb5d   :  { %4869 = vmatprep.subr.bf16.mxu0 %v4868_v12  ;;  %v2661_v0 = vld [vmem:[#allocation22 + $0x60] sm:$0xff]  ;;  %v2678_v12 = vld [vmem:[#allocation22 + $0xe8] sm:$0xff] }
 0xb5e   :  { %v4878_v13 = vpack.c.bf16 %v2661_v0, %v2653_v27  ;;  %v4880_v14 = vpack.c.bf16 %v2678_v12, %v2670_v51  ;;  %v2685_v27 = vld [vmem:[#allocation22 + $0x120] sm:$0xff]  ;;  %v2702_v51 = vld [vmem:[#allocation22 + $0x1a8] sm:$0xff] }
 0xb5f   :  { %4855 = vmatpush1.bf16.msra.mxu1 %v4854_v41  ;;  %v4894_v41 = vpack.c.bf16 %v2663_v42, %v2655_v29  ;;  %v2693_v0 = vld [vmem:[#allocation22 + $0x160] sm:$0xff]  ;;  %v2687_v29 = vld [vmem:[#allocation22 + $0x130] sm:$0xff]  ;;  %v2710_v12 = vld [vmem:[#allocation22 + $0x1e8] sm:$0xff] }
 0xb60   :  { %4871 = vmatpush1.bf16.msra.mxu0 %v4870_v21  ;;  %4857 = vmatprep.subr.bf16.mxu1 %v4856_v55  ;;  %v2669_v21 = vld [vmem:[#allocation22 + $0xa0] sm:$0xff]  ;;  %v2695_v42 = vld [vmem:[#allocation22 + $0x170] sm:$0xff] }
 0xb61   :  { %4873 = vmatprep.subr.bf16.mxu0 %v4872_v15  ;;  %v2677_v55 = vld [vmem:[#allocation22 + $0xe0] sm:$0xff]  ;;  %v2686_v15 = vld [vmem:[#allocation22 + $0x128] sm:$0xff] }
 0xb63   :  { %4859 = vmatpush1.bf16.msra.mxu1 %v4858_v54  ;;  %v4882_v54 = vpack.c.bf16 %v2677_v55, %v2669_v21  ;;  %v2701_v21 = vld [vmem:[#allocation22 + $0x1a0] sm:$0xff] }
 0xb64   :  { %4875 = vmatpush1.bf16.msra.mxu0 %v4874_v38  ;;  %4877 = vmatprep.subr.bf16.mxu1 %v4876_v28  ;;  %v4898_v38 = vpack.c.bf16 %v2679_v18, %v2671_v61  ;;  %v4884_v28 = vpack.c.bf16 %v2694_v31, %v2686_v15  ;;  %v2709_v55 = vld [vmem:[#allocation22 + $0x1e0] sm:$0xff]  ;;  %v4904_v61 = vpack.c.bf16 %v2712_v20, %v2704_v53  ;;  %v2711_v18 = vld [vmem:[#allocation22 + $0x1f0] sm:$0xff] }
 0xb65   :  { %4893 = vmatprep.subr.bf16.mxu0 %v4892_v52  ;;  %v4900_v52 = vpack.c.bf16 %v2696_v1, %v2688_v9  ;;  %v4890_v15 = vpack.c.bf16 %v2709_v55, %v2701_v21  ;;  %v7039_v9 = vld [vmem:[#allocation75_spill] sm:$0xff]  ;;  %v7040_v1 = vld [vmem:[#allocation76_spill] sm:$0xff] }
 0xb66   :  { %3934 = vmatmul.mubr.msk.f32.vlgmr.msra.gmra.mrb[24].mxu1 %vm1594_vm5, %v2714_v59 }
 0xb67   :  { %3935 = vmatmul.mubr.msk.f32.vlgmr.msra.gmra.mrb[28].mxu0 %vm1594_vm5, %v2714_v59  ;;  %4879 = vmatpush1.bf16.msra.mxu1 %v4878_v13  ;;  %v4886_v13 = vpack.c.bf16 %v2693_v0, %v2685_v27 }
 0xb68   :  { %4895 = vmatpush1.bf16.msra.mxu0 %v4894_v41  ;;  %4881 = vmatprep.subr.bf16.mxu1 %v4880_v14  ;;  %v4902_v41 = vpack.c.bf16 %v2695_v42, %v2687_v29  ;;  %v4888_v14 = vpack.c.bf16 %v2710_v12, %v2702_v51 }
 0xb69   :  { %4897 = vmatprep.subr.bf16.mxu0 %v4896_v43  ;;  %2923 = vmatprep.mubr.f32.mxu1 %v7006_v63  ;;  %v2703_v43 = vld [vmem:[#allocation22 + $0x1b0] sm:$0xff] }
 0xb6a   :  { %2994 = vmatprep.mubr.f32.mxu0 %v7006_v63  ;;  %v4906_v31 = vpack.c.bf16 %v2711_v18, %v2703_v43 }
 0xb6b   :  { %4883 = vmatpush1.bf16.msra.mxu1 %v4882_v54 }
 0xb6c   :  { %4899 = vmatpush1.bf16.msra.mxu0 %v4898_v38  ;;  %4885 = vmatprep.subr.bf16.mxu1 %v4884_v28 }
 0xb6d   :  { %4901 = vmatprep.subr.bf16.mxu0 %v4900_v52 }
 0xb6f   :  { %4887 = vmatpush1.bf16.msra.mxu1 %v4886_v13 }
 0xb70   :  { %4903 = vmatpush1.bf16.msra.mxu0 %v4902_v41  ;;  %4889 = vmatprep.subr.bf16.mxu1 %v4888_v14 }
 0xb71   :  { %4905 = vmatprep.subr.bf16.mxu0 %v4904_v61 }
 0xb73   :  { %4891 = vmatpush1.bf16.msra.mxu1 %v4890_v15 }
 0xb74   :  { %4907 = vmatpush1.bf16.msra.mxu0 %v4906_v31  ;;  %4909 = vmatprep.subr.bf16.mxu1 %v6324_v34  ;;  %v3002_v34 = vpop.permute.xlu1 %3001 }
 0xb75   :  { %4925 = vmatprep.subr.bf16.mxu0 %v6326_v39  ;;  %v7007_v39 = vld [vmem:[#allocation43_spill] sm:$0xff] }
 0xb76   :  { %3936 = vmatmul.mubr.msk.f32.vlgmr.msra.gmra.mrb[26].mxu1 %vm1594_vm5, %v2714_v59 }
 0xb77   :  { %3937 = vmatmul.mubr.msk.f32.vlgmr.msra.gmra.mrb[30].mxu0 %vm1594_vm5, %v2714_v59  ;;  %4911 = vmatpush1.bf16.msra.mxu1 %v6328_v44  ;;  %v7008_v44 = vld [vmem:[#allocation44_spill] sm:$0xff]  ;;  %v7038_v59 = vld [vmem:[#allocation74_spill] sm:$0xff] }
 0xb78   :  { %4927 = vmatpush1.bf16.msra.mxu0 %v6331_v46  ;;  %4913 = vmatprep.subr.bf16.mxu1 %v6333_v47  ;;  %v7009_v46 = vld [vmem:[#allocation45_spill] sm:$0xff]  ;;  %v7010_v47 = vld [vmem:[#allocation46_spill] sm:$0xff] }
 0xb79   :  { %4929 = vmatprep.subr.bf16.mxu0 %v6338_v23  ;;  %3069 = vmatprep.mubr.f32.mxu1 %v7006_v63  ;;  %v7011_v23 = vld [vmem:[#allocation47_spill] sm:$0xff] }
 0xb7a   :  { %3140 = vmatprep.mubr.f32.mxu0 %v7006_v63 }
 0xb7b   :  { %4915 = vmatpush1.bf16.msra.mxu1 %v6345_v56  ;;  %v7012_v56 = vld [vmem:[#allocation48_spill] sm:$0xff] }
 0xb7c   :  { %4931 = vmatpush1.bf16.msra.mxu0 %v6349_v57  ;;  %4917 = vmatprep.subr.bf16.mxu1 %v6351_v58  ;;  %v7013_v57 = vld [vmem:[#allocation49_spill] sm:$0xff]  ;;  %v7014_v58 = vld [vmem:[#allocation50_spill] sm:$0xff] }
 0xb7d   :  { %4933 = vmatprep.subr.bf16.mxu0 %v6354_v62  ;;  %v7015_v62 = vld [vmem:[#allocation51_spill] sm:$0xff] }
 0xb7f   :  { %4919 = vmatpush1.bf16.msra.mxu1 %v6359_v6  ;;  %v7016_v6 = vld [vmem:[#allocation52_spill] sm:$0xff] }
 0xb80   :  { %4935 = vmatpush1.bf16.msra.mxu0 %v6363_v7  ;;  %4921 = vmatprep.subr.bf16.mxu1 %v6365_v8  ;;  %v7017_v7 = vld [vmem:[#allocation53_spill] sm:$0xff]  ;;  %v7018_v8 = vld [vmem:[#allocation54_spill] sm:$0xff] }
 0xb81   :  { %4937 = vmatprep.subr.bf16.mxu0 %v6368_v5  ;;  %v7019_v5 = vld [vmem:[#allocation55_spill] sm:$0xff] }
 0xb83   :  { %4923 = vmatpush1.bf16.msra.mxu1 %v6371_v16  ;;  %v7020_v16 = vld [vmem:[#allocation56_spill] sm:$0xff] }
 0xb84   :  { %4939 = vmatpush1.bf16.msra.mxu0 %v6375_v22  ;;  %4941 = vmatprep.subr.bf16.mxu1 %v6377_v26  ;;  %v7021_v22 = vld [vmem:[#allocation57_spill] sm:$0xff]  ;;  %v7022_v26 = vld [vmem:[#allocation58_spill] sm:$0xff] }
 0xb85   :  { %4957 = vmatprep.subr.bf16.mxu0 %v6380_v32  ;;  %v7023_v32 = vld [vmem:[#allocation59_spill] sm:$0xff] }
 0xb86   :  { %3938 = vmatmul.mubr.msk.f32.vlgmr.msra.gmra.mrb[28].mxu1 %vm1594_vm5, %v3002_v34 }
 0xb87   :  { %3939 = vmatmul.mubr.msk.f32.vlgmr.msra.gmra.mrb[32].mxu0 %vm1594_vm5, %v3002_v34  ;;  %4943 = vmatpush1.bf16.msra.mxu1 %v6383_v40  ;;  %v7024_v40 = vld [vmem:[#allocation60_spill] sm:$0xff] }
 0xb88   :  { %4959 = vmatpush1.bf16.msra.mxu0 %v6389_v25  ;;  %4945 = vmatprep.subr.bf16.mxu1 %v6391_v49  ;;  %v7025_v25 = vld [vmem:[#allocation61_spill] sm:$0xff]  ;;  %v7026_v49 = vld [vmem:[#allocation62_spill] sm:$0xff] }
 0xb89   :  { %4961 = vmatprep.subr.bf16.mxu0 %v6394_v17  ;;  %3211 = vmatprep.mubr.f32.mxu1 %v7006_v63  ;;  %v7027_v17 = vld [vmem:[#allocation63_spill] sm:$0xff] }
 0xb8a   :  { %3282 = vmatprep.mubr.f32.mxu0 %v7006_v63 }
 0xb8b   :  { %4947 = vmatpush1.bf16.msra.mxu1 %v6401_v19  ;;  %v7028_v19 = vld [vmem:[#allocation64_spill] sm:$0xff] }
 0xb8c   :  { %4963 = vmatpush1.bf16.msra.mxu0 %v6406_v60  ;;  %4949 = vmatprep.subr.bf16.mxu1 %v6409_v2  ;;  %v7029_v60 = vld [vmem:[#allocation65_spill] sm:$0xff]  ;;  %v7030_v2 = vld [vmem:[#allocation66_spill] sm:$0xff] }
 0xb8d   :  { %4965 = vmatprep.subr.bf16.mxu0 %v6411_v3  ;;  %v7031_v3 = vld [vmem:[#allocation67_spill] sm:$0xff] }
 0xb8f   :  { %4951 = vmatpush1.bf16.msra.mxu1 %v6417_v10  ;;  %v7032_v10 = vld [vmem:[#allocation68_spill] sm:$0xff] }
 0xb90   :  { %4967 = vmatpush1.bf16.msra.mxu0 %v6420_v11  ;;  %4953 = vmatprep.subr.bf16.mxu1 %v6422_v48  ;;  %v7033_v11 = vld [vmem:[#allocation69_spill] sm:$0xff]  ;;  %v7034_v48 = vld [vmem:[#allocation70_spill] sm:$0xff] }
 0xb91   :  { %4969 = vmatprep.subr.bf16.mxu0 %v6426_v30  ;;  %v7035_v30 = vld [vmem:[#allocation71_spill] sm:$0xff] }
 0xb93   :  { %4955 = vmatpush1.bf16.msra.mxu1 %v6429_v35  ;;  %v7036_v35 = vld [vmem:[#allocation72_spill] sm:$0xff] }
 0xb94   :  { %4971 = vmatpush1.bf16.msra.mxu0 %v6433_v37  ;;  %4973 = vmatprep.subr.bf16.mxu1 %v7007_v39  ;;  %v7037_v37 = vld [vmem:[#allocation73_spill] sm:$0xff]  ;;  %v5221_v39 = vld [vmem:[%s6842_s11] sm:$0x7] }
 0xb95   :  { %5005 = vmatprep.subr.bf16.mxu0 %v7008_v44  ;;  %v7041_v44 = vld [vmem:[#allocation40_spill] sm:$0xff] }
 0xb96   :  { %3940 = vmatmul.mubr.msk.f32.vlgmr.msra.gmra.mrb[30].mxu1 %vm1594_vm5, %v3002_v34 }
 0xb97   :  { %3941 = vmatmul.mubr.msk.f32.vlgmr.msra.gmra.mrb[34].mxu0 %vm1594_vm5, %v3002_v34  ;;  %4975 = vmatpush3.bf16.msra.mxu1 %v7009_v46  ;;  %v1382_v46 = vrot.slane %v5221_v39, %v7041_v44  ;;  %v3588_v39 = vld [vmem:[#allocation26 + $0x28] sm:$0xff] }
 0xb98   :  { %5007 = vmatpush3.bf16.msra.mxu0 %v7010_v47  ;;  %4977 = vmatprep.subr.bf16.mxu1 %v7011_v23  ;;  %v7042_v47 = vld [vmem:[#allocation42_spill] sm:$0xff] }
 0xb99   :  { %5009 = vmatprep.subr.bf16.mxu0 %v7012_v56  ;;  %v6741_v23 = vadd.f32 %v7042_v47, %v1382_v46  ;;  %v3589_v46 = vld [vmem:[#allocation26 + $0x30] sm:$0xff]  ;;  %v3590_v47 = vld [vmem:[#allocation26 + $0x38] sm:$0xff] }
 0xb9b   :  { %4979 = vmatpush3.bf16.msra.mxu1 %v7013_v57  ;;  %v3679_v56 = vmul.f32 %v6741_v23, %v6741_v23 }
 0xb9c   :  { %5011 = vmatpush3.bf16.msra.mxu0 %v7014_v58  ;;  %4981 = vmatprep.subr.bf16.mxu1 %v7015_v62 }
 0xb9d   :  { %5013 = vmatprep.subr.bf16.mxu0 %v7016_v6  ;;  %v3680_v57 = vmul.f32 %v3679_v56, %v6741_v23  ;;  %v3591_v56 = vld [vmem:[#allocation26 + $0x40] sm:$0xff] }
 0xb9f   :  { %4983 = vmatpush3.bf16.msra.mxu1 %v7017_v7 }
 0xba0   :  { %5015 = vmatpush3.bf16.msra.mxu0 %v7018_v8  ;;  %4985 = vmatprep.subr.bf16.mxu1 %v7019_v5 }
 0xba1   :  { %5017 = vmatprep.subr.bf16.mxu0 %v7020_v16 }
 0xba3   :  { %4987 = vmatpush3.bf16.msra.mxu1 %v7021_v22 }
 0xba4   :  { %5019 = vmatpush3.bf16.msra.mxu0 %v7022_v26  ;;  %4989 = vmatprep.subr.bf16.mxu1 %v7023_v32  ;;  %v3681_v26 = vmul.f32 0.044715, %v3680_v57  ;;  %v3592_v57 = vld [vmem:[#allocation26 + $0x48] sm:$0xff] }
 0xba5   :  { %5021 = vmatprep.subr.bf16.mxu0 %v7024_v40  ;;  %v7043_v40 = vld [vmem:[#allocation77_spill] sm:$0xff] }
 0xba6   :  { %v3682_v32 = vadd.f32 %v3681_v26, %v6741_v23  ;;  %v3598_v26 = vld [vmem:[#allocation26 + $0x78] sm:$0xff] }
 0xba7   :  { %4991 = vmatpush3.bf16.msra.mxu1 %v7025_v25 }
 0xba8   :  { %5023 = vmatpush3.bf16.msra.mxu0 %v7026_v49  ;;  %4993 = vmatprep.subr.bf16.mxu1 %v7027_v17  ;;  %v3683_v25 = vmul.f32 0.7978846, %v3682_v32  ;;  %v7044_v49 = vld [vmem:[#allocation78_spill] sm:$0xff]  ;;  %v7045_v17 = vld [vmem:[#allocation79_spill] sm:$0xff] }
 0xba9   :  { %5025 = vmatprep.subr.bf16.mxu0 %v7028_v19  ;;  %v7048_v19 = vld [vmem:[#allocation82_spill] sm:$0xff] }
 0xbaa   :  { %5216 = vtanh.f32 %v3683_v25 }
 0xbab   :  { %4995 = vmatpush3.bf16.msra.mxu1 %v7029_v60 }
 0xbac   :  { %5027 = vmatpush3.bf16.msra.mxu0 %v7030_v2  ;;  %4997 = vmatprep.subr.bf16.mxu1 %v7031_v3 }
 0xbad   :  { %5029 = vmatprep.subr.bf16.mxu0 %v7032_v10  ;;  %v7049_v10 = vld [vmem:[#allocation83_spill] sm:$0xff] }
 0xbaf   :  { %4999 = vmatpush3.bf16.msra.mxu1 %v7033_v11 }
 0xbb0   :  { %5031 = vmatpush3.bf16.msra.mxu0 %v7034_v48  ;;  %5001 = vmatprep.subr.bf16.mxu1 %v7035_v30  ;;  %v7050_v48 = vld [vmem:[#allocation84_spill] sm:$0xff]  ;;  %v7051_v30 = vld [vmem:[#allocation85_spill] sm:$0xff] }
 0xbb1   :  { %5033 = vmatprep.subr.bf16.mxu0 %v7036_v35  ;;  %v7052_v35 = vld [vmem:[#allocation86_spill] sm:$0xff] }
 0xbb3   :  { %5003 = vmatpush3.bf16.msra.mxu1 %v7037_v37  ;;  %v7053_v37 = vld [vmem:[#allocation87_spill] sm:$0xff] }
 0xbb4   :  { %5035 = vmatpush3.bf16.msra.mxu0 %v7038_v59  ;;  %5037 = vmatprep.subr.bf16.mxu1 %v7039_v9  ;;  %v7054_v59 = vld [vmem:[#allocation88_spill] sm:$0xff]  ;;  %v7055_v9 = vld [vmem:[#allocation89_spill] sm:$0xff] }
 0xbb5   :  { %5069 = vmatprep.subr.bf16.mxu0 %v7040_v1  ;;  %v7056_v1 = vld [vmem:[#allocation90_spill] sm:$0xff] }
 0xc09   :  { %v4048_v54 = vpop.f32.mrb[20].mxu1 }
 0xc0a   :  { %v4083_v38 = vpop.f32.mrb[24].mxu0  ;;  %v4049_v28 = vpop.f32.mrb[21].mxu1 }
 0xc0b   :  { %v4050_v27 = vadd.f32 %v4049_v28, %v4048_v54  ;;  %v4084_v0 = vpop.f32.mrb[25].mxu0  ;;  %v5217_v54 = vpop.eup %5216  ;;  %v7058_v28 = vld [vmem:[#allocation92_spill] sm:$0xff] }
 0xc0c   :  { %v4085_v29 = vadd.f32 %v4084_v0, %v4083_v38  ;;  %v7057_v38 = vld [vmem:[#allocation91_spill] sm:$0xff]  ;;  %v7060_v0 = vld [vmem:[#allocation94_spill] sm:$0xff] }
 0xc0e   :  { %v2506_v52 = vadd.f32 %v4085_v29, %v4050_v27  ;;  %v7059_v27 = vld [vmem:[#allocation93_spill] sm:$0xff]  ;;  %v3685_v29 = vadd.f32 1.0, %v5217_v54 }
 0xc29   :  { %v4118_v42 = vpop.f32.mrb[22].mxu1 }
 0xc2a   :  { %v4153_v51 = vpop.f32.mrb[26].mxu0  ;;  %v4119_v12 = vpop.f32.mrb[23].mxu1 }
 0xc2b   :  { %v4120_v53 = vadd.f32 %v4119_v12, %v4118_v42  ;;  %v4154_v20 = vpop.f32.mrb[27].mxu0  ;;  %v7062_v42 = vld [vmem:[#allocation96_spill] sm:$0xff]  ;;  %v7064_v12 = vld [vmem:[#allocation98_spill] sm:$0xff] }
 0xc2c   :  { %v4155_v13 = vadd.f32 %v4154_v20, %v4153_v51  ;;  %v7063_v51 = vld [vmem:[#allocation97_spill] sm:$0xff]  ;;  %v7065_v20 = vld [vmem:[#allocation99_spill] sm:$0xff] }
 0xc2d   :  { %v2576_v41 = vadd.f32 %v4120_v53, %v2506_v52  ;;  %v7061_v52 = vld [vmem:[#allocation95_spill] sm:$0xff]  ;;  %v3686_v53 = vmul.f32 0.5, %v3685_v29 }
 0xc2f   :  { %v6734_v14 = vadd.f32 %v4155_v13, %v2576_v41  ;;  %v7066_v13 = vld [vmem:[#allocation100_spill] sm:$0xff]  ;;  %v7067_v41 = vmov 0.0|0.0  }
 0xc39   :  { %v2783_v21 = vpop.f32.mrb[24].mxu1 }
 0xc3a   :  { %v2854_v55 = vpop.f32.mrb[28].mxu0  ;;  %v2785_v61 = vpop.f32.mrb[25].mxu1 }
 0xc3b   :  { %v2856_v43 = vpop.f32.mrb[29].mxu0 }
 0xc49   :  { %v2925_v18 = vpop.f32.mrb[26].mxu1 }
 0xc4a   :  { %v2996_v15 = vpop.f32.mrb[30].mxu0  ;;  %v2927_v31 = vpop.f32.mrb[27].mxu1 }
 0xc4b   :  { %v2998_v34 = vpop.f32.mrb[31].mxu0 }
 0xc59   :  { %v3071_v58 = vpop.f32.mrb[28].mxu1 }
 0xc5a   :  { %v3289_v62 = vmul.f32 %v3071_v58, %v2783_v21  ;;  %v3142_v6 = vpop.f32.mrb[32].mxu0  ;;  %v3073_v7 = vpop.f32.mrb[29].mxu1  ;;  %v3687_v21 = vmul.f32 %v3686_v53, %v6741_v23  ;;  %v5110_v23 = vpack.c.bf16 %v3590_v47, %v3589_v46  ;;  %v5113_v58 = vpack.c.bf16 %v3592_v57, %v3591_v56  ;;  %v3693_v53 = vld [vmem:[#allocation14 + $0x28] sm:$0xff]  ;;  %v3702_v46 = vld [vmem:[#allocation14 + $0x70] sm:$0xff]  ;;  %v3703_v47 = vld [vmem:[#allocation14 + $0x78] sm:$0xff] }
 0xc5b   :  { %v3291_v8 = vmul.f32 %v3142_v6, %v2854_v55  ;;  %v3290_v5 = vmul.f32 %v3073_v7, %v2785_v61  ;;  %v3144_v16 = vpop.f32.mrb[33].mxu0  ;;  %v3583_v55 = vld [vmem:[#allocation26] sm:$0xff]  ;;  %v3584_v61 = vld [vmem:[#allocation26 + $0x8] sm:$0xff]  ;;  %v3594_v6 = vld [vmem:[#allocation26 + $0x58] sm:$0xff] }
 0xc5c   :  { %v3292_v22 = vmul.f32 %v3144_v16, %v2856_v43  ;;  %v3585_v43 = vld [vmem:[#allocation26 + $0x10] sm:$0xff]  ;;  %v3704_v56 = vld [vmem:[#allocation14 + $0x80] sm:$0xff] }
 0xc5d   :  { %3361 = vmatprep.mubr.f32.mxu1 %v3290_v5  ;;  %v3596_v5 = vld [vmem:[#allocation26 + $0x68] sm:$0xff] }
 0xc5e   :  { %3431 = vmatprep.mubr.f32.mxu0 %v3292_v22  ;;  %3362 = vmatmul.mubr.f32.vlgmr.msra.gmra.mrb[32].mxu1 %v3289_v62  ;;  %v3593_v62 = vld [vmem:[#allocation26 + $0x50] sm:$0xff] }
 0xc5f   :  { %3432 = vmatmul.mubr.f32.vlgmr.msra.gmra.mrb[36].mxu0 %v3291_v8  ;;  %5039 = vmatpush3.bf16.msra.mxu1 %v6552_v33  ;;  %v7046_v33 = vld [vmem:[#allocation80_spill] sm:$0xff]  ;;  %v5116_v7 = vpack.c.bf16 %v3594_v6, %v3593_v62  ;;  %v3595_v8 = vld [vmem:[#allocation26 + $0x60] sm:$0xff]  ;;  %v3787_v62 = vld [vmem:[#allocation17] sm:$0xff] }
 0xc60   :  { %5071 = vmatpush3.bf16.msra.mxu0 %v6554_v45  ;;  %5041 = vmatprep.subr.bf16.mxu1 %v6556_v4  ;;  %v7047_v45 = vld [vmem:[#allocation81_spill] sm:$0xff]  ;;  %v5119_v16 = vpack.c.bf16 %v3596_v5, %v3595_v8  ;;  %v3705_v57 = vld [vmem:[#allocation14 + $0x88] sm:$0xff]  ;;  %v3788_v6 = vld [vmem:[#allocation17 + $0x8] sm:$0xff] }
 0xc61   :  { %5073 = vmatprep.subr.bf16.mxu0 %v6558_v36  ;;  %v3597_v22 = vld [vmem:[#allocation26 + $0x70] sm:$0xff]  ;;  %v5152_v8 = vpack.c.bf16 %v3788_v6, %v3787_v62 }
 0xc62   :  { %v5122_v32 = vpack.c.bf16 %v3598_v26, %v3597_v22  ;;  %v3790_v5 = vld [vmem:[#allocation17 + $0x18] sm:$0xff]  ;;  %v3791_v22 = vld [vmem:[#allocation17 + $0x20] sm:$0xff]  ;;  %v3792_v26 = vld [vmem:[#allocation17 + $0x28] sm:$0xff] }
 0xc63   :  { %5043 = vmatpush3.bf16.msra.mxu1 %v6561_v50 }
 0xc64   :  { %5075 = vmatpush3.bf16.msra.mxu0 %v6565_v24  ;;  %5045 = vmatprep.subr.bf16.mxu1 %v7043_v40 }
 0xc65   :  { %5077 = vmatprep.subr.bf16.mxu0 %v7044_v49 }
 0xc67   :  { %5047 = vmatpush3.bf16.msra.mxu1 %v7045_v17 }
 0xc68   :  { %5079 = vmatpush3.bf16.msra.mxu0 %v7046_v33  ;;  %5049 = vmatprep.subr.bf16.mxu1 %v7047_v45 }
 0xc69   :  { %v3213_v4 = vpop.f32.mrb[30].mxu1  ;;  %5081 = vmatprep.subr.bf16.mxu0 %v7048_v19  ;;  %v473_v19 = vpop.xlane.xlu1 %472 }
 0xc6a   :  { %v3293_v36 = vmul.f32 %v3213_v4, %v2925_v18  ;;  %v3284_v60 = vpop.f32.mrb[34].mxu0  ;;  %v3215_v50 = vpop.f32.mrb[31].mxu1  ;;  %v5101_v18 = vpack.c.bf16 %v3584_v61, %v3583_v55  ;;  %v3696_v61 = vld [vmem:[#allocation14 + $0x40] sm:$0xff] }
 0xc6b   :  { %v3295_v2 = vmul.f32 %v3284_v60, %v2996_v15  ;;  %v3294_v24 = vmul.f32 %v3215_v50, %v2927_v31  ;;  %v3286_v3 = vpop.f32.mrb[35].mxu0  ;;  %5051 = vmatpush3.bf16.msra.mxu1 %v7049_v10  ;;  %v3586_v15 = vld [vmem:[#allocation26 + $0x18] sm:$0xff]  ;;  %v3689_v10 = vld [vmem:[#allocation14 + $0x8] sm:$0xff] }
 0xc6c   :  { %v3296_v11 = vmul.f32 %v3286_v3, %v2998_v34  ;;  %5083 = vmatpush3.bf16.msra.mxu0 %v7050_v48  ;;  %5053 = vmatprep.subr.bf16.mxu1 %v7051_v30  ;;  %v5104_v31 = vpack.c.bf16 %v3586_v15, %v3585_v43  ;;  %v3587_v34 = vld [vmem:[#allocation26 + $0x20] sm:$0xff] }
 0xc6d   :  { %3501 = vmatprep.mubr.f32.mxu1 %v3294_v24  ;;  %5085 = vmatprep.subr.bf16.mxu0 %v7052_v35  ;;  %v5107_v44 = vpack.c.bf16 %v3588_v39, %v3587_v34  ;;  %v3688_v3 = vld [vmem:[#allocation14] sm:$0xff]  ;;  %v3691_v30 = vld [vmem:[#allocation14 + $0x18] sm:$0xff]  ;;  %v3701_v39 = vld [vmem:[#allocation14 + $0x68] sm:$0xff] }
 0xc6e   :  { %3571 = vmatprep.mubr.f32.mxu0 %v3296_v11  ;;  %v3690_v11 = vld [vmem:[#allocation14 + $0x10] sm:$0xff]  ;;  %v5125_v48 = vpack.c.bf16 %v3689_v10, %v3688_v3  ;;  %v3699_v15 = vld [vmem:[#allocation14 + $0x58] sm:$0xff]  ;;  %v3700_v34 = vld [vmem:[#allocation14 + $0x60] sm:$0xff] }
 0xc6f   :  { %5055 = vmatpush3.bf16.msra.mxu1 %v7053_v37  ;;  %v3794_v3 = vld [vmem:[#allocation17 + $0x38] sm:$0xff] }
 0xc70   :  { %5087 = vmatpush3.bf16.msra.mxu0 %v7054_v59  ;;  %5057 = vmatprep.subr.bf16.mxu1 %v7055_v9  ;;  %v5128_v9 = vpack.c.bf16 %v3691_v30, %v3690_v11  ;;  %v3942_v11 = vld [vmem:[#allocation16] ss:$0 sm:$0xff] }
 0xc71   :  { %5089 = vmatprep.subr.bf16.mxu0 %v7056_v1 }
 0xc73   :  { %5059 = vmatpush3.bf16.msra.mxu1 %v7057_v38 }
 0xc74   :  { %5091 = vmatpush3.bf16.msra.mxu0 %v7058_v28  ;;  %5061 = vmatprep.subr.bf16.mxu1 %v7059_v27 }
 0xc75   :  { %5093 = vmatprep.subr.bf16.mxu0 %v7060_v0 }
 0xc77   :  { %5063 = vmatpush3.bf16.msra.mxu1 %v7061_v52 }
 0xc78   :  { %5095 = vmatpush3.bf16.msra.mxu0 %v7062_v42  ;;  %5065 = vmatprep.subr.bf16.mxu1 %v7063_v51 }
 0xc79   :  { %5097 = vmatprep.subr.bf16.mxu0 %v7064_v12  ;;  %v3692_v12 = vld [vmem:[#allocation14 + $0x20] sm:$0xff] }
 0xc7b   :  { %5067 = vmatpush3.bf16.msra.mxu1 %v7065_v20  ;;  %v5131_v20 = vpack.c.bf16 %v3693_v53, %v3692_v12 }
 0xc7c   :  { %5099 = vmatpush3.bf16.msra.mxu0 %v7066_v13  ;;  %5100 = vmatprep.subr.bf16.mxu1 %v7067_v41  ;;  %v3694_v13 = vld [vmem:[#allocation14 + $0x30] sm:$0xff] }
 0xc7d   :  { %5124 = vmatprep.subr.bf16.mxu0 %v7067_v41 }
 0xc7e   :  { %3502 = vmatmul.mubr.f32.vlgmr.msra.gmra.mrb[34].mxu1 %v3293_v36  ;;  %v474_v36 = vrot.slane %v473_v19, 4 }
 0xc7f   :  { %3572 = vmatmul.mubr.f32.vlgmr.msra.gmra.mrb[38].mxu0 %v3295_v2  ;;  %4430 = vmatprep.mubr.msk.f32.mxu1 %vm5664_vm0, %v7006_v63 }
 0xc80   :  { %3943 = vmatprep.mubr.msk.f32.mxu0 %vm966_vm4, %v3687_v21  ;;  %5102 = vmatpush3.bf16.msra.mxu1 %v5101_v18  ;;  %v475_v60 = vadd.f32 %v474_v36, %v473_v19  ;;  %v3695_v21 = vld [vmem:[#allocation14 + $0x38] sm:$0xff]  ;;  %v3698_v18 = vld [vmem:[#allocation14 + $0x50] sm:$0xff] }
 0xc81   :  { %5103 = vmatprep.subr.bf16.mxu1 %v7067_v41  ;;  %5126 = vmatpush1.bf16.msra.mxu0 %v5125_v48  ;;  %v5134_v55 = vpack.c.bf16 %v3695_v21, %v3694_v13 }
 0xc82   :  { %v476_v50 = vrot.slane %v475_v60, 2  ;;  %5127 = vmatprep.subr.bf16.mxu0 %v7067_v41 }
 0xc84   :  { %5105 = vmatpush3.bf16.msra.mxu1 %v5104_v31  ;;  %v477_v2 = vadd.f32 %v476_v50, %v475_v60  ;;  %v5140_v31 = vpack.c.bf16 %v3699_v15, %v3698_v18 }
 0xc85   :  { %5106 = vmatprep.subr.bf16.mxu1 %v7067_v41  ;;  %5129 = vmatpush1.bf16.msra.mxu0 %v5128_v9  ;;  %v3944_v9 = vld [vmem:[#allocation19] ss:$0 sm:$0xff] }
 0xc86   :  { %v478_v24 = vrot.slane %v477_v2, 1  ;;  %5130 = vmatprep.subr.bf16.mxu0 %v7067_v41 }
 0xc88   :  { %5108 = vmatpush3.bf16.msra.mxu1 %v5107_v44  ;;  %v479_v38 = vadd.f32 %v478_v24, %v477_v2  ;;  %v5143_v44 = vpack.c.bf16 %v3701_v39, %v3700_v34  ;;  %v3793_v24 = vld [vmem:[#allocation17 + $0x30] sm:$0xff] }
 0xc89   :  { %5109 = vmatprep.subr.bf16.mxu1 %v7067_v41  ;;  %5132 = vmatpush1.bf16.msra.mxu0 %v5131_v20  ;;  %v5161_v10 = vpack.c.bf16 %v3794_v3, %v3793_v24 }
 0xc8a   :  { %v480_v29 = vmul.f32 0.03125, %v479_v38  ;;  %5133 = vmatprep.subr.bf16.mxu0 %v7067_v41 }
 0xc8c   :  { %5111 = vmatpush3.bf16.msra.mxu1 %v5110_v23  ;;  %v5146_v23 = vpack.c.bf16 %v3703_v47, %v3702_v46 }
 0xc8d   :  { %5112 = vmatprep.subr.bf16.mxu1 %v7067_v41  ;;  %5135 = vmatpush1.bf16.msra.mxu0 %v5134_v55 }
 0xc8e   :  { %5136 = vmatprep.subr.bf16.mxu0 %v7067_v41 }
 0xc90   :  { %5114 = vmatpush3.bf16.msra.mxu1 %v5113_v58  ;;  %v5149_v58 = vpack.c.bf16 %v3705_v57, %v3704_v56 }
 0xc91   :  { %5115 = vmatprep.subr.bf16.mxu1 %v7067_v41 }
 0xc94   :  { %5117 = vmatpush3.bf16.msra.mxu1 %v5116_v7  ;;  %v3789_v7 = vld [vmem:[#allocation17 + $0x10] sm:$0xff] }
 0xc95   :  { %5118 = vmatprep.subr.bf16.mxu1 %v7067_v41 }
 0xc98   :  { %5120 = vmatpush3.bf16.msra.mxu1 %v5119_v16  ;;  %v5155_v16 = vpack.c.bf16 %v3790_v5, %v3789_v7 }
 0xc99   :  { %5121 = vmatprep.subr.bf16.mxu1 %v7067_v41 }
 0xc9c   :  { %5123 = vmatpush3.bf16.msra.mxu1 %v5122_v32  ;;  %v5158_v32 = vpack.c.bf16 %v3792_v26, %v3791_v22 }
 0xc9d   :  { %5151 = vmatprep.subr.bf16.mxu1 %v7067_v41 }
 0xd31   :  { %v4188_v40 = vpop.f32.mrb[32].mxu1 }
 0xd32   :  { %v4223_v25 = vpop.f32.mrb[36].mxu0  ;;  %v4189_v49 = vpop.f32.mrb[33].mxu1 }
 0xd33   :  { %v4190_v17 = vadd.f32 %v4189_v49, %v4188_v40  ;;  %v4224_v33 = vpop.f32.mrb[37].mxu0 }
 0xd34   :  { %v4225_v45 = vadd.f32 %v4224_v33, %v4223_v25 }
 0xd36   :  { %v3434_v4 = vadd.f32 %v4225_v45, %v4190_v17 }
 0xd51   :  { %v4258_v35 = vpop.f32.mrb[34].mxu1 }
 0xd52   :  { %v4293_v37 = vpop.f32.mrb[38].mxu0  ;;  %v4259_v59 = vpop.f32.mrb[35].mxu1 }
 0xd53   :  { %v4260_v1 = vadd.f32 %v4259_v59, %v4258_v35  ;;  %v4294_v54 = vpop.f32.mrb[39].mxu0 }
 0xd54   :  { %v4295_v28 = vadd.f32 %v4294_v54, %v4293_v37  ;;  %v7068_v37 = vld [vmem:[#allocation41_spill] sm:$0xff] }
 0xd55   :  { %v3504_v27 = vadd.f32 %v4260_v1, %v3434_v4 }
 0xd57   :  { %v3574_v0 = vadd.f32 %v4295_v28, %v3504_v27 }
 0xd59   :  { %v3577_v52 = vmul.f32 %v3574_v0, %v480_v29 }
 0xd5b   :  { %3579 = vrot.lane.b32.xlu0 %v3577_v52, %s5651_s3 }
 0xdcd   :  { %v3580_v42 = vpop.permute.xlu0 %3579 }
 0xdce   :  { %v6796_v51 = vsel %vm1594_vm5, %v6734_v14, %v3580_v42  ;;  %v3697_v14 = vld [vmem:[#allocation14 + $0x48] sm:$0xff] }
 0xdcf   :  { %4431 = vmatmul.mubr.f32.vlgmr.msra.gmra.mrb[36].mxu1 %v6796_v51  ;;  %v5137_v43 = vpack.c.bf16 %v3697_v14, %v3696_v61 }
 0xdd0   :  { %4451 = vmatprep.mubr.msk.f32.mxu1 %vm5664_vm0, %v7006_v63  ;;  %5153 = vmatpush3.bf16.msra.mxu1 %v5152_v8 }
 0xdd1   :  { %5138 = vmatpush1.bf16.msra.mxu0 %v5137_v43  ;;  %5154 = vmatprep.subr.bf16.mxu1 %v7067_v41 }
 0xdd2   :  { %5139 = vmatprep.subr.bf16.mxu0 %v7067_v41 }
 0xdd4   :  { %5156 = vmatpush3.bf16.msra.mxu1 %v5155_v16 }
 0xdd5   :  { %5141 = vmatpush1.bf16.msra.mxu0 %v5140_v31  ;;  %5157 = vmatprep.subr.bf16.mxu1 %v7067_v41 }
 0xdd6   :  { %5142 = vmatprep.subr.bf16.mxu0 %v7067_v41 }
 0xdd8   :  { %5159 = vmatpush3.bf16.msra.mxu1 %v5158_v32 }
 0xdd9   :  { %5144 = vmatpush1.bf16.msra.mxu0 %v5143_v44  ;;  %5160 = vmatprep.subr.bf16.mxu1 %v7067_v41 }
 0xdda   :  { %5145 = vmatprep.subr.bf16.mxu0 %v7067_v41 }
 0xddc   :  { %5162 = vmatpush3.bf16.msra.mxu1 %v5161_v10 }
 0xddd   :  { %5147 = vmatpush1.bf16.msra.mxu0 %v5146_v23  ;;  %4449 = vmatprep.subr.mxu1 %v7006_v63 }
 0xdde   :  { %5148 = vmatprep.subr.bf16.mxu0 %v7067_v41  ;;  %v3795_v41 = vld [vmem:[#allocation17 + $0x40] sm:$0xff] }
 0xde0   :  { %4450 = vmatpush3.msra.mxu1 %v3795_v41 }
 0xde1   :  { %5150 = vmatpush1.bf16.msra.mxu0 %v5149_v58 }
 0xea2   :  { %v3665_v40 = vpop.f32.mrb[36].mxu1 }
 0xea3   :  { %v3669_v25 = vmul.f32 %v3665_v40, %v3665_v40  ;;  %v4432_v49 = vpop.f32.mrb[37].mxu1 }
 0xea5   :  { %v3670_v17 = vmul.f32 %v3669_v25, %v3665_v40 }
 0xea7   :  { %v3671_v33 = vmul.f32 0.044715, %v3670_v17 }
 0xea9   :  { %v3672_v45 = vadd.f32 %v3671_v33, %v3665_v40 }
 0xeab   :  { %v3673_v4 = vmul.f32 0.7978846, %v3672_v45 }
 0xead   :  { %5218 = vtanh.f32 %v3673_v4 }
 0xeb7   :  { %v5219_v19 = vpop.eup %5218 }
 0xeb8   :  { %v3675_v36 = vadd.f32 1.0, %v5219_v19 }
 0xeba   :  { %v3676_v60 = vmul.f32 0.5, %v3675_v36 }
 0xebc   :  { %v3677_v50 = vmul.f32 %v3676_v60, %v3665_v40 }
 0xebe   :  { %v3678_v2 = vmul.f32 %v3677_v50, %v6796_v51 }
 0xec0   :  { %3781 = vmatmul.mubr.f32.vlgmr.msra.gmra.mrb[40].mxu0 %v3678_v2 }
 0xf93   :  { %v3782_v48 = vpop.f32.mrb[40].mxu0 }
 0xf94   :  { %v3783_v30 = vadd.f32 %v3942_v11, %v3782_v48  ;;  %v3784_v35 = vpop.f32.mrb[41].mxu0 }
 0xf96   :  { %v3786_v59 = vadd.f32 %v3783_v30, %v7068_v37 }
 0xf98   :  { %4452 = vmatmul.mubr.msk.f32.vlgmr.msra.gmra.mrb[38].mxu1 %vm470_vm3, %v3786_v59 }
0x106b   :  { %v3872_v1 = vpop.f32.mrb[38].mxu1 }
0x106c   :  { %v3873_v54 = vadd.f32 %v3944_v9, %v3872_v1  ;;  %v4453_v38 = vpop.f32.mrb[39].mxu1 }
0x106e   :  { %3876 = vst.msk [vmem:[%s7069_s20] sm:$0xff] %vm1594_vm5, %v3873_v54  ;;  %3878 = vrot.lane.b32.xlu0 %v3873_v54, %s5651_s3 }
0x10e0   :  { %v3879_v63 = vpop.permute.xlu0 %3878 }
0x10e1   :  { %3882 = vst.msk [vmem:[#allocation29] sm:$0xff] %vm3881_vm6, %v3879_v63 }
0x10e2   :  { %5607 = shalt.err (!%p5604_p0)
}
0x10e3   :  { %s7070_s24 = sld [smem:[#allocation110_spill]] }
0x10e9   :  { %s5608_s21 = scalar_lea.hbm %s7070_s24, 128 }
0x10ea   :  { %p5609_p1 = scmp.ne.s32.totalorder %s7070_s24, %s5608_s21  ;;  %p5612_p2 = scmp.lt.u32.totalorder %s5608_s21, %s7070_s24 }
0x10ec   :  { %p5614_p3 = pnand %p5612_p2, %p5609_p1 }
0x10ee   :  { %5617 = shalt.err (!%p5614_p3)
}
0x10ef   :  { %3894 = dma.vmem_to_hbm [thread:$0]  %s3892_s12, 128, %s7070_s24, [#allocation4]  }
0x10f0   :  { %5636 = dma.done.wait [#allocation4], 128  }
0x10f1   :  { %5637 = vsyncadd [#allocation4], 4294967168 }
0x10f2   :  { %3900 = vsyncpa [#allocation3], 1 }
0x10f3   :  { %3901 = vsyncpa [#allocation6], 1 }
0x10f4   :  { %3902 = vsyncpa [#allocation9], 1 }
0x10f5   :  { %3903 = vsyncpa [#allocation12], 1 }
0x10f6   :  { %3904 = vsyncpa [#allocation15], 1 }
0x10f7   :  { %3905 = vsyncpa [#allocation18], 1 }
0x10f8   :  { %3906 = vsyncpa [#allocation21], 1 }
0x10f9   :  { %3907 = vsyncpa [#allocation24], 1 }
0x10fa   :  { %3908 = vsyncpa [#allocation27], 1 }
0x10fb   :  { %3909 = vsyncpa [#allocation4], 1 }

</bundles_post_ra>
